<compile_context>
chip_gen: v7x
topology: tpu7x:2x2x1
jax: 0.10.0
libtpu: 0.0.40
codegen_flags: <defaults>
</compile_context>

<pallas_src>
import jax
import jax.numpy as jnp
from jax.experimental import pallas as pl
from jax.experimental.pallas import tpu as pltpu

LANES = 128          # channel / output padding (one full lane dim)
IMG = 28             # MNIST-style input, required so the flatten yields 80 features
C1, C2, C3 = 26, 11, 3    # conv output spatial sizes
P1, P2, P3 = 13, 5, 1     # pooled spatial sizes


def _rup(n, m):
    return ((n + m - 1) // m) * m


M1 = _rup(C1 * C1, 8)             # 680: conv1 output rows (flat 26x26)
M2 = _rup(C2 * P1, 8)             # 144: conv2 "full-width" output rows (flat 11x13)
M3 = _rup(C3 * P2, 8)             # 16 : conv3 "full-width" output rows (flat 3x5)
A2 = _rup(2 * P1 + 2 + M2, 8)     # 176: pooled1 buffer rows (13x13 + shift overrun)
A3 = _rup(2 * P2 + 2 + M3, 8)     # 32 : pooled2 buffer rows (5x5  + shift overrun)


# ---------------------------------------------------------------------------
# Fused kernel: conv1+pool -> conv2+pool -> conv3+pool -> fc1 -> fc2 -> fc3
# ---------------------------------------------------------------------------
def _cnn_fused_kernel(x_ref, w1_ref, b1_ref, w2_ref, b2_ref, w3_ref, b3_ref,
                      f1w_ref, f1b_ref, f2w_ref, f2b_ref, f3w_ref, f3b_ref,
                      out_ref,
                      c1_ref, a2_ref, c2_ref, a3_ref, c3_ref):
    f32 = jnp.float32

    # Shift-overrun rows only ever feed discarded outputs, but keep them zero.
    a2_ref[...] = jnp.zeros(a2_ref.shape, f32)
    a3_ref[...] = jnp.zeros(a3_ref.shape, f32)

    def conv3x3(src_ref, w_ref, b_ref, dst_ref, w_in, m_rows):
        # Full-width shift-and-matmul: output flat row r = i*w_in + j accumulates
        # src[r + di*w_in + dj] @ w[di*3+dj].  Columns j >= w_in-2 (and rows past the
        # valid output height) are junk and are never read by the fused pooling.
        acc = jnp.zeros((m_rows, LANES), f32)
        for t in range(9):
            di, dj = divmod(t, 3)
            xs = src_ref[pl.ds(di * w_in + dj, m_rows), :]
            acc = acc + jnp.dot(xs, w_ref[t], preferred_element_type=f32)
        dst_ref[...] = jnp.maximum(acc + b_ref[...], 0.0)

    def pool2x2(src_ref, w_in, hp, wp, dst_ref):
        # 2x2 / stride-2 max pool over the flat (i*w_in + j, C) conv output; pooled
        # rows are written in the flat layout of the next stage (width wp).
        for pi in range(hp):
            r0 = 2 * pi * w_in
            r1 = r0 + w_in
            v = jnp.maximum(
                jnp.maximum(src_ref[pl.ds(r0, wp, stride=2), :],
                            src_ref[pl.ds(r0 + 1, wp, stride=2), :]),
                jnp.maximum(src_ref[pl.ds(r1, wp, stride=2), :],
                            src_ref[pl.ds(r1 + 1, wp, stride=2), :]))
            dst_ref[pl.ds(pi * wp, wp), :] = v

    # ---- Stage 1: conv1 (K = 9 taps zero-padded to 128) + ReLU + pool ----
    x = x_ref[0]                                                    # (M1, 128)
    y1 = jnp.dot(x, w1_ref[...], preferred_element_type=f32) + b1_ref[...]
    c1_ref[...] = jnp.maximum(y1, 0.0)
    pool2x2(c1_ref, C1, P1, P1, a2_ref)

    # ---- Stage 2 / 3: in-VMEM shift-and-matmul conv + ReLU + fused pool ----
    conv3x3(a2_ref, w2_ref, b2_ref, c2_ref, P1, M2)
    pool2x2(c2_ref, P1, P2, P2, a3_ref)
    conv3x3(a3_ref, w3_ref, b3_ref, c3_ref, P2, M3)

    # 3x3 -> 1x1 pool: flat indices 0,1 (image row 0) and P2, P2+1 (image row 1).
    feat = jnp.maximum(
        jnp.maximum(c3_ref[pl.ds(0, 1), :], c3_ref[pl.ds(1, 1), :]),
        jnp.maximum(c3_ref[pl.ds(P2, 1), :], c3_ref[pl.ds(P2 + 1, 1), :]))  # (1,128)

    # ---- Fused fc1 -> fc2 -> fc3 (all padded to 128 lanes) ----
    h = jnp.maximum(
        jnp.dot(feat, f1w_ref[...], preferred_element_type=f32) + f1b_ref[...], 0.0)
    h = jnp.maximum(
        jnp.dot(h, f2w_ref[...], preferred_element_type=f32) + f2b_ref[...], 0.0)
    logits = jnp.dot(h, f3w_ref[...], preferred_element_type=f32) + f3b_ref[...]
    out_ref[...] = jnp.broadcast_to(logits, out_ref.shape)


# ---------------------------------------------------------------------------
# Parameter packing: torch layouts -> lane-dense (…, 128) MXU blocks
# ---------------------------------------------------------------------------
def _pad_to(a, shape):
    return jnp.pad(a, [(0, t - s) for s, t in zip(a.shape, shape)])


def prepare_params(p):
    def conv_w(w):   # (Cout, Cin, 3, 3) -> (9, 128, 128) indexed [tap, cin, cout]
        co, ci = w.shape[0], w.shape[1]
        wk = jnp.transpose(w, (2, 3, 1, 0)).reshape(9, ci, co)
        return _pad_to(wk, (9, LANES, LANES))

    def fc_w(w):     # (out, in) -> (128, 128) indexed [in, out]
        return _pad_to(w.T, (LANES, LANES))

    def bias(b):
        return _pad_to(b.reshape(1, -1), (1, LANES))

    return {
        "w1": _pad_to(p["conv1_w"].reshape(20, 9).T, (LANES, LANES)),  # (9,20)->(128,128)
        "b1": bias(p["conv1_b"]),
        "w2": conv_w(p["conv2_w"]), "b2": bias(p["conv2_b"]),
        "w3": conv_w(p["conv3_w"]), "b3": bias(p["conv3_b"]),
        "f1w": fc_w(p["fc1_w"]), "f1b": bias(p["fc1_b"]),
        "f2w": fc_w(p["fc2_w"]), "f2b": bias(p["fc2_b"]),
        "f3w": fc_w(p["fc3_w"]), "f3b": bias(p["fc3_b"]),
    }


# ---------------------------------------------------------------------------
# Forward pass (mirrors CNN.forward)
# ---------------------------------------------------------------------------
@jax.jit
def cnn_forward(pp, x):
    B = x.shape[0]
    # conv1 has Cin=1, so its im2col is just 9 shifted copies of the image; the 9
    # taps are placed on the lane axis and zero-padded to K=128 (one MXU pass).
    x2 = x[:, 0]                                                      # (B, 28, 28)
    cols = [x2[:, di:di + C1, dj:dj + C1] for di in range(3) for dj in range(3)]
    patches = jnp.stack(cols, axis=-1).reshape(B, C1 * C1, 9)
    x_cols = jnp.pad(patches, ((0, 0), (0, M1 - C1 * C1), (0, LANES - 9)))

    full2d = lambda b: (0, 0)
    full3d = lambda b: (0, 0, 0)
    out = pl.pallas_call(
        _cnn_fused_kernel,
        out_shape=jax.ShapeDtypeStruct((B, 8, LANES), jnp.float32),
        grid=(B,),
        in_specs=[
            pl.BlockSpec((1, M1, LANES), lambda b: (b, 0, 0)),   # im2col'd image
            pl.BlockSpec((LANES, LANES), full2d),                # w1
            pl.BlockSpec((1, LANES), full2d),                    # b1
            pl.BlockSpec((9, LANES, LANES), full3d),             # w2
            pl.BlockSpec((1, LANES), full2d),                    # b2
            pl.BlockSpec((9, LANES, LANES), full3d),             # w3
            pl.BlockSpec((1, LANES), full2d),                    # b3
            pl.BlockSpec((LANES, LANES), full2d),                # fc1 w
            pl.BlockSpec((1, LANES), full2d),                    # fc1 b
            pl.BlockSpec((LANES, LANES), full2d),                # fc2 w
            pl.BlockSpec((1, LANES), full2d),                    # fc2 b
            pl.BlockSpec((LANES, LANES), full2d),                # fc3 w
            pl.BlockSpec((1, LANES), full2d),                    # fc3 b
        ],
        out_specs=pl.BlockSpec((1, 8, LANES), lambda b: (b, 0, 0)),
        scratch_shapes=[
            pltpu.VMEM((M1, LANES), jnp.float32),   # conv1 output (flat 26x26)
            pltpu.VMEM((A2, LANES), jnp.float32),   # pooled1 (flat 13x13 + overrun)
            pltpu.VMEM((M2, LANES), jnp.float32),   # conv2 output (flat 11x13)
            pltpu.VMEM((A3, LANES), jnp.float32),   # pooled2 (flat 5x5 + overrun)
            pltpu.VMEM((M3, LANES), jnp.float32),   # conv3 output (flat 3x5)
        ],
        compiler_params=pltpu.CompilerParams(dimension_semantics=("parallel",)),
    )(x_cols, pp["w1"], pp["b1"], pp["w2"], pp["b2"], pp["w3"], pp["b3"],
      pp["f1w"], pp["f1b"], pp["f2w"], pp["f2b"], pp["f3w"], pp["f3b"])
    return out[:, 0, :10]


# ---------------------------------------------------------------------------
# Deterministic synthetic params (same shapes as the torch module) + reference
# ---------------------------------------------------------------------------
def init_params(key):
    ks = jax.random.split(key, 12)
    s = 0.1
    return {
        "conv1_w": jax.random.normal(ks[0], (20, 1, 3, 3), jnp.float32) * s,
        "conv1_b": jax.random.normal(ks[1], (20,), jnp.float32) * s,
        "conv2_w": jax.random.normal(ks[2], (40, 20, 3, 3), jnp.float32) * s,
        "conv2_b": jax.random.normal(ks[3], (40,), jnp.float32) * s,
        "conv3_w": jax.random.normal(ks[4], (80, 40, 3, 3), jnp.float32) * s,
        "conv3_b": jax.random.normal(ks[5], (80,), jnp.float32) * s,
        "fc1_w": jax.random.normal(ks[6], (40, 80), jnp.float32) * s,
        "fc1_b": jax.random.normal(ks[7], (40,), jnp.float32) * s,
        "fc2_w": jax.random.normal(ks[8], (20, 40), jnp.float32) * s,
        "fc2_b": jax.random.normal(ks[9], (20,), jnp.float32) * s,
        "fc3_w": jax.random.normal(ks[10], (10, 20), jnp.float32) * s,
        "fc3_b": jax.random.normal(ks[11], (10,), jnp.float32) * s,
    }


@jax.jit
def cnn_reference(params, x):
    prec = jax.lax.Precision.HIGHEST

    def conv(x, w, b):
        y = jax.lax.conv_general_dilated(
            x, w, window_strides=(1, 1), padding="VALID",
            dimension_numbers=("NCHW", "OIHW", "NCHW"), precision=prec)
        return jax.nn.relu(y + b[None, :, None, None])

    def pool(x):
        return jax.lax.reduce_window(x, -jnp.inf, jax.lax.max,
                                     (1, 1, 2, 2), (1, 1, 2, 2), "VALID")

    x = pool(conv(x, params["conv1_w"], params["conv1_b"]))
    x = pool(conv(x, params["conv2_w"], params["conv2_b"]))
    x = pool(conv(x, params["conv3_w"], params["conv3_b"]))
    x = x.reshape(x.shape[0], -1)
    x = jax.nn.relu(jnp.dot(x, params["fc1_w"].T, precision=prec) + params["fc1_b"])
    x = jax.nn.relu(jnp.dot(x, params["fc2_w"].T, precision=prec) + params["fc2_b"])
    return jnp.dot(x, params["fc3_w"].T, precision=prec) + params["fc3_b"]


if __name__ == "__main__":
    key = jax.random.PRNGKey(0)
    pkey, xkey = jax.random.split(key)
    params = init_params(pkey)
    padded = prepare_params(params)
    # Input must be 28x28 (MNIST-style) so the flatten yields 80 features.
    x = jax.random.normal(xkey, (4, 1, 28, 28), jnp.float32)

    out = cnn_forward(padded, x)
    jax.block_until_ready(out)
    assert out.shape == (4, 10), out.shape

    ref = cnn_reference(params, x)
    err = float(jnp.max(jnp.abs(out - ref)))
    assert err < 2e-3, f"max abs error vs reference: {err}"
    print("KERNEL_OK")
</pallas_src>

<mosaic_0001>
module attributes {stable_mosaic.version = 11 : i64} {
  func.func @_cnn_fused_kernel(%arg0: i32, %arg1: memref<1x680x128xf32, #tpu.memory_space<vmem>>, %arg2: memref<128x128xf32, #tpu.memory_space<vmem>>, %arg3: memref<1x128xf32, #tpu.memory_space<vmem>>, %arg4: memref<9x128x128xf32, #tpu.memory_space<vmem>>, %arg5: memref<1x128xf32, #tpu.memory_space<vmem>>, %arg6: memref<9x128x128xf32, #tpu.memory_space<vmem>>, %arg7: memref<1x128xf32, #tpu.memory_space<vmem>>, %arg8: memref<128x128xf32, #tpu.memory_space<vmem>>, %arg9: memref<1x128xf32, #tpu.memory_space<vmem>>, %arg10: memref<128x128xf32, #tpu.memory_space<vmem>>, %arg11: memref<1x128xf32, #tpu.memory_space<vmem>>, %arg12: memref<128x128xf32, #tpu.memory_space<vmem>>, %arg13: memref<1x128xf32, #tpu.memory_space<vmem>>, %arg14: memref<1x8x128xf32, #tpu.memory_space<vmem>>, %arg15: memref<680x128xf32, #tpu.memory_space<vmem>>, %arg16: memref<176x128xf32, #tpu.memory_space<vmem>>, %arg17: memref<144x128xf32, #tpu.memory_space<vmem>>, %arg18: memref<32x128xf32, #tpu.memory_space<vmem>>, %arg19: memref<16x128xf32, #tpu.memory_space<vmem>>) attributes {dimension_semantics = [#tpu.dimension_semantics<parallel>], iteration_bounds = array<i64: 4>, scalar_prefetch = 0 : i64, scratch_operands = 5 : i64, tpu.core_type = #tpu.core_type<tc>, window_params = [{transform_indices = @transform_0, window_bounds = array<i64: 1, 680, 128>}, {pipeline_mode = #tpu.pipeline_mode<synchronous>, transform_indices = @transform_1, window_bounds = array<i64: 128, 128>}, {pipeline_mode = #tpu.pipeline_mode<synchronous>, transform_indices = @transform_2, window_bounds = array<i64: 1, 128>}, {pipeline_mode = #tpu.pipeline_mode<synchronous>, transform_indices = @transform_3, window_bounds = array<i64: 9, 128, 128>}, {pipeline_mode = #tpu.pipeline_mode<synchronous>, transform_indices = @transform_4, window_bounds = array<i64: 1, 128>}, {pipeline_mode = #tpu.pipeline_mode<synchronous>, transform_indices = @transform_5, window_bounds = array<i64: 9, 128, 128>}, {pipeline_mode = #tpu.pipeline_mode<synchronous>, transform_indices = @transform_6, window_bounds = array<i64: 1, 128>}, {pipeline_mode = #tpu.pipeline_mode<synchronous>, transform_indices = @transform_7, window_bounds = array<i64: 128, 128>}, {pipeline_mode = #tpu.pipeline_mode<synchronous>, transform_indices = @transform_8, window_bounds = array<i64: 1, 128>}, {pipeline_mode = #tpu.pipeline_mode<synchronous>, transform_indices = @transform_9, window_bounds = array<i64: 128, 128>}, {pipeline_mode = #tpu.pipeline_mode<synchronous>, transform_indices = @transform_10, window_bounds = array<i64: 1, 128>}, {pipeline_mode = #tpu.pipeline_mode<synchronous>, transform_indices = @transform_11, window_bounds = array<i64: 128, 128>}, {pipeline_mode = #tpu.pipeline_mode<synchronous>, transform_indices = @transform_12, window_bounds = array<i64: 1, 128>}, {transform_indices = @transform_13, window_bounds = array<i64: 1, 8, 128>}]} {
    %cst = arith.constant 0.000000e+00 : f32
    %0 = vector.broadcast %cst : f32 to vector<176x128xf32>
    %c0 = arith.constant 0 : index
    %c0_0 = arith.constant 0 : index
    %1 = vector.load %arg16[%c0, %c0_0] : memref<176x128xf32, #tpu.memory_space<vmem>>, vector<176x128xf32>
    tpu.vector_store %arg16[%c0, %c0_0], %0 {strides = array<i32>} : memref<176x128xf32, #tpu.memory_space<vmem>>, vector<176x128xf32>,
    %cst_1 = arith.constant 0.000000e+00 : f32
    %2 = vector.broadcast %cst_1 : f32 to vector<32x128xf32>
    %c0_2 = arith.constant 0 : index
    %c0_3 = arith.constant 0 : index
    %3 = vector.load %arg18[%c0_2, %c0_3] : memref<32x128xf32, #tpu.memory_space<vmem>>, vector<32x128xf32>
    tpu.vector_store %arg18[%c0_2, %c0_3], %2 {strides = array<i32>} : memref<32x128xf32, #tpu.memory_space<vmem>>, vector<32x128xf32>,
    %c0_4 = arith.constant 0 : index
    %c0_5 = arith.constant 0 : index
    %c0_6 = arith.constant 0 : index
    %4 = vector.load %arg1[%c0_4, %c0_5, %c0_6] : memref<1x680x128xf32, #tpu.memory_space<vmem>>, vector<1x680x128xf32>
    %5 = vector.shape_cast %4 : vector<1x680x128xf32> to vector<680x128xf32>
    %c0_7 = arith.constant 0 : index
    %c0_8 = arith.constant 0 : index
    %6 = vector.load %arg2[%c0_7, %c0_8] : memref<128x128xf32, #tpu.memory_space<vmem>>, vector<128x128xf32>
    %cst_9 = arith.constant dense<0.000000e+00> : vector<680x128xf32>
    %7 = tpu.matmul %5, %6, %cst_9 {dimension_numbers = #tpu.dot_dimension_numbers<[1], [0], [0], [1], [0, 0, 1, 1], [], []>} : vector<680x128xf32>, vector<128x128xf32>, vector<680x128xf32> -> vector<680x128xf32>
    %c0_10 = arith.constant 0 : index
    %c0_11 = arith.constant 0 : index
    %8 = vector.load %arg3[%c0_10, %c0_11] : memref<1x128xf32, #tpu.memory_space<vmem>>, vector<1x128xf32>
    %9 = vector.broadcast %8 : vector<1x128xf32> to vector<680x128xf32>
    %10 = arith.addf %7, %9 : vector<680x128xf32>
    %cst_12 = arith.constant 0.000000e+00 : f32
    %11 = vector.broadcast %cst_12 : f32 to vector<680x128xf32>
    %12 = arith.maximumf %10, %11 : vector<680x128xf32>
    %c0_13 = arith.constant 0 : index
    %c0_14 = arith.constant 0 : index
    %13 = vector.load %arg15[%c0_13, %c0_14] : memref<680x128xf32, #tpu.memory_space<vmem>>, vector<680x128xf32>
    tpu.vector_store %arg15[%c0_13, %c0_14], %12 {strides = array<i32>} : memref<680x128xf32, #tpu.memory_space<vmem>>, vector<680x128xf32>,
    %c0_15 = arith.constant 0 : index
    %c0_16 = arith.constant 0 : index
    %14 = tpu.strided_load %arg15[%c0_15, %c0_16] {strides = array<i32: 2, 1>} : memref<680x128xf32, #tpu.memory_space<vmem>>, vector<13x128xf32>
    %c1 = arith.constant 1 : index
    %c0_17 = arith.constant 0 : index
    %15 = tpu.strided_load %arg15[%c1, %c0_17] {strides = array<i32: 2, 1>} : memref<680x128xf32, #tpu.memory_space<vmem>>, vector<13x128xf32>
    %16 = arith.maximumf %14, %15 : vector<13x128xf32>
    %c26 = arith.constant 26 : index
    %c0_18 = arith.constant 0 : index
    %17 = tpu.strided_load %arg15[%c26, %c0_18] {strides = array<i32: 2, 1>} : memref<680x128xf32, #tpu.memory_space<vmem>>, vector<13x128xf32>
    %c27 = arith.constant 27 : index
    %c0_19 = arith.constant 0 : index
    %18 = tpu.strided_load %arg15[%c27, %c0_19] {strides = array<i32: 2, 1>} : memref<680x128xf32, #tpu.memory_space<vmem>>, vector<13x128xf32>
    %19 = arith.maximumf %17, %18 : vector<13x128xf32>
    %20 = arith.maximumf %16, %19 : vector<13x128xf32>
    %c0_20 = arith.constant 0 : index
    %c0_21 = arith.constant 0 : index
    %21 = vector.load %arg16[%c0_20, %c0_21] : memref<176x128xf32, #tpu.memory_space<vmem>>, vector<13x128xf32>
    tpu.vector_store %arg16[%c0_20, %c0_21], %20 {strides = array<i32>} : memref<176x128xf32, #tpu.memory_space<vmem>>, vector<13x128xf32>,
    %c52 = arith.constant 52 : index
    %c0_22 = arith.constant 0 : index
    %22 = tpu.strided_load %arg15[%c52, %c0_22] {strides = array<i32: 2, 1>} : memref<680x128xf32, #tpu.memory_space<vmem>>, vector<13x128xf32>
    %c53 = arith.constant 53 : index
    %c0_23 = arith.constant 0 : index
    %23 = tpu.strided_load %arg15[%c53, %c0_23] {strides = array<i32: 2, 1>} : memref<680x128xf32, #tpu.memory_space<vmem>>, vector<13x128xf32>
    %24 = arith.maximumf %22, %23 : vector<13x128xf32>
    %c78 = arith.constant 78 : index
    %c0_24 = arith.constant 0 : index
    %25 = tpu.strided_load %arg15[%c78, %c0_24] {strides = array<i32: 2, 1>} : memref<680x128xf32, #tpu.memory_space<vmem>>, vector<13x128xf32>
    %c79 = arith.constant 79 : index
    %c0_25 = arith.constant 0 : index
    %26 = tpu.strided_load %arg15[%c79, %c0_25] {strides = array<i32: 2, 1>} : memref<680x128xf32, #tpu.memory_space<vmem>>, vector<13x128xf32>
    %27 = arith.maximumf %25, %26 : vector<13x128xf32>
    %28 = arith.maximumf %24, %27 : vector<13x128xf32>
    %c13 = arith.constant 13 : index
    %c0_26 = arith.constant 0 : index
    %29 = vector.load %arg16[%c13, %c0_26] : memref<176x128xf32, #tpu.memory_space<vmem>>, vector<13x128xf32>
    tpu.vector_store %arg16[%c13, %c0_26], %28 {strides = array<i32>} : memref<176x128xf32, #tpu.memory_space<vmem>>, vector<13x128xf32>,
    %c104 = arith.constant 104 : index
    %c0_27 = arith.constant 0 : index
    %30 = tpu.strided_load %arg15[%c104, %c0_27] {strides = array<i32: 2, 1>} : memref<680x128xf32, #tpu.memory_space<vmem>>, vector<13x128xf32>
    %c105 = arith.constant 105 : index
    %c0_28 = arith.constant 0 : index
    %31 = tpu.strided_load %arg15[%c105, %c0_28] {strides = array<i32: 2, 1>} : memref<680x128xf32, #tpu.memory_space<vmem>>, vector<13x128xf32>
    %32 = arith.maximumf %30, %31 : vector<13x128xf32>
    %c130 = arith.constant 130 : index
    %c0_29 = arith.constant 0 : index
    %33 = tpu.strided_load %arg15[%c130, %c0_29] {strides = array<i32: 2, 1>} : memref<680x128xf32, #tpu.memory_space<vmem>>, vector<13x128xf32>
    %c131 = arith.constant 131 : index
    %c0_30 = arith.constant 0 : index
    %34 = tpu.strided_load %arg15[%c131, %c0_30] {strides = array<i32: 2, 1>} : memref<680x128xf32, #tpu.memory_space<vmem>>, vector<13x128xf32>
    %35 = arith.maximumf %33, %34 : vector<13x128xf32>
    %36 = arith.maximumf %32, %35 : vector<13x128xf32>
    %c26_31 = arith.constant 26 : index
    %c0_32 = arith.constant 0 : index
    %37 = vector.load %arg16[%c26_31, %c0_32] : memref<176x128xf32, #tpu.memory_space<vmem>>, vector<13x128xf32>
    tpu.vector_store %arg16[%c26_31, %c0_32], %36 {strides = array<i32>} : memref<176x128xf32, #tpu.memory_space<vmem>>, vector<13x128xf32>,
    %c156 = arith.constant 156 : index
    %c0_33 = arith.constant 0 : index
    %38 = tpu.strided_load %arg15[%c156, %c0_33] {strides = array<i32: 2, 1>} : memref<680x128xf32, #tpu.memory_space<vmem>>, vector<13x128xf32>
    %c157 = arith.constant 157 : index
    %c0_34 = arith.constant 0 : index
    %39 = tpu.strided_load %arg15[%c157, %c0_34] {strides = array<i32: 2, 1>} : memref<680x128xf32, #tpu.memory_space<vmem>>, vector<13x128xf32>
    %40 = arith.maximumf %38, %39 : vector<13x128xf32>
    %c182 = arith.constant 182 : index
    %c0_35 = arith.constant 0 : index
    %41 = tpu.strided_load %arg15[%c182, %c0_35] {strides = array<i32: 2, 1>} : memref<680x128xf32, #tpu.memory_space<vmem>>, vector<13x128xf32>
    %c183 = arith.constant 183 : index
    %c0_36 = arith.constant 0 : index
    %42 = tpu.strided_load %arg15[%c183, %c0_36] {strides = array<i32: 2, 1>} : memref<680x128xf32, #tpu.memory_space<vmem>>, vector<13x128xf32>
    %43 = arith.maximumf %41, %42 : vector<13x128xf32>
    %44 = arith.maximumf %40, %43 : vector<13x128xf32>
    %c39 = arith.constant 39 : index
    %c0_37 = arith.constant 0 : index
    %45 = vector.load %arg16[%c39, %c0_37] : memref<176x128xf32, #tpu.memory_space<vmem>>, vector<13x128xf32>
    tpu.vector_store %arg16[%c39, %c0_37], %44 {strides = array<i32>} : memref<176x128xf32, #tpu.memory_space<vmem>>, vector<13x128xf32>,
    %c208 = arith.constant 208 : index
    %c0_38 = arith.constant 0 : index
    %46 = tpu.strided_load %arg15[%c208, %c0_38] {strides = array<i32: 2, 1>} : memref<680x128xf32, #tpu.memory_space<vmem>>, vector<13x128xf32>
    %c209 = arith.constant 209 : index
    %c0_39 = arith.constant 0 : index
    %47 = tpu.strided_load %arg15[%c209, %c0_39] {strides = array<i32: 2, 1>} : memref<680x128xf32, #tpu.memory_space<vmem>>, vector<13x128xf32>
    %48 = arith.maximumf %46, %47 : vector<13x128xf32>
    %c234 = arith.constant 234 : index
    %c0_40 = arith.constant 0 : index
    %49 = tpu.strided_load %arg15[%c234, %c0_40] {strides = array<i32: 2, 1>} : memref<680x128xf32, #tpu.memory_space<vmem>>, vector<13x128xf32>
    %c235 = arith.constant 235 : index
    %c0_41 = arith.constant 0 : index
    %50 = tpu.strided_load %arg15[%c235, %c0_41] {strides = array<i32: 2, 1>} : memref<680x128xf32, #tpu.memory_space<vmem>>, vector<13x128xf32>
    %51 = arith.maximumf %49, %50 : vector<13x128xf32>
    %52 = arith.maximumf %48, %51 : vector<13x128xf32>
    %c52_42 = arith.constant 52 : index
    %c0_43 = arith.constant 0 : index
    %53 = vector.load %arg16[%c52_42, %c0_43] : memref<176x128xf32, #tpu.memory_space<vmem>>, vector<13x128xf32>
    tpu.vector_store %arg16[%c52_42, %c0_43], %52 {strides = array<i32>} : memref<176x128xf32, #tpu.memory_space<vmem>>, vector<13x128xf32>,
    %c260 = arith.constant 260 : index
    %c0_44 = arith.constant 0 : index
    %54 = tpu.strided_load %arg15[%c260, %c0_44] {strides = array<i32: 2, 1>} : memref<680x128xf32, #tpu.memory_space<vmem>>, vector<13x128xf32>
    %c261 = arith.constant 261 : index
    %c0_45 = arith.constant 0 : index
    %55 = tpu.strided_load %arg15[%c261, %c0_45] {strides = array<i32: 2, 1>} : memref<680x128xf32, #tpu.memory_space<vmem>>, vector<13x128xf32>
    %56 = arith.maximumf %54, %55 : vector<13x128xf32>
    %c286 = arith.constant 286 : index
    %c0_46 = arith.constant 0 : index
    %57 = tpu.strided_load %arg15[%c286, %c0_46] {strides = array<i32: 2, 1>} : memref<680x128xf32, #tpu.memory_space<vmem>>, vector<13x128xf32>
    %c287 = arith.constant 287 : index
    %c0_47 = arith.constant 0 : index
    %58 = tpu.strided_load %arg15[%c287, %c0_47] {strides = array<i32: 2, 1>} : memref<680x128xf32, #tpu.memory_space<vmem>>, vector<13x128xf32>
    %59 = arith.maximumf %57, %58 : vector<13x128xf32>
    %60 = arith.maximumf %56, %59 : vector<13x128xf32>
    %c65 = arith.constant 65 : index
    %c0_48 = arith.constant 0 : index
    %61 = vector.load %arg16[%c65, %c0_48] : memref<176x128xf32, #tpu.memory_space<vmem>>, vector<13x128xf32>
    tpu.vector_store %arg16[%c65, %c0_48], %60 {strides = array<i32>} : memref<176x128xf32, #tpu.memory_space<vmem>>, vector<13x128xf32>,
    %c312 = arith.constant 312 : index
    %c0_49 = arith.constant 0 : index
    %62 = tpu.strided_load %arg15[%c312, %c0_49] {strides = array<i32: 2, 1>} : memref<680x128xf32, #tpu.memory_space<vmem>>, vector<13x128xf32>
    %c313 = arith.constant 313 : index
    %c0_50 = arith.constant 0 : index
    %63 = tpu.strided_load %arg15[%c313, %c0_50] {strides = array<i32: 2, 1>} : memref<680x128xf32, #tpu.memory_space<vmem>>, vector<13x128xf32>
    %64 = arith.maximumf %62, %63 : vector<13x128xf32>
    %c338 = arith.constant 338 : index
    %c0_51 = arith.constant 0 : index
    %65 = tpu.strided_load %arg15[%c338, %c0_51] {strides = array<i32: 2, 1>} : memref<680x128xf32, #tpu.memory_space<vmem>>, vector<13x128xf32>
    %c339 = arith.constant 339 : index
    %c0_52 = arith.constant 0 : index
    %66 = tpu.strided_load %arg15[%c339, %c0_52] {strides = array<i32: 2, 1>} : memref<680x128xf32, #tpu.memory_space<vmem>>, vector<13x128xf32>
    %67 = arith.maximumf %65, %66 : vector<13x128xf32>
    %68 = arith.maximumf %64, %67 : vector<13x128xf32>
    %c78_53 = arith.constant 78 : index
    %c0_54 = arith.constant 0 : index
    %69 = vector.load %arg16[%c78_53, %c0_54] : memref<176x128xf32, #tpu.memory_space<vmem>>, vector<13x128xf32>
    tpu.vector_store %arg16[%c78_53, %c0_54], %68 {strides = array<i32>} : memref<176x128xf32, #tpu.memory_space<vmem>>, vector<13x128xf32>,
    %c364 = arith.constant 364 : index
    %c0_55 = arith.constant 0 : index
    %70 = tpu.strided_load %arg15[%c364, %c0_55] {strides = array<i32: 2, 1>} : memref<680x128xf32, #tpu.memory_space<vmem>>, vector<13x128xf32>
    %c365 = arith.constant 365 : index
    %c0_56 = arith.constant 0 : index
    %71 = tpu.strided_load %arg15[%c365, %c0_56] {strides = array<i32: 2, 1>} : memref<680x128xf32, #tpu.memory_space<vmem>>, vector<13x128xf32>
    %72 = arith.maximumf %70, %71 : vector<13x128xf32>
    %c390 = arith.constant 390 : index
    %c0_57 = arith.constant 0 : index
    %73 = tpu.strided_load %arg15[%c390, %c0_57] {strides = array<i32: 2, 1>} : memref<680x128xf32, #tpu.memory_space<vmem>>, vector<13x128xf32>
    %c391 = arith.constant 391 : index
    %c0_58 = arith.constant 0 : index
    %74 = tpu.strided_load %arg15[%c391, %c0_58] {strides = array<i32: 2, 1>} : memref<680x128xf32, #tpu.memory_space<vmem>>, vector<13x128xf32>
    %75 = arith.maximumf %73, %74 : vector<13x128xf32>
    %76 = arith.maximumf %72, %75 : vector<13x128xf32>
    %c91 = arith.constant 91 : index
    %c0_59 = arith.constant 0 : index
    %77 = vector.load %arg16[%c91, %c0_59] : memref<176x128xf32, #tpu.memory_space<vmem>>, vector<13x128xf32>
    tpu.vector_store %arg16[%c91, %c0_59], %76 {strides = array<i32>} : memref<176x128xf32, #tpu.memory_space<vmem>>, vector<13x128xf32>,
    %c416 = arith.constant 416 : index
    %c0_60 = arith.constant 0 : index
    %78 = tpu.strided_load %arg15[%c416, %c0_60] {strides = array<i32: 2, 1>} : memref<680x128xf32, #tpu.memory_space<vmem>>, vector<13x128xf32>
    %c417 = arith.constant 417 : index
    %c0_61 = arith.constant 0 : index
    %79 = tpu.strided_load %arg15[%c417, %c0_61] {strides = array<i32: 2, 1>} : memref<680x128xf32, #tpu.memory_space<vmem>>, vector<13x128xf32>
    %80 = arith.maximumf %78, %79 : vector<13x128xf32>
    %c442 = arith.constant 442 : index
    %c0_62 = arith.constant 0 : index
    %81 = tpu.strided_load %arg15[%c442, %c0_62] {strides = array<i32: 2, 1>} : memref<680x128xf32, #tpu.memory_space<vmem>>, vector<13x128xf32>
    %c443 = arith.constant 443 : index
    %c0_63 = arith.constant 0 : index
    %82 = tpu.strided_load %arg15[%c443, %c0_63] {strides = array<i32: 2, 1>} : memref<680x128xf32, #tpu.memory_space<vmem>>, vector<13x128xf32>
    %83 = arith.maximumf %81, %82 : vector<13x128xf32>
    %84 = arith.maximumf %80, %83 : vector<13x128xf32>
    %c104_64 = arith.constant 104 : index
    %c0_65 = arith.constant 0 : index
    %85 = vector.load %arg16[%c104_64, %c0_65] : memref<176x128xf32, #tpu.memory_space<vmem>>, vector<13x128xf32>
    tpu.vector_store %arg16[%c104_64, %c0_65], %84 {strides = array<i32>} : memref<176x128xf32, #tpu.memory_space<vmem>>, vector<13x128xf32>,
    %c468 = arith.constant 468 : index
    %c0_66 = arith.constant 0 : index
    %86 = tpu.strided_load %arg15[%c468, %c0_66] {strides = array<i32: 2, 1>} : memref<680x128xf32, #tpu.memory_space<vmem>>, vector<13x128xf32>
    %c469 = arith.constant 469 : index
    %c0_67 = arith.constant 0 : index
    %87 = tpu.strided_load %arg15[%c469, %c0_67] {strides = array<i32: 2, 1>} : memref<680x128xf32, #tpu.memory_space<vmem>>, vector<13x128xf32>
    %88 = arith.maximumf %86, %87 : vector<13x128xf32>
    %c494 = arith.constant 494 : index
    %c0_68 = arith.constant 0 : index
    %89 = tpu.strided_load %arg15[%c494, %c0_68] {strides = array<i32: 2, 1>} : memref<680x128xf32, #tpu.memory_space<vmem>>, vector<13x128xf32>
    %c495 = arith.constant 495 : index
    %c0_69 = arith.constant 0 : index
    %90 = tpu.strided_load %arg15[%c495, %c0_69] {strides = array<i32: 2, 1>} : memref<680x128xf32, #tpu.memory_space<vmem>>, vector<13x128xf32>
    %91 = arith.maximumf %89, %90 : vector<13x128xf32>
    %92 = arith.maximumf %88, %91 : vector<13x128xf32>
    %c117 = arith.constant 117 : index
    %c0_70 = arith.constant 0 : index
    %93 = vector.load %arg16[%c117, %c0_70] : memref<176x128xf32, #tpu.memory_space<vmem>>, vector<13x128xf32>
    tpu.vector_store %arg16[%c117, %c0_70], %92 {strides = array<i32>} : memref<176x128xf32, #tpu.memory_space<vmem>>, vector<13x128xf32>,
    %c520 = arith.constant 520 : index
    %c0_71 = arith.constant 0 : index
    %94 = tpu.strided_load %arg15[%c520, %c0_71] {strides = array<i32: 2, 1>} : memref<680x128xf32, #tpu.memory_space<vmem>>, vector<13x128xf32>
    %c521 = arith.constant 521 : index
    %c0_72 = arith.constant 0 : index
    %95 = tpu.strided_load %arg15[%c521, %c0_72] {strides = array<i32: 2, 1>} : memref<680x128xf32, #tpu.memory_space<vmem>>, vector<13x128xf32>
    %96 = arith.maximumf %94, %95 : vector<13x128xf32>
    %c546 = arith.constant 546 : index
    %c0_73 = arith.constant 0 : index
    %97 = tpu.strided_load %arg15[%c546, %c0_73] {strides = array<i32: 2, 1>} : memref<680x128xf32, #tpu.memory_space<vmem>>, vector<13x128xf32>
    %c547 = arith.constant 547 : index
    %c0_74 = arith.constant 0 : index
    %98 = tpu.strided_load %arg15[%c547, %c0_74] {strides = array<i32: 2, 1>} : memref<680x128xf32, #tpu.memory_space<vmem>>, vector<13x128xf32>
    %99 = arith.maximumf %97, %98 : vector<13x128xf32>
    %100 = arith.maximumf %96, %99 : vector<13x128xf32>
    %c130_75 = arith.constant 130 : index
    %c0_76 = arith.constant 0 : index
    %101 = vector.load %arg16[%c130_75, %c0_76] : memref<176x128xf32, #tpu.memory_space<vmem>>, vector<13x128xf32>
    tpu.vector_store %arg16[%c130_75, %c0_76], %100 {strides = array<i32>} : memref<176x128xf32, #tpu.memory_space<vmem>>, vector<13x128xf32>,
    %c572 = arith.constant 572 : index
    %c0_77 = arith.constant 0 : index
    %102 = tpu.strided_load %arg15[%c572, %c0_77] {strides = array<i32: 2, 1>} : memref<680x128xf32, #tpu.memory_space<vmem>>, vector<13x128xf32>
    %c573 = arith.constant 573 : index
    %c0_78 = arith.constant 0 : index
    %103 = tpu.strided_load %arg15[%c573, %c0_78] {strides = array<i32: 2, 1>} : memref<680x128xf32, #tpu.memory_space<vmem>>, vector<13x128xf32>
    %104 = arith.maximumf %102, %103 : vector<13x128xf32>
    %c598 = arith.constant 598 : index
    %c0_79 = arith.constant 0 : index
    %105 = tpu.strided_load %arg15[%c598, %c0_79] {strides = array<i32: 2, 1>} : memref<680x128xf32, #tpu.memory_space<vmem>>, vector<13x128xf32>
    %c599 = arith.constant 599 : index
    %c0_80 = arith.constant 0 : index
    %106 = tpu.strided_load %arg15[%c599, %c0_80] {strides = array<i32: 2, 1>} : memref<680x128xf32, #tpu.memory_space<vmem>>, vector<13x128xf32>
    %107 = arith.maximumf %105, %106 : vector<13x128xf32>
    %108 = arith.maximumf %104, %107 : vector<13x128xf32>
    %c143 = arith.constant 143 : index
    %c0_81 = arith.constant 0 : index
    %109 = vector.load %arg16[%c143, %c0_81] : memref<176x128xf32, #tpu.memory_space<vmem>>, vector<13x128xf32>
    tpu.vector_store %arg16[%c143, %c0_81], %108 {strides = array<i32>} : memref<176x128xf32, #tpu.memory_space<vmem>>, vector<13x128xf32>,
    %c624 = arith.constant 624 : index
    %c0_82 = arith.constant 0 : index
    %110 = tpu.strided_load %arg15[%c624, %c0_82] {strides = array<i32: 2, 1>} : memref<680x128xf32, #tpu.memory_space<vmem>>, vector<13x128xf32>
    %c625 = arith.constant 625 : index
    %c0_83 = arith.constant 0 : index
    %111 = tpu.strided_load %arg15[%c625, %c0_83] {strides = array<i32: 2, 1>} : memref<680x128xf32, #tpu.memory_space<vmem>>, vector<13x128xf32>
    %112 = arith.maximumf %110, %111 : vector<13x128xf32>
    %c650 = arith.constant 650 : index
    %c0_84 = arith.constant 0 : index
    %113 = tpu.strided_load %arg15[%c650, %c0_84] {strides = array<i32: 2, 1>} : memref<680x128xf32, #tpu.memory_space<vmem>>, vector<13x128xf32>
    %c651 = arith.constant 651 : index
    %c0_85 = arith.constant 0 : index
    %114 = tpu.strided_load %arg15[%c651, %c0_85] {strides = array<i32: 2, 1>} : memref<680x128xf32, #tpu.memory_space<vmem>>, vector<13x128xf32>
    %115 = arith.maximumf %113, %114 : vector<13x128xf32>
    %116 = arith.maximumf %112, %115 : vector<13x128xf32>
    %c156_86 = arith.constant 156 : index
    %c0_87 = arith.constant 0 : index
    %117 = vector.load %arg16[%c156_86, %c0_87] : memref<176x128xf32, #tpu.memory_space<vmem>>, vector<13x128xf32>
    tpu.vector_store %arg16[%c156_86, %c0_87], %116 {strides = array<i32>} : memref<176x128xf32, #tpu.memory_space<vmem>>, vector<13x128xf32>,
    %cst_88 = arith.constant 0.000000e+00 : f32
    %118 = vector.broadcast %cst_88 : f32 to vector<144x128xf32>
    %c0_89 = arith.constant 0 : index
    %c0_90 = arith.constant 0 : index
    %119 = vector.load %arg16[%c0_89, %c0_90] : memref<176x128xf32, #tpu.memory_space<vmem>>, vector<144x128xf32>
    %c0_91 = arith.constant 0 : index
    %c0_92 = arith.constant 0 : index
    %c0_93 = arith.constant 0 : index
    %120 = vector.load %arg4[%c0_91, %c0_92, %c0_93] : memref<9x128x128xf32, #tpu.memory_space<vmem>>, vector<1x128x128xf32>
    %121 = vector.shape_cast %120 : vector<1x128x128xf32> to vector<128x128xf32>
    %cst_94 = arith.constant dense<0.000000e+00> : vector<144x128xf32>
    %122 = tpu.matmul %119, %121, %cst_94 {dimension_numbers = #tpu.dot_dimension_numbers<[1], [0], [0], [1], [0, 0, 1, 1], [], []>} : vector<144x128xf32>, vector<128x128xf32>, vector<144x128xf32> -> vector<144x128xf32>
    %123 = arith.addf %118, %122 : vector<144x128xf32>
    %c1_95 = arith.constant 1 : index
    %c0_96 = arith.constant 0 : index
    %124 = vector.load %arg16[%c1_95, %c0_96] : memref<176x128xf32, #tpu.memory_space<vmem>>, vector<144x128xf32>
    %c1_97 = arith.constant 1 : index
    %c0_98 = arith.constant 0 : index
    %c0_99 = arith.constant 0 : index
    %125 = vector.load %arg4[%c1_97, %c0_98, %c0_99] : memref<9x128x128xf32, #tpu.memory_space<vmem>>, vector<1x128x128xf32>
    %126 = vector.shape_cast %125 : vector<1x128x128xf32> to vector<128x128xf32>
    %cst_100 = arith.constant dense<0.000000e+00> : vector<144x128xf32>
    %127 = tpu.matmul %124, %126, %cst_100 {dimension_numbers = #tpu.dot_dimension_numbers<[1], [0], [0], [1], [0, 0, 1, 1], [], []>} : vector<144x128xf32>, vector<128x128xf32>, vector<144x128xf32> -> vector<144x128xf32>
    %128 = arith.addf %123, %127 : vector<144x128xf32>
    %c2 = arith.constant 2 : index
    %c0_101 = arith.constant 0 : index
    %129 = vector.load %arg16[%c2, %c0_101] : memref<176x128xf32, #tpu.memory_space<vmem>>, vector<144x128xf32>
    %c2_102 = arith.constant 2 : index
    %c0_103 = arith.constant 0 : index
    %c0_104 = arith.constant 0 : index
    %130 = vector.load %arg4[%c2_102, %c0_103, %c0_104] : memref<9x128x128xf32, #tpu.memory_space<vmem>>, vector<1x128x128xf32>
    %131 = vector.shape_cast %130 : vector<1x128x128xf32> to vector<128x128xf32>
    %cst_105 = arith.constant dense<0.000000e+00> : vector<144x128xf32>
    %132 = tpu.matmul %129, %131, %cst_105 {dimension_numbers = #tpu.dot_dimension_numbers<[1], [0], [0], [1], [0, 0, 1, 1], [], []>} : vector<144x128xf32>, vector<128x128xf32>, vector<144x128xf32> -> vector<144x128xf32>
    %133 = arith.addf %128, %132 : vector<144x128xf32>
    %c13_106 = arith.constant 13 : index
    %c0_107 = arith.constant 0 : index
    %134 = vector.load %arg16[%c13_106, %c0_107] : memref<176x128xf32, #tpu.memory_space<vmem>>, vector<144x128xf32>
    %c3 = arith.constant 3 : index
    %c0_108 = arith.constant 0 : index
    %c0_109 = arith.constant 0 : index
    %135 = vector.load %arg4[%c3, %c0_108, %c0_109] : memref<9x128x128xf32, #tpu.memory_space<vmem>>, vector<1x128x128xf32>
    %136 = vector.shape_cast %135 : vector<1x128x128xf32> to vector<128x128xf32>
    %cst_110 = arith.constant dense<0.000000e+00> : vector<144x128xf32>
    %137 = tpu.matmul %134, %136, %cst_110 {dimension_numbers = #tpu.dot_dimension_numbers<[1], [0], [0], [1], [0, 0, 1, 1], [], []>} : vector<144x128xf32>, vector<128x128xf32>, vector<144x128xf32> -> vector<144x128xf32>
    %138 = arith.addf %133, %137 : vector<144x128xf32>
    %c14 = arith.constant 14 : index
    %c0_111 = arith.constant 0 : index
    %139 = vector.load %arg16[%c14, %c0_111] : memref<176x128xf32, #tpu.memory_space<vmem>>, vector<144x128xf32>
    %c4 = arith.constant 4 : index
    %c0_112 = arith.constant 0 : index
    %c0_113 = arith.constant 0 : index
    %140 = vector.load %arg4[%c4, %c0_112, %c0_113] : memref<9x128x128xf32, #tpu.memory_space<vmem>>, vector<1x128x128xf32>
    %141 = vector.shape_cast %140 : vector<1x128x128xf32> to vector<128x128xf32>
    %cst_114 = arith.constant dense<0.000000e+00> : vector<144x128xf32>
    %142 = tpu.matmul %139, %141, %cst_114 {dimension_numbers = #tpu.dot_dimension_numbers<[1], [0], [0], [1], [0, 0, 1, 1], [], []>} : vector<144x128xf32>, vector<128x128xf32>, vector<144x128xf32> -> vector<144x128xf32>
    %143 = arith.addf %138, %142 : vector<144x128xf32>
    %c15 = arith.constant 15 : index
    %c0_115 = arith.constant 0 : index
    %144 = vector.load %arg16[%c15, %c0_115] : memref<176x128xf32, #tpu.memory_space<vmem>>, vector<144x128xf32>
    %c5 = arith.constant 5 : index
    %c0_116 = arith.constant 0 : index
    %c0_117 = arith.constant 0 : index
    %145 = vector.load %arg4[%c5, %c0_116, %c0_117] : memref<9x128x128xf32, #tpu.memory_space<vmem>>, vector<1x128x128xf32>
    %146 = vector.shape_cast %145 : vector<1x128x128xf32> to vector<128x128xf32>
    %cst_118 = arith.constant dense<0.000000e+00> : vector<144x128xf32>
    %147 = tpu.matmul %144, %146, %cst_118 {dimension_numbers = #tpu.dot_dimension_numbers<[1], [0], [0], [1], [0, 0, 1, 1], [], []>} : vector<144x128xf32>, vector<128x128xf32>, vector<144x128xf32> -> vector<144x128xf32>
    %148 = arith.addf %143, %147 : vector<144x128xf32>
    %c26_119 = arith.constant 26 : index
    %c0_120 = arith.constant 0 : index
    %149 = vector.load %arg16[%c26_119, %c0_120] : memref<176x128xf32, #tpu.memory_space<vmem>>, vector<144x128xf32>
    %c6 = arith.constant 6 : index
    %c0_121 = arith.constant 0 : index
    %c0_122 = arith.constant 0 : index
    %150 = vector.load %arg4[%c6, %c0_121, %c0_122] : memref<9x128x128xf32, #tpu.memory_space<vmem>>, vector<1x128x128xf32>
    %151 = vector.shape_cast %150 : vector<1x128x128xf32> to vector<128x128xf32>
    %cst_123 = arith.constant dense<0.000000e+00> : vector<144x128xf32>
    %152 = tpu.matmul %149, %151, %cst_123 {dimension_numbers = #tpu.dot_dimension_numbers<[1], [0], [0], [1], [0, 0, 1, 1], [], []>} : vector<144x128xf32>, vector<128x128xf32>, vector<144x128xf32> -> vector<144x128xf32>
    %153 = arith.addf %148, %152 : vector<144x128xf32>
    %c27_124 = arith.constant 27 : index
    %c0_125 = arith.constant 0 : index
    %154 = vector.load %arg16[%c27_124, %c0_125] : memref<176x128xf32, #tpu.memory_space<vmem>>, vector<144x128xf32>
    %c7 = arith.constant 7 : index
    %c0_126 = arith.constant 0 : index
    %c0_127 = arith.constant 0 : index
    %155 = vector.load %arg4[%c7, %c0_126, %c0_127] : memref<9x128x128xf32, #tpu.memory_space<vmem>>, vector<1x128x128xf32>
    %156 = vector.shape_cast %155 : vector<1x128x128xf32> to vector<128x128xf32>
    %cst_128 = arith.constant dense<0.000000e+00> : vector<144x128xf32>
    %157 = tpu.matmul %154, %156, %cst_128 {dimension_numbers = #tpu.dot_dimension_numbers<[1], [0], [0], [1], [0, 0, 1, 1], [], []>} : vector<144x128xf32>, vector<128x128xf32>, vector<144x128xf32> -> vector<144x128xf32>
    %158 = arith.addf %153, %157 : vector<144x128xf32>
    %c28 = arith.constant 28 : index
    %c0_129 = arith.constant 0 : index
    %159 = vector.load %arg16[%c28, %c0_129] : memref<176x128xf32, #tpu.memory_space<vmem>>, vector<144x128xf32>
    %c8 = arith.constant 8 : index
    %c0_130 = arith.constant 0 : index
    %c0_131 = arith.constant 0 : index
    %160 = vector.load %arg4[%c8, %c0_130, %c0_131] : memref<9x128x128xf32, #tpu.memory_space<vmem>>, vector<1x128x128xf32>
    %161 = vector.shape_cast %160 : vector<1x128x128xf32> to vector<128x128xf32>
    %cst_132 = arith.constant dense<0.000000e+00> : vector<144x128xf32>
    %162 = tpu.matmul %159, %161, %cst_132 {dimension_numbers = #tpu.dot_dimension_numbers<[1], [0], [0], [1], [0, 0, 1, 1], [], []>} : vector<144x128xf32>, vector<128x128xf32>, vector<144x128xf32> -> vector<144x128xf32>
    %163 = arith.addf %158, %162 : vector<144x128xf32>
    %c0_133 = arith.constant 0 : index
    %c0_134 = arith.constant 0 : index
    %164 = vector.load %arg5[%c0_133, %c0_134] : memref<1x128xf32, #tpu.memory_space<vmem>>, vector<1x128xf32>
    %165 = vector.broadcast %164 : vector<1x128xf32> to vector<144x128xf32>
    %166 = arith.addf %163, %165 : vector<144x128xf32>
    %cst_135 = arith.constant 0.000000e+00 : f32
    %167 = vector.broadcast %cst_135 : f32 to vector<144x128xf32>
    %168 = arith.maximumf %166, %167 : vector<144x128xf32>
    %c0_136 = arith.constant 0 : index
    %c0_137 = arith.constant 0 : index
    %169 = vector.load %arg17[%c0_136, %c0_137] : memref<144x128xf32, #tpu.memory_space<vmem>>, vector<144x128xf32>
    tpu.vector_store %arg17[%c0_136, %c0_137], %168 {strides = array<i32>} : memref<144x128xf32, #tpu.memory_space<vmem>>, vector<144x128xf32>,
    %c0_138 = arith.constant 0 : index
    %c0_139 = arith.constant 0 : index
    %170 = tpu.strided_load %arg17[%c0_138, %c0_139] {strides = array<i32: 2, 1>} : memref<144x128xf32, #tpu.memory_space<vmem>>, vector<5x128xf32>
    %c1_140 = arith.constant 1 : index
    %c0_141 = arith.constant 0 : index
    %171 = tpu.strided_load %arg17[%c1_140, %c0_141] {strides = array<i32: 2, 1>} : memref<144x128xf32, #tpu.memory_space<vmem>>, vector<5x128xf32>
    %172 = arith.maximumf %170, %171 : vector<5x128xf32>
    %c13_142 = arith.constant 13 : index
    %c0_143 = arith.constant 0 : index
    %173 = tpu.strided_load %arg17[%c13_142, %c0_143] {strides = array<i32: 2, 1>} : memref<144x128xf32, #tpu.memory_space<vmem>>, vector<5x128xf32>
    %c14_144 = arith.constant 14 : index
    %c0_145 = arith.constant 0 : index
    %174 = tpu.strided_load %arg17[%c14_144, %c0_145] {strides = array<i32: 2, 1>} : memref<144x128xf32, #tpu.memory_space<vmem>>, vector<5x128xf32>
    %175 = arith.maximumf %173, %174 : vector<5x128xf32>
    %176 = arith.maximumf %172, %175 : vector<5x128xf32>
    %c0_146 = arith.constant 0 : index
    %c0_147 = arith.constant 0 : index
    %177 = vector.load %arg18[%c0_146, %c0_147] : memref<32x128xf32, #tpu.memory_space<vmem>>, vector<5x128xf32>
    tpu.vector_store %arg18[%c0_146, %c0_147], %176 {strides = array<i32>} : memref<32x128xf32, #tpu.memory_space<vmem>>, vector<5x128xf32>,
    %c26_148 = arith.constant 26 : index
    %c0_149 = arith.constant 0 : index
    %178 = tpu.strided_load %arg17[%c26_148, %c0_149] {strides = array<i32: 2, 1>} : memref<144x128xf32, #tpu.memory_space<vmem>>, vector<5x128xf32>
    %c27_150 = arith.constant 27 : index
    %c0_151 = arith.constant 0 : index
    %179 = tpu.strided_load %arg17[%c27_150, %c0_151] {strides = array<i32: 2, 1>} : memref<144x128xf32, #tpu.memory_space<vmem>>, vector<5x128xf32>
    %180 = arith.maximumf %178, %179 : vector<5x128xf32>
    %c39_152 = arith.constant 39 : index
    %c0_153 = arith.constant 0 : index
    %181 = tpu.strided_load %arg17[%c39_152, %c0_153] {strides = array<i32: 2, 1>} : memref<144x128xf32, #tpu.memory_space<vmem>>, vector<5x128xf32>
    %c40 = arith.constant 40 : index
    %c0_154 = arith.constant 0 : index
    %182 = tpu.strided_load %arg17[%c40, %c0_154] {strides = array<i32: 2, 1>} : memref<144x128xf32, #tpu.memory_space<vmem>>, vector<5x128xf32>
    %183 = arith.maximumf %181, %182 : vector<5x128xf32>
    %184 = arith.maximumf %180, %183 : vector<5x128xf32>
    %c5_155 = arith.constant 5 : index
    %c0_156 = arith.constant 0 : index
    %185 = vector.load %arg18[%c5_155, %c0_156] : memref<32x128xf32, #tpu.memory_space<vmem>>, vector<5x128xf32>
    tpu.vector_store %arg18[%c5_155, %c0_156], %184 {strides = array<i32>} : memref<32x128xf32, #tpu.memory_space<vmem>>, vector<5x128xf32>,
    %c52_157 = arith.constant 52 : index
    %c0_158 = arith.constant 0 : index
    %186 = tpu.strided_load %arg17[%c52_157, %c0_158] {strides = array<i32: 2, 1>} : memref<144x128xf32, #tpu.memory_space<vmem>>, vector<5x128xf32>
    %c53_159 = arith.constant 53 : index
    %c0_160 = arith.constant 0 : index
    %187 = tpu.strided_load %arg17[%c53_159, %c0_160] {strides = array<i32: 2, 1>} : memref<144x128xf32, #tpu.memory_space<vmem>>, vector<5x128xf32>
    %188 = arith.maximumf %186, %187 : vector<5x128xf32>
    %c65_161 = arith.constant 65 : index
    %c0_162 = arith.constant 0 : index
    %189 = tpu.strided_load %arg17[%c65_161, %c0_162] {strides = array<i32: 2, 1>} : memref<144x128xf32, #tpu.memory_space<vmem>>, vector<5x128xf32>
    %c66 = arith.constant 66 : index
    %c0_163 = arith.constant 0 : index
    %190 = tpu.strided_load %arg17[%c66, %c0_163] {strides = array<i32: 2, 1>} : memref<144x128xf32, #tpu.memory_space<vmem>>, vector<5x128xf32>
    %191 = arith.maximumf %189, %190 : vector<5x128xf32>
    %192 = arith.maximumf %188, %191 : vector<5x128xf32>
    %c10 = arith.constant 10 : index
    %c0_164 = arith.constant 0 : index
    %193 = vector.load %arg18[%c10, %c0_164] : memref<32x128xf32, #tpu.memory_space<vmem>>, vector<5x128xf32>
    tpu.vector_store %arg18[%c10, %c0_164], %192 {strides = array<i32>} : memref<32x128xf32, #tpu.memory_space<vmem>>, vector<5x128xf32>,
    %c78_165 = arith.constant 78 : index
    %c0_166 = arith.constant 0 : index
    %194 = tpu.strided_load %arg17[%c78_165, %c0_166] {strides = array<i32: 2, 1>} : memref<144x128xf32, #tpu.memory_space<vmem>>, vector<5x128xf32>
    %c79_167 = arith.constant 79 : index
    %c0_168 = arith.constant 0 : index
    %195 = tpu.strided_load %arg17[%c79_167, %c0_168] {strides = array<i32: 2, 1>} : memref<144x128xf32, #tpu.memory_space<vmem>>, vector<5x128xf32>
    %196 = arith.maximumf %194, %195 : vector<5x128xf32>
    %c91_169 = arith.constant 91 : index
    %c0_170 = arith.constant 0 : index
    %197 = tpu.strided_load %arg17[%c91_169, %c0_170] {strides = array<i32: 2, 1>} : memref<144x128xf32, #tpu.memory_space<vmem>>, vector<5x128xf32>
    %c92 = arith.constant 92 : index
    %c0_171 = arith.constant 0 : index
    %198 = tpu.strided_load %arg17[%c92, %c0_171] {strides = array<i32: 2, 1>} : memref<144x128xf32, #tpu.memory_space<vmem>>, vector<5x128xf32>
    %199 = arith.maximumf %197, %198 : vector<5x128xf32>
    %200 = arith.maximumf %196, %199 : vector<5x128xf32>
    %c15_172 = arith.constant 15 : index
    %c0_173 = arith.constant 0 : index
    %201 = vector.load %arg18[%c15_172, %c0_173] : memref<32x128xf32, #tpu.memory_space<vmem>>, vector<5x128xf32>
    tpu.vector_store %arg18[%c15_172, %c0_173], %200 {strides = array<i32>} : memref<32x128xf32, #tpu.memory_space<vmem>>, vector<5x128xf32>,
    %c104_174 = arith.constant 104 : index
    %c0_175 = arith.constant 0 : index
    %202 = tpu.strided_load %arg17[%c104_174, %c0_175] {strides = array<i32: 2, 1>} : memref<144x128xf32, #tpu.memory_space<vmem>>, vector<5x128xf32>
    %c105_176 = arith.constant 105 : index
    %c0_177 = arith.constant 0 : index
    %203 = tpu.strided_load %arg17[%c105_176, %c0_177] {strides = array<i32: 2, 1>} : memref<144x128xf32, #tpu.memory_space<vmem>>, vector<5x128xf32>
    %204 = arith.maximumf %202, %203 : vector<5x128xf32>
    %c117_178 = arith.constant 117 : index
    %c0_179 = arith.constant 0 : index
    %205 = tpu.strided_load %arg17[%c117_178, %c0_179] {strides = array<i32: 2, 1>} : memref<144x128xf32, #tpu.memory_space<vmem>>, vector<5x128xf32>
    %c118 = arith.constant 118 : index
    %c0_180 = arith.constant 0 : index
    %206 = tpu.strided_load %arg17[%c118, %c0_180] {strides = array<i32: 2, 1>} : memref<144x128xf32, #tpu.memory_space<vmem>>, vector<5x128xf32>
    %207 = arith.maximumf %205, %206 : vector<5x128xf32>
    %208 = arith.maximumf %204, %207 : vector<5x128xf32>
    %c20 = arith.constant 20 : index
    %c0_181 = arith.constant 0 : index
    %209 = vector.load %arg18[%c20, %c0_181] : memref<32x128xf32, #tpu.memory_space<vmem>>, vector<5x128xf32>
    tpu.vector_store %arg18[%c20, %c0_181], %208 {strides = array<i32>} : memref<32x128xf32, #tpu.memory_space<vmem>>, vector<5x128xf32>,
    %cst_182 = arith.constant 0.000000e+00 : f32
    %210 = vector.broadcast %cst_182 : f32 to vector<16x128xf32>
    %c0_183 = arith.constant 0 : index
    %c0_184 = arith.constant 0 : index
    %211 = vector.load %arg18[%c0_183, %c0_184] : memref<32x128xf32, #tpu.memory_space<vmem>>, vector<16x128xf32>
    %c0_185 = arith.constant 0 : index
    %c0_186 = arith.constant 0 : index
    %c0_187 = arith.constant 0 : index
    %212 = vector.load %arg6[%c0_185, %c0_186, %c0_187] : memref<9x128x128xf32, #tpu.memory_space<vmem>>, vector<1x128x128xf32>
    %213 = vector.shape_cast %212 : vector<1x128x128xf32> to vector<128x128xf32>
    %cst_188 = arith.constant dense<0.000000e+00> : vector<16x128xf32>
    %214 = tpu.matmul %211, %213, %cst_188 {dimension_numbers = #tpu.dot_dimension_numbers<[1], [0], [0], [1], [0, 0, 1, 1], [], []>} : vector<16x128xf32>, vector<128x128xf32>, vector<16x128xf32> -> vector<16x128xf32>
    %215 = arith.addf %210, %214 : vector<16x128xf32>
    %c1_189 = arith.constant 1 : index
    %c0_190 = arith.constant 0 : index
    %216 = vector.load %arg18[%c1_189, %c0_190] : memref<32x128xf32, #tpu.memory_space<vmem>>, vector<16x128xf32>
    %c1_191 = arith.constant 1 : index
    %c0_192 = arith.constant 0 : index
    %c0_193 = arith.constant 0 : index
    %217 = vector.load %arg6[%c1_191, %c0_192, %c0_193] : memref<9x128x128xf32, #tpu.memory_space<vmem>>, vector<1x128x128xf32>
    %218 = vector.shape_cast %217 : vector<1x128x128xf32> to vector<128x128xf32>
    %cst_194 = arith.constant dense<0.000000e+00> : vector<16x128xf32>
    %219 = tpu.matmul %216, %218, %cst_194 {dimension_numbers = #tpu.dot_dimension_numbers<[1], [0], [0], [1], [0, 0, 1, 1], [], []>} : vector<16x128xf32>, vector<128x128xf32>, vector<16x128xf32> -> vector<16x128xf32>
    %220 = arith.addf %215, %219 : vector<16x128xf32>
    %c2_195 = arith.constant 2 : index
    %c0_196 = arith.constant 0 : index
    %221 = vector.load %arg18[%c2_195, %c0_196] : memref<32x128xf32, #tpu.memory_space<vmem>>, vector<16x128xf32>
    %c2_197 = arith.constant 2 : index
    %c0_198 = arith.constant 0 : index
    %c0_199 = arith.constant 0 : index
    %222 = vector.load %arg6[%c2_197, %c0_198, %c0_199] : memref<9x128x128xf32, #tpu.memory_space<vmem>>, vector<1x128x128xf32>
    %223 = vector.shape_cast %222 : vector<1x128x128xf32> to vector<128x128xf32>
    %cst_200 = arith.constant dense<0.000000e+00> : vector<16x128xf32>
    %224 = tpu.matmul %221, %223, %cst_200 {dimension_numbers = #tpu.dot_dimension_numbers<[1], [0], [0], [1], [0, 0, 1, 1], [], []>} : vector<16x128xf32>, vector<128x128xf32>, vector<16x128xf32> -> vector<16x128xf32>
    %225 = arith.addf %220, %224 : vector<16x128xf32>
    %c5_201 = arith.constant 5 : index
    %c0_202 = arith.constant 0 : index
    %226 = vector.load %arg18[%c5_201, %c0_202] : memref<32x128xf32, #tpu.memory_space<vmem>>, vector<16x128xf32>
    %c3_203 = arith.constant 3 : index
    %c0_204 = arith.constant 0 : index
    %c0_205 = arith.constant 0 : index
    %227 = vector.load %arg6[%c3_203, %c0_204, %c0_205] : memref<9x128x128xf32, #tpu.memory_space<vmem>>, vector<1x128x128xf32>
    %228 = vector.shape_cast %227 : vector<1x128x128xf32> to vector<128x128xf32>
    %cst_206 = arith.constant dense<0.000000e+00> : vector<16x128xf32>
    %229 = tpu.matmul %226, %228, %cst_206 {dimension_numbers = #tpu.dot_dimension_numbers<[1], [0], [0], [1], [0, 0, 1, 1], [], []>} : vector<16x128xf32>, vector<128x128xf32>, vector<16x128xf32> -> vector<16x128xf32>
    %230 = arith.addf %225, %229 : vector<16x128xf32>
    %c6_207 = arith.constant 6 : index
    %c0_208 = arith.constant 0 : index
    %231 = vector.load %arg18[%c6_207, %c0_208] : memref<32x128xf32, #tpu.memory_space<vmem>>, vector<16x128xf32>
    %c4_209 = arith.constant 4 : index
    %c0_210 = arith.constant 0 : index
    %c0_211 = arith.constant 0 : index
    %232 = vector.load %arg6[%c4_209, %c0_210, %c0_211] : memref<9x128x128xf32, #tpu.memory_space<vmem>>, vector<1x128x128xf32>
    %233 = vector.shape_cast %232 : vector<1x128x128xf32> to vector<128x128xf32>
    %cst_212 = arith.constant dense<0.000000e+00> : vector<16x128xf32>
    %234 = tpu.matmul %231, %233, %cst_212 {dimension_numbers = #tpu.dot_dimension_numbers<[1], [0], [0], [1], [0, 0, 1, 1], [], []>} : vector<16x128xf32>, vector<128x128xf32>, vector<16x128xf32> -> vector<16x128xf32>
    %235 = arith.addf %230, %234 : vector<16x128xf32>
    %c7_213 = arith.constant 7 : index
    %c0_214 = arith.constant 0 : index
    %236 = vector.load %arg18[%c7_213, %c0_214] : memref<32x128xf32, #tpu.memory_space<vmem>>, vector<16x128xf32>
    %c5_215 = arith.constant 5 : index
    %c0_216 = arith.constant 0 : index
    %c0_217 = arith.constant 0 : index
    %237 = vector.load %arg6[%c5_215, %c0_216, %c0_217] : memref<9x128x128xf32, #tpu.memory_space<vmem>>, vector<1x128x128xf32>
    %238 = vector.shape_cast %237 : vector<1x128x128xf32> to vector<128x128xf32>
    %cst_218 = arith.constant dense<0.000000e+00> : vector<16x128xf32>
    %239 = tpu.matmul %236, %238, %cst_218 {dimension_numbers = #tpu.dot_dimension_numbers<[1], [0], [0], [1], [0, 0, 1, 1], [], []>} : vector<16x128xf32>, vector<128x128xf32>, vector<16x128xf32> -> vector<16x128xf32>
    %240 = arith.addf %235, %239 : vector<16x128xf32>
    %c10_219 = arith.constant 10 : index
    %c0_220 = arith.constant 0 : index
    %241 = vector.load %arg18[%c10_219, %c0_220] : memref<32x128xf32, #tpu.memory_space<vmem>>, vector<16x128xf32>
    %c6_221 = arith.constant 6 : index
    %c0_222 = arith.constant 0 : index
    %c0_223 = arith.constant 0 : index
    %242 = vector.load %arg6[%c6_221, %c0_222, %c0_223] : memref<9x128x128xf32, #tpu.memory_space<vmem>>, vector<1x128x128xf32>
    %243 = vector.shape_cast %242 : vector<1x128x128xf32> to vector<128x128xf32>
    %cst_224 = arith.constant dense<0.000000e+00> : vector<16x128xf32>
    %244 = tpu.matmul %241, %243, %cst_224 {dimension_numbers = #tpu.dot_dimension_numbers<[1], [0], [0], [1], [0, 0, 1, 1], [], []>} : vector<16x128xf32>, vector<128x128xf32>, vector<16x128xf32> -> vector<16x128xf32>
    %245 = arith.addf %240, %244 : vector<16x128xf32>
    %c11 = arith.constant 11 : index
    %c0_225 = arith.constant 0 : index
    %246 = vector.load %arg18[%c11, %c0_225] : memref<32x128xf32, #tpu.memory_space<vmem>>, vector<16x128xf32>
    %c7_226 = arith.constant 7 : index
    %c0_227 = arith.constant 0 : index
    %c0_228 = arith.constant 0 : index
    %247 = vector.load %arg6[%c7_226, %c0_227, %c0_228] : memref<9x128x128xf32, #tpu.memory_space<vmem>>, vector<1x128x128xf32>
    %248 = vector.shape_cast %247 : vector<1x128x128xf32> to vector<128x128xf32>
    %cst_229 = arith.constant dense<0.000000e+00> : vector<16x128xf32>
    %249 = tpu.matmul %246, %248, %cst_229 {dimension_numbers = #tpu.dot_dimension_numbers<[1], [0], [0], [1], [0, 0, 1, 1], [], []>} : vector<16x128xf32>, vector<128x128xf32>, vector<16x128xf32> -> vector<16x128xf32>
    %250 = arith.addf %245, %249 : vector<16x128xf32>
    %c12 = arith.constant 12 : index
    %c0_230 = arith.constant 0 : index
    %251 = vector.load %arg18[%c12, %c0_230] : memref<32x128xf32, #tpu.memory_space<vmem>>, vector<16x128xf32>
    %c8_231 = arith.constant 8 : index
    %c0_232 = arith.constant 0 : index
    %c0_233 = arith.constant 0 : index
    %252 = vector.load %arg6[%c8_231, %c0_232, %c0_233] : memref<9x128x128xf32, #tpu.memory_space<vmem>>, vector<1x128x128xf32>
    %253 = vector.shape_cast %252 : vector<1x128x128xf32> to vector<128x128xf32>
    %cst_234 = arith.constant dense<0.000000e+00> : vector<16x128xf32>
    %254 = tpu.matmul %251, %253, %cst_234 {dimension_numbers = #tpu.dot_dimension_numbers<[1], [0], [0], [1], [0, 0, 1, 1], [], []>} : vector<16x128xf32>, vector<128x128xf32>, vector<16x128xf32> -> vector<16x128xf32>
    %255 = arith.addf %250, %254 : vector<16x128xf32>
    %c0_235 = arith.constant 0 : index
    %c0_236 = arith.constant 0 : index
    %256 = vector.load %arg7[%c0_235, %c0_236] : memref<1x128xf32, #tpu.memory_space<vmem>>, vector<1x128xf32>
    %257 = vector.broadcast %256 : vector<1x128xf32> to vector<16x128xf32>
    %258 = arith.addf %255, %257 : vector<16x128xf32>
    %cst_237 = arith.constant 0.000000e+00 : f32
    %259 = vector.broadcast %cst_237 : f32 to vector<16x128xf32>
    %260 = arith.maximumf %258, %259 : vector<16x128xf32>
    %c0_238 = arith.constant 0 : index
    %c0_239 = arith.constant 0 : index
    %261 = vector.load %arg19[%c0_238, %c0_239] : memref<16x128xf32, #tpu.memory_space<vmem>>, vector<16x128xf32>
    tpu.vector_store %arg19[%c0_238, %c0_239], %260 {strides = array<i32>} : memref<16x128xf32, #tpu.memory_space<vmem>>, vector<16x128xf32>,
    %c0_240 = arith.constant 0 : index
    %c0_241 = arith.constant 0 : index
    %262 = vector.load %arg19[%c0_240, %c0_241] : memref<16x128xf32, #tpu.memory_space<vmem>>, vector<1x128xf32>
    %c1_242 = arith.constant 1 : index
    %c0_243 = arith.constant 0 : index
    %263 = vector.load %arg19[%c1_242, %c0_243] : memref<16x128xf32, #tpu.memory_space<vmem>>, vector<1x128xf32>
    %264 = arith.maximumf %262, %263 : vector<1x128xf32>
    %c5_244 = arith.constant 5 : index
    %c0_245 = arith.constant 0 : index
    %265 = vector.load %arg19[%c5_244, %c0_245] : memref<16x128xf32, #tpu.memory_space<vmem>>, vector<1x128xf32>
    %c6_246 = arith.constant 6 : index
    %c0_247 = arith.constant 0 : index
    %266 = vector.load %arg19[%c6_246, %c0_247] : memref<16x128xf32, #tpu.memory_space<vmem>>, vector<1x128xf32>
    %267 = arith.maximumf %265, %266 : vector<1x128xf32>
    %268 = arith.maximumf %264, %267 : vector<1x128xf32>
    %c0_248 = arith.constant 0 : index
    %c0_249 = arith.constant 0 : index
    %269 = vector.load %arg8[%c0_248, %c0_249] : memref<128x128xf32, #tpu.memory_space<vmem>>, vector<128x128xf32>
    %cst_250 = arith.constant dense<0.000000e+00> : vector<1x128xf32>
    %270 = tpu.matmul %268, %269, %cst_250 {dimension_numbers = #tpu.dot_dimension_numbers<[1], [0], [0], [1], [0, 0, 1, 1], [], []>} : vector<1x128xf32>, vector<128x128xf32>, vector<1x128xf32> -> vector<1x128xf32>
    %c0_251 = arith.constant 0 : index
    %c0_252 = arith.constant 0 : index
    %271 = vector.load %arg9[%c0_251, %c0_252] : memref<1x128xf32, #tpu.memory_space<vmem>>, vector<1x128xf32>
    %272 = arith.addf %270, %271 : vector<1x128xf32>
    %cst_253 = arith.constant 0.000000e+00 : f32
    %273 = vector.broadcast %cst_253 : f32 to vector<1x128xf32>
    %274 = arith.maximumf %272, %273 : vector<1x128xf32>
    %c0_254 = arith.constant 0 : index
    %c0_255 = arith.constant 0 : index
    %275 = vector.load %arg10[%c0_254, %c0_255] : memref<128x128xf32, #tpu.memory_space<vmem>>, vector<128x128xf32>
    %cst_256 = arith.constant dense<0.000000e+00> : vector<1x128xf32>
    %276 = tpu.matmul %274, %275, %cst_256 {dimension_numbers = #tpu.dot_dimension_numbers<[1], [0], [0], [1], [0, 0, 1, 1], [], []>} : vector<1x128xf32>, vector<128x128xf32>, vector<1x128xf32> -> vector<1x128xf32>
    %c0_257 = arith.constant 0 : index
    %c0_258 = arith.constant 0 : index
    %277 = vector.load %arg11[%c0_257, %c0_258] : memref<1x128xf32, #tpu.memory_space<vmem>>, vector<1x128xf32>
    %278 = arith.addf %276, %277 : vector<1x128xf32>
    %cst_259 = arith.constant 0.000000e+00 : f32
    %279 = vector.broadcast %cst_259 : f32 to vector<1x128xf32>
    %280 = arith.maximumf %278, %279 : vector<1x128xf32>
    %c0_260 = arith.constant 0 : index
    %c0_261 = arith.constant 0 : index
    %281 = vector.load %arg12[%c0_260, %c0_261] : memref<128x128xf32, #tpu.memory_space<vmem>>, vector<128x128xf32>
    %cst_262 = arith.constant dense<0.000000e+00> : vector<1x128xf32>
    %282 = tpu.matmul %280, %281, %cst_262 {dimension_numbers = #tpu.dot_dimension_numbers<[1], [0], [0], [1], [0, 0, 1, 1], [], []>} : vector<1x128xf32>, vector<128x128xf32>, vector<1x128xf32> -> vector<1x128xf32>
    %c0_263 = arith.constant 0 : index
    %c0_264 = arith.constant 0 : index
    %283 = vector.load %arg13[%c0_263, %c0_264] : memref<1x128xf32, #tpu.memory_space<vmem>>, vector<1x128xf32>
    %284 = arith.addf %282, %283 : vector<1x128xf32>
    %285 = vector.shape_cast %284 : vector<1x128xf32> to vector<1x1x128xf32>
    %286 = vector.broadcast %285 : vector<1x1x128xf32> to vector<1x8x128xf32>
    %c0_265 = arith.constant 0 : index
    %c0_266 = arith.constant 0 : index
    %c0_267 = arith.constant 0 : index
    %287 = vector.load %arg14[%c0_265, %c0_266, %c0_267] : memref<1x8x128xf32, #tpu.memory_space<vmem>>, vector<1x8x128xf32>
    tpu.vector_store %arg14[%c0_265, %c0_266, %c0_267], %286 {strides = array<i32>} : memref<1x8x128xf32, #tpu.memory_space<vmem>>, vector<1x8x128xf32>,
    return
  }
  func.func @transform_0(%arg0: i32) -> (i32, i32, i32) {
    %c0_i32 = arith.constant 0 : i32
    %c0_i32_0 = arith.constant 0 : i32
    %c0_i32_1 = arith.constant 0 : i32
    return %arg0, %c0_i32, %c0_i32_0 : i32, i32, i32
  }
  func.func @transform_1(%arg0: i32) -> (i32, i32) {
    %c0_i32 = arith.constant 0 : i32
    %c0_i32_0 = arith.constant 0 : i32
    %c0_i32_1 = arith.constant 0 : i32
    return %c0_i32, %c0_i32_0 : i32, i32
  }
  func.func @transform_2(%arg0: i32) -> (i32, i32) {
    %c0_i32 = arith.constant 0 : i32
    %c0_i32_0 = arith.constant 0 : i32
    %c0_i32_1 = arith.constant 0 : i32
    return %c0_i32, %c0_i32_0 : i32, i32
  }
  func.func @transform_3(%arg0: i32) -> (i32, i32, i32) {
    %c0_i32 = arith.constant 0 : i32
    %c0_i32_0 = arith.constant 0 : i32
    %c0_i32_1 = arith.constant 0 : i32
    %c0_i32_2 = arith.constant 0 : i32
    return %c0_i32, %c0_i32_0, %c0_i32_1 : i32, i32, i32
  }
  func.func @transform_4(%arg0: i32) -> (i32, i32) {
    %c0_i32 = arith.constant 0 : i32
    %c0_i32_0 = arith.constant 0 : i32
    %c0_i32_1 = arith.constant 0 : i32
    return %c0_i32, %c0_i32_0 : i32, i32
  }
  func.func @transform_5(%arg0: i32) -> (i32, i32, i32) {
    %c0_i32 = arith.constant 0 : i32
    %c0_i32_0 = arith.constant 0 : i32
    %c0_i32_1 = arith.constant 0 : i32
    %c0_i32_2 = arith.constant 0 : i32
    return %c0_i32, %c0_i32_0, %c0_i32_1 : i32, i32, i32
  }
  func.func @transform_6(%arg0: i32) -> (i32, i32) {
    %c0_i32 = arith.constant 0 : i32
    %c0_i32_0 = arith.constant 0 : i32
    %c0_i32_1 = arith.constant 0 : i32
    return %c0_i32, %c0_i32_0 : i32, i32
  }
  func.func @transform_7(%arg0: i32) -> (i32, i32) {
    %c0_i32 = arith.constant 0 : i32
    %c0_i32_0 = arith.constant 0 : i32
    %c0_i32_1 = arith.constant 0 : i32
    return %c0_i32, %c0_i32_0 : i32, i32
  }
  func.func @transform_8(%arg0: i32) -> (i32, i32) {
    %c0_i32 = arith.constant 0 : i32
    %c0_i32_0 = arith.constant 0 : i32
    %c0_i32_1 = arith.constant 0 : i32
    return %c0_i32, %c0_i32_0 : i32, i32
  }
  func.func @transform_9(%arg0: i32) -> (i32, i32) {
    %c0_i32 = arith.constant 0 : i32
    %c0_i32_0 = arith.constant 0 : i32
    %c0_i32_1 = arith.constant 0 : i32
    return %c0_i32, %c0_i32_0 : i32, i32
  }
  func.func @transform_10(%arg0: i32) -> (i32, i32) {
    %c0_i32 = arith.constant 0 : i32
    %c0_i32_0 = arith.constant 0 : i32
    %c0_i32_1 = arith.constant 0 : i32
    return %c0_i32, %c0_i32_0 : i32, i32
  }
  func.func @transform_11(%arg0: i32) -> (i32, i32) {
    %c0_i32 = arith.constant 0 : i32
    %c0_i32_0 = arith.constant 0 : i32
    %c0_i32_1 = arith.constant 0 : i32
    return %c0_i32, %c0_i32_0 : i32, i32
  }
  func.func @transform_12(%arg0: i32) -> (i32, i32) {
    %c0_i32 = arith.constant 0 : i32
    %c0_i32_0 = arith.constant 0 : i32
    %c0_i32_1 = arith.constant 0 : i32
    return %c0_i32, %c0_i32_0 : i32, i32
  }
  func.func @transform_13(%arg0: i32) -> (i32, i32, i32) {
    %c0_i32 = arith.constant 0 : i32
    %c0_i32_0 = arith.constant 0 : i32
    %c0_i32_1 = arith.constant 0 : i32
    return %arg0, %c0_i32, %c0_i32_0 : i32, i32, i32
  }
}

</mosaic_0001>

<bundles_post_ra>
// kernel: cnn_forward.1
= control target key start
LH: loop header
LB: loop body
LE: loop exit
PB: predicated region body
PF: predicated region fallthrough
CT: control target
= control target key end

     0   :  { %s7753_s25 = smov 0   ;;  %s9369_s0 = inlined_call_operand.vmem [shape: f32[4,680,128], index: 0, kind: input, shape index: {}]   ;;  %s9370_s1 = inlined_call_operand.vmem [shape: f32[128,128], index: 1, kind: input, shape index: {}]   ;;  %s9371_s2 = inlined_call_operand.vmem [shape: f32[1,128], index: 2, kind: input, shape index: {}]   ;;  %s9372_s3 = inlined_call_operand.vmem [shape: f32[9,128,128], index: 3, kind: input, shape index: {}]   ;;  %s9373_s4 = inlined_call_operand.vmem [shape: f32[1,128], index: 4, kind: input, shape index: {}]   ;;  %s9374_s5 = inlined_call_operand.vmem [shape: f32[9,128,128], index: 5, kind: input, shape index: {}]   ;;  %s9375_s6 = inlined_call_operand.vmem [shape: f32[1,128], index: 6, kind: input, shape index: {}]   ;;  %s9376_s7 = inlined_call_operand.vmem [shape: f32[128,128], index: 7, kind: input, shape index: {}]   ;;  %s9377_s8 = inlined_call_operand.vmem [shape: f32[1,128], index: 8, kind: input, shape index: {}]   ;;  %s9378_s9 = inlined_call_operand.vmem [shape: f32[128,128], index: 9, kind: input, shape index: {}]   ;;  %s9379_s10 = inlined_call_operand.vmem [shape: f32[1,128], index: 10, kind: input, shape index: {}]   ;;  %s9380_s11 = inlined_call_operand.vmem [shape: f32[128,128], index: 11, kind: input, shape index: {}]   ;;  %s9381_s12 = inlined_call_operand.vmem [shape: f32[1,128], index: 12, kind: input, shape index: {}]   ;;  %s9382_s13 = inlined_call_operand.vmem [shape: f32[4,8,128], index: 13, kind: output, shape index: {}]  }
   0x1 LB: > { %s4699_s26 = sadd.s32 4294967295, %s7678_s25   ;;  %p4703_p0 = scmp.ge.s32.totalorder %s7678_s25, 1  ;;  %s7678_s25 = sphi %s7753_s25, %s23_s25  }
   0x2   : > { %p387_p1 = scmp.lt.s32.totalorder %s7678_s25, 5 }
   0x4   : > { %p388_p2 = pnand %p4703_p0, %p387_p1 }
   0x5   : > { %v550_v0 = vld [vmem:[%s9370_s1] sm:$0xff] (!%p388_p2)  ;;  %v551_v1 = vld [vmem:[%s9370_s1 + $0x8] sm:$0xff] (!%p388_p2)  ;;  %v552_v2 = vld [vmem:[%s9370_s1 + $0x10] sm:$0xff] (!%p388_p2)  ;;  %v7680_v3 = vmov (!%p388_p2), 0.0|0.0   ;;  %vm7681_vm0 = vmmov (!%p388_p2), 0   ;;  %v7682_v6 = vmov (!%p388_p2), 0.0  }
   0x6   : > { %391 = sbr.rel (%p388_p2) target bundleno = 2162 (0x872), region = 72  ;;  %6825 = vmatprep.subr.bf16.mxu0 (!%p388_p2), %v7680_v3  ;;  %v6826_v4 = vpack.c.bf16 (!%p388_p2), %v551_v1, %v550_v0  ;;  %v553_v5 = vld [vmem:[%s9370_s1 + $0x18] sm:$0xff] (!%p388_p2)  ;;  %5619 = vmatprep.mubr.msk.f32.mxu0 (!%p388_p2), %vm7681_vm0, %v7682_v6  ;;  %440 = vst [vmem:[#allocation3 + $0x8] sm:$0xff] (!%p388_p2), %v7682_v6  ;;  %441 = vst [vmem:[#allocation3 + $0x10] sm:$0xff] (!%p388_p2), %v7682_v6  ;;  %v554_v8 = vld [vmem:[%s9370_s1 + $0x20] sm:$0xff] (!%p388_p2)  ;;  %p430_p3 = scmp.lt.s32.totalorder (!%p388_p2), %s4699_s26, 3 }
   0x7   : > { %442 = vst [vmem:[#allocation3 + $0x18] sm:$0xff] (!%p388_p2), %v7682_v6  ;;  %443 = vst [vmem:[#allocation3 + $0x20] sm:$0xff] (!%p388_p2), %v7682_v6  ;;  %v6829_v7 = vpack.c.bf16 (!%p388_p2), %v553_v5, %v552_v2  ;;  %v555_v9 = vld [vmem:[%s9370_s1 + $0x28] sm:$0xff] (!%p388_p2)  ;;  %v556_v11 = vld [vmem:[%s9370_s1 + $0x30] sm:$0xff] (!%p388_p2) }
   0x8   : > { %444 = vst [vmem:[#allocation3 + $0x28] sm:$0xff] (!%p388_p2), %v7682_v6  ;;  %445 = vst [vmem:[#allocation3 + $0x30] sm:$0xff] (!%p388_p2), %v7682_v6  ;;  %6827 = vmatpush3.bf16.msra.mxu0 (!%p388_p2), %v6826_v4  ;;  %v6832_v10 = vpack.c.bf16 (!%p388_p2), %v555_v9, %v554_v8  ;;  %v557_v12 = vld [vmem:[%s9370_s1 + $0x38] sm:$0xff] (!%p388_p2)  ;;  %v558_v14 = vld [vmem:[%s9370_s1 + $0x40] sm:$0xff] (!%p388_p2) }
   0x9   : > { %446 = vst [vmem:[#allocation3 + $0x38] sm:$0xff] (!%p388_p2), %v7682_v6  ;;  %447 = vst [vmem:[#allocation3 + $0x40] sm:$0xff] (!%p388_p2), %v7682_v6  ;;  %6828 = vmatprep.subr.bf16.mxu0 (!%p388_p2), %v7680_v3  ;;  %v6835_v13 = vpack.c.bf16 (!%p388_p2), %v557_v12, %v556_v11  ;;  %v559_v15 = vld [vmem:[%s9370_s1 + $0x48] sm:$0xff] (!%p388_p2)  ;;  %v560_v17 = vld [vmem:[%s9370_s1 + $0x50] sm:$0xff] (!%p388_p2) }
   0xa   : > { %448 = vst [vmem:[#allocation3 + $0x48] sm:$0xff] (!%p388_p2), %v7682_v6  ;;  %449 = vst [vmem:[#allocation3 + $0x50] sm:$0xff] (!%p388_p2), %v7682_v6  ;;  %v6838_v16 = vpack.c.bf16 (!%p388_p2), %v559_v15, %v558_v14  ;;  %v561_v18 = vld [vmem:[%s9370_s1 + $0x58] sm:$0xff] (!%p388_p2)  ;;  %v562_v20 = vld [vmem:[%s9370_s1 + $0x60] sm:$0xff] (!%p388_p2) }
   0xb   : > { %450 = vst [vmem:[#allocation3 + $0x58] sm:$0xff] (!%p388_p2), %v7682_v6  ;;  %451 = vst [vmem:[#allocation3 + $0x60] sm:$0xff] (!%p388_p2), %v7682_v6  ;;  %v6841_v19 = vpack.c.bf16 (!%p388_p2), %v561_v18, %v560_v17  ;;  %v563_v21 = vld [vmem:[%s9370_s1 + $0x68] sm:$0xff] (!%p388_p2)  ;;  %v564_v23 = vld [vmem:[%s9370_s1 + $0x70] sm:$0xff] (!%p388_p2) }
   0xc   : > { %453 = vst [vmem:[#allocation3 + $0x70] sm:$0xff] (!%p388_p2), %v7682_v6  ;;  %454 = vst [vmem:[#allocation3 + $0x78] sm:$0xff] (!%p388_p2), %v7682_v6  ;;  %6830 = vmatpush3.bf16.msra.mxu0 (!%p388_p2), %v6829_v7  ;;  %v6844_v22 = vpack.c.bf16 (!%p388_p2), %v563_v21, %v562_v20  ;;  %v565_v24 = vld [vmem:[%s9370_s1 + $0x78] sm:$0xff] (!%p388_p2)  ;;  %v4723_v57 = vld [vmem:[%s9372_s3 + $0x100] sm:$0xff] (!%p388_p2) }
   0xd   : > { %455 = vst [vmem:[#allocation3 + $0x80] sm:$0xff] %v7682_v6  ;;  %456 = vst [vmem:[#allocation3 + $0x88] sm:$0xff] %v7682_v6  ;;  %6831 = vmatprep.subr.bf16.mxu0 %v7680_v3  ;;  %s9384_s26 = smov (!%p430_p3, %s4699_s26), 3  ;;  %v6847_v25 = vpack.c.bf16 %v565_v24, %v564_v23  ;;  %v4724_v58 = vld [vmem:[%s9372_s3 + $0x108] sm:$0xff]  ;;  %v4725_v61 = vld [vmem:[%s9372_s3 + $0x110] sm:$0xff] }
   0xe   : > { %457 = vst [vmem:[#allocation3 + $0x90] sm:$0xff] %v7682_v6  ;;  %458 = vst [vmem:[#allocation3 + $0x98] sm:$0xff] %v7682_v6  ;;  %s7657_s29 = smul.u32 680, %s9384_s26  ;;  %v6913_v59 = vpack.c.bf16 %v4724_v58, %v4723_v57  ;;  %v4726_v62 = vld [vmem:[%s9372_s3 + $0x118] sm:$0xff]  ;;  %v4727_v1 = vld [vmem:[%s9372_s3 + $0x120] sm:$0xff]  ;;  %s4705_s16 = sshll.u32 %s9384_s26, 3 }
   0xf   : > { %459 = vst [vmem:[#allocation3 + $0xa0] sm:$0xff] %v7682_v6  ;;  %460 = vst [vmem:[#allocation3 + $0xa8] sm:$0xff] %v7682_v6  ;;  %v6917_v63 = vpack.c.bf16 %v4726_v62, %v4725_v61  ;;  %v4728_v2 = vld [vmem:[%s9372_s3 + $0x128] sm:$0xff]  ;;  %v4729_v7 = vld [vmem:[%s9372_s3 + $0x130] sm:$0xff]  ;;  %s438_s19 = scalar_lea.vmem %s9382_s13, %s4705_s16 }
  0x10   : > { %461 = vst [vmem:[#allocation5] sm:$0xff] %v7682_v6  ;;  %462 = vst [vmem:[#allocation5 + $0x8] sm:$0xff] %v7682_v6  ;;  %6833 = vmatpush3.bf16.msra.mxu0 %v6832_v10  ;;  %s7853_s15 = scalar_lea.vmem %s9369_s0, %s7657_s29  ;;  %6914 = vmatprep.subr.bf16.mxu1 %v6913_v59  ;;  %v6921_v4 = vpack.c.bf16 %v4728_v2, %v4727_v1  ;;  %v4730_v8 = vld [vmem:[%s9372_s3 + $0x138] sm:$0xff]  ;;  %v4731_v11 = vld [vmem:[%s9372_s3 + $0x140] sm:$0xff] }
  0x11   : > { %463 = vst [vmem:[#allocation5 + $0x10] sm:$0xff] %v7682_v6  ;;  %464 = vst [vmem:[#allocation5 + $0x18] sm:$0xff] %v7682_v6  ;;  %6834 = vmatprep.subr.bf16.mxu0 %v7680_v3  ;;  %v465_v26 = vld [vmem:[%s7853_s15] sm:$0xff]  ;;  %v466_v27 = vld [vmem:[%s7853_s15 + $0x8] sm:$0xff]  ;;  %6916 = vmatpush3.bf16.msra.mxu1 %v6913_v59  ;;  %v6925_v9 = vpack.c.bf16 %v4730_v8, %v4729_v7 }
  0x12   : > { %v467_v28 = vld [vmem:[%s7853_s15 + $0x10] sm:$0xff]  ;;  %v468_v29 = vld [vmem:[%s7853_s15 + $0x18] sm:$0xff]  ;;  %v469_v30 = vld [vmem:[%s7853_s15 + $0x20] sm:$0xff]  ;;  %6918 = vmatprep.subr.bf16.mxu1 %v6917_v63 }
  0x13   : > { %v470_v31 = vld [vmem:[%s7853_s15 + $0x28] sm:$0xff]  ;;  %v471_v32 = vld [vmem:[%s7853_s15 + $0x30] sm:$0xff]  ;;  %v472_v33 = vld [vmem:[%s7853_s15 + $0x38] sm:$0xff] }
  0x14   : > { %6836 = vmatpush3.bf16.msra.mxu0 %v6835_v13  ;;  %v473_v34 = vld [vmem:[%s7853_s15 + $0x40] sm:$0xff]  ;;  %v474_v35 = vld [vmem:[%s7853_s15 + $0x48] sm:$0xff]  ;;  %v475_v36 = vld [vmem:[%s7853_s15 + $0x50] sm:$0xff] }
  0x15   : > { %6837 = vmatprep.subr.bf16.mxu0 %v7680_v3  ;;  %v476_v37 = vld [vmem:[%s7853_s15 + $0x58] sm:$0xff]  ;;  %v477_v38 = vld [vmem:[%s7853_s15 + $0x60] sm:$0xff]  ;;  %v478_v39 = vld [vmem:[%s7853_s15 + $0x68] sm:$0xff]  ;;  %6920 = vmatpush3.bf16.msra.mxu1 %v6917_v63 }
  0x16   : > { %v479_v40 = vld [vmem:[%s7853_s15 + $0x70] sm:$0xff]  ;;  %v480_v41 = vld [vmem:[%s7853_s15 + $0x78] sm:$0xff]  ;;  %v481_v42 = vld [vmem:[%s7853_s15 + $0x80] sm:$0xff]  ;;  %6922 = vmatprep.subr.bf16.mxu1 %v6921_v4 }
  0x17   : > { %v482_v43 = vld [vmem:[%s7853_s15 + $0x88] sm:$0xff]  ;;  %v483_v44 = vld [vmem:[%s7853_s15 + $0x90] sm:$0xff]  ;;  %v484_v45 = vld [vmem:[%s7853_s15 + $0x98] sm:$0xff] }
  0x18   : > { %6839 = vmatpush3.bf16.msra.mxu0 %v6838_v16  ;;  %v485_v46 = vld [vmem:[%s7853_s15 + $0xa0] sm:$0xff]  ;;  %v486_v47 = vld [vmem:[%s7853_s15 + $0xa8] sm:$0xff]  ;;  %v487_v48 = vld [vmem:[%s7853_s15 + $0xb0] sm:$0xff] }
  0x19   : > { %6840 = vmatprep.subr.bf16.mxu0 %v7680_v3  ;;  %v488_v49 = vld [vmem:[%s7853_s15 + $0xb8] sm:$0xff]  ;;  %v489_v50 = vld [vmem:[%s7853_s15 + $0xc0] sm:$0xff]  ;;  %v490_v51 = vld [vmem:[%s7853_s15 + $0xc8] sm:$0xff]  ;;  %6924 = vmatpush3.bf16.msra.mxu1 %v6921_v4 }
  0x1a   : > { %v491_v52 = vld [vmem:[%s7853_s15 + $0xd0] sm:$0xff]  ;;  %v492_v53 = vld [vmem:[%s7853_s15 + $0xd8] sm:$0xff]  ;;  %v493_v54 = vld [vmem:[%s7853_s15 + $0xe0] sm:$0xff]  ;;  %6926 = vmatprep.subr.bf16.mxu1 %v6925_v9 }
  0x1b   : > { %v494_v55 = vld [vmem:[%s7853_s15 + $0xe8] sm:$0xff]  ;;  %v495_v56 = vld [vmem:[%s7853_s15 + $0xf0] sm:$0xff]  ;;  %v496_v60 = vld [vmem:[%s7853_s15 + $0xf8] sm:$0xff] }
  0x1c   : > { %6842 = vmatpush3.bf16.msra.mxu0 %v6841_v19  ;;  %v497_v0 = vld [vmem:[%s7853_s15 + $0x100] sm:$0xff]  ;;  %v498_v5 = vld [vmem:[%s7853_s15 + $0x108] sm:$0xff]  ;;  %v499_v10 = vld [vmem:[%s7853_s15 + $0x110] sm:$0xff] }
  0x1d   : > { %6843 = vmatprep.subr.bf16.mxu0 %v7680_v3  ;;  %6928 = vmatpush3.bf16.msra.mxu1 %v6925_v9  ;;  %v4732_v12 = vld [vmem:[%s9372_s3 + $0x148] sm:$0xff]  ;;  %v500_v14 = vld [vmem:[%s7853_s15 + $0x118] sm:$0xff]  ;;  %v4733_v15 = vld [vmem:[%s9372_s3 + $0x150] sm:$0xff] }
  0x1e   : > { %v6929_v13 = vpack.c.bf16 %v4732_v12, %v4731_v11  ;;  %v4734_v16 = vld [vmem:[%s9372_s3 + $0x158] sm:$0xff]  ;;  %v501_v18 = vld [vmem:[%s7853_s15 + $0x120] sm:$0xff]  ;;  %v4736_v20 = vld [vmem:[%s9372_s3 + $0x168] sm:$0xff] }
  0x1f   : > { %v6933_v17 = vpack.c.bf16 %v4734_v16, %v4733_v15  ;;  %v4735_v19 = vld [vmem:[%s9372_s3 + $0x160] sm:$0xff]  ;;  %v4737_v23 = vld [vmem:[%s9372_s3 + $0x170] sm:$0xff]  ;;  %v4738_v24 = vld [vmem:[%s9372_s3 + $0x178] sm:$0xff] }
  0x20   : > { %6845 = vmatpush3.bf16.msra.mxu0 %v6844_v22  ;;  %6930 = vmatprep.subr.bf16.mxu1 %v6929_v13  ;;  %v6937_v21 = vpack.c.bf16 %v4736_v20, %v4735_v19  ;;  %v502_v22 = vld [vmem:[%s7853_s15 + $0x128] sm:$0xff]  ;;  %v516_v57 = vld [vmem:[%s7853_s15 + $0x198] sm:$0xff]  ;;  %v4719_v58 = vld [vmem:[%s9372_s3 + $0xe0] sm:$0xff] }
  0x21   : > { %6846 = vmatprep.subr.bf16.mxu0 %v7680_v3  ;;  %6932 = vmatpush3.bf16.msra.mxu1 %v6929_v13  ;;  %v4720_v59 = vld [vmem:[%s9372_s3 + $0xe8] sm:$0xff]  ;;  %v517_v61 = vld [vmem:[%s7853_s15 + $0x1a0] sm:$0xff]  ;;  %v4721_v62 = vld [vmem:[%s9372_s3 + $0xf0] sm:$0xff] }
  0x22   : > { %6934 = vmatprep.subr.bf16.mxu1 %v6933_v17  ;;  %v4722_v63 = vld [vmem:[%s9372_s3 + $0xf8] sm:$0xff]  ;;  %v8111_v1 = vld [vmem:[%s9371_s2] ss:$0 sm:$0xff]  ;;  %v518_v2 = vld [vmem:[%s7853_s15 + $0x1a8] sm:$0xff] }
  0x23   : > { %v519_v8 = vld [vmem:[%s7853_s15 + $0x1b0] sm:$0xff]  ;;  %v520_v13 = vld [vmem:[%s7853_s15 + $0x1b8] sm:$0xff] }
  0x24   : > { %6848 = vmatpush3.bf16.msra.mxu0 %v6847_v25  ;;  %v6941_v25 = vpack.c.bf16 %v4738_v24, %v4737_v23  ;;  %v522_v23 = vld [vmem:[%s7853_s15 + $0x1c8] sm:$0xff] }
  0x25   : > { %6936 = vmatpush3.bf16.msra.mxu1 %v6933_v17 }
  0x26   : > { %6938 = vmatprep.subr.bf16.mxu1 %v6937_v21 }
  0x27   : > { %5620 = vmatmul.mubr.f32.vlgmr.msra.gmra.mrb[0].mxu0 %v465_v26  ;;  %v503_v26 = vld [vmem:[%s7853_s15 + $0x130] sm:$0xff] }
  0x28   : > { %5622 = vmatprep.mubr.msk.f32.mxu0 %vm7681_vm0, %v7682_v6 }
  0x29   : > { %6940 = vmatpush3.bf16.msra.mxu1 %v6937_v21 }
  0x2a   : > { %6942 = vmatprep.subr.bf16.mxu1 %v6941_v25 }
  0x2b   : > { %5623 = vmatmul.mubr.f32.gmra.mrb[2].mxu0 %v466_v27  ;;  %v504_v27 = vld [vmem:[%s7853_s15 + $0x138] sm:$0xff] }
  0x2c   : > { %5625 = vmatprep.mubr.msk.f32.mxu0 %vm7681_vm0, %v7682_v6 }
  0x2d   : > { %6944 = vmatpush3.bf16.msra.mxu1 %v6941_v25 }
  0x2f   : > { %5626 = vmatmul.mubr.f32.gmra.mrb[4].mxu0 %v467_v28  ;;  %v505_v28 = vld [vmem:[%s7853_s15 + $0x140] sm:$0xff] }
  0x30   : > { %5628 = vmatprep.mubr.msk.f32.mxu0 %vm7681_vm0, %v7682_v6 }
  0x33   : > { %5629 = vmatmul.mubr.f32.gmra.mrb[6].mxu0 %v468_v29  ;;  %v506_v29 = vld [vmem:[%s7853_s15 + $0x148] sm:$0xff] }
  0x34   : > { %5631 = vmatprep.mubr.msk.f32.mxu0 %vm7681_vm0, %v7682_v6 }
  0x37   : > { %5632 = vmatmul.mubr.f32.gmra.mrb[8].mxu0 %v469_v30  ;;  %v507_v30 = vld [vmem:[%s7853_s15 + $0x150] sm:$0xff] }
  0x38   : > { %5634 = vmatprep.mubr.msk.f32.mxu0 %vm7681_vm0, %v7682_v6 }
  0x3b   : > { %5635 = vmatmul.mubr.f32.gmra.mrb[10].mxu0 %v470_v31  ;;  %v508_v31 = vld [vmem:[%s7853_s15 + $0x158] sm:$0xff] }
  0x3c   : > { %5637 = vmatprep.mubr.msk.f32.mxu0 %vm7681_vm0, %v7682_v6 }
  0x3f   : > { %5638 = vmatmul.mubr.f32.gmra.mrb[12].mxu0 %v471_v32  ;;  %v509_v32 = vld [vmem:[%s7853_s15 + $0x160] sm:$0xff] }
  0x40   : > { %5640 = vmatprep.mubr.msk.f32.mxu0 %vm7681_vm0, %v7682_v6 }
  0x43   : > { %5641 = vmatmul.mubr.f32.gmra.mrb[14].mxu0 %v472_v33  ;;  %v510_v33 = vld [vmem:[%s7853_s15 + $0x168] sm:$0xff] }
  0x44   : > { %5643 = vmatprep.mubr.msk.f32.mxu0 %vm7681_vm0, %v7682_v6 }
  0x47   : > { %5644 = vmatmul.mubr.f32.gmra.mrb[16].mxu0 %v473_v34  ;;  %v4707_v34 = vld [vmem:[%s9372_s3 + $0x80] sm:$0xff] }
  0x48   : > { %5646 = vmatprep.mubr.msk.f32.mxu0 %vm7681_vm0, %v7682_v6 }
  0x4b   : > { %5647 = vmatmul.mubr.f32.gmra.mrb[18].mxu0 %v474_v35  ;;  %v4708_v35 = vld [vmem:[%s9372_s3 + $0x88] sm:$0xff] }
  0x4c   : > { %5649 = vmatprep.mubr.msk.f32.mxu0 %vm7681_vm0, %v7682_v6 }
  0x4f   : > { %5650 = vmatmul.mubr.f32.gmra.mrb[20].mxu0 %v475_v36  ;;  %v6849_v36 = vpack.c.bf16 %v4708_v35, %v4707_v34 }
  0x50   : > { %5652 = vmatprep.mubr.msk.f32.mxu0 %vm7681_vm0, %v7682_v6 }
  0x51   : > { %6850 = vmatprep.subr.bf16.mxu0 %v6849_v36 }
  0x52   : > { %6852 = vmatpush3.bf16.msra.mxu0 %v6849_v36 }
  0x53   : > { %5653 = vmatmul.mubr.f32.gmra.mrb[22].mxu0 %v476_v37  ;;  %v511_v37 = vld [vmem:[%s7853_s15 + $0x170] sm:$0xff] }
  0x54   : > { %5655 = vmatprep.mubr.msk.f32.mxu0 %vm7681_vm0, %v7682_v6 }
  0x57   : > { %5656 = vmatmul.mubr.f32.gmra.mrb[24].mxu0 %v477_v38  ;;  %v4709_v38 = vld [vmem:[%s9372_s3 + $0x90] sm:$0xff] }
  0x58   : > { %5658 = vmatprep.mubr.msk.f32.mxu0 %vm7681_vm0, %v7682_v6 }
  0x5b   : > { %5659 = vmatmul.mubr.f32.gmra.mrb[26].mxu0 %v478_v39  ;;  %v4710_v39 = vld [vmem:[%s9372_s3 + $0x98] sm:$0xff] }
  0x5c   : > { %5661 = vmatprep.mubr.msk.f32.mxu0 %vm7681_vm0, %v7682_v6 }
  0x5f   : > { %5662 = vmatmul.mubr.f32.gmra.mrb[28].mxu0 %v479_v40  ;;  %v6853_v40 = vpack.c.bf16 %v4710_v39, %v4709_v38  ;;  %v525_v38 = vld [vmem:[%s7853_s15 + $0x1e0] sm:$0xff] }
  0x60   : > { %5664 = vmatprep.mubr.msk.f32.mxu0 %vm7681_vm0, %v7682_v6 }
  0x61   : > { %6854 = vmatprep.subr.bf16.mxu0 %v6853_v40 }
  0x62   : > { %6856 = vmatpush3.bf16.msra.mxu0 %v6853_v40 }
  0x63   : > { %5665 = vmatmul.mubr.f32.gmra.mrb[30].mxu0 %v480_v41  ;;  %v512_v41 = vld [vmem:[%s7853_s15 + $0x178] sm:$0xff] }
  0x64   : > { %5667 = vmatprep.mubr.msk.f32.mxu0 %vm7681_vm0, %v7682_v6 }
  0x67   : > { %5668 = vmatmul.mubr.f32.gmra.mrb[32].mxu0 %v481_v42  ;;  %v4711_v42 = vld [vmem:[%s9372_s3 + $0xa0] sm:$0xff] }
  0x68   : > { %5670 = vmatprep.mubr.msk.f32.mxu0 %vm7681_vm0, %v7682_v6 }
  0x6b   : > { %5671 = vmatmul.mubr.f32.gmra.mrb[34].mxu0 %v482_v43  ;;  %v4712_v43 = vld [vmem:[%s9372_s3 + $0xa8] sm:$0xff] }
  0x6c   : > { %5673 = vmatprep.mubr.msk.f32.mxu0 %vm7681_vm0, %v7682_v6 }
  0x6f   : > { %5674 = vmatmul.mubr.f32.gmra.mrb[36].mxu0 %v483_v44  ;;  %v6857_v44 = vpack.c.bf16 %v4712_v43, %v4711_v42 }
  0x70   : > { %5676 = vmatprep.mubr.msk.f32.mxu0 %vm7681_vm0, %v7682_v6 }
  0x71   : > { %6858 = vmatprep.subr.bf16.mxu0 %v6857_v44 }
  0x72   : > { %6860 = vmatpush3.bf16.msra.mxu0 %v6857_v44 }
  0x73   : > { %5677 = vmatmul.mubr.f32.gmra.mrb[38].mxu0 %v484_v45  ;;  %v513_v45 = vld [vmem:[%s7853_s15 + $0x180] sm:$0xff] }
  0x74   : > { %5679 = vmatprep.mubr.msk.f32.mxu0 %vm7681_vm0, %v7682_v6 }
  0x77   : > { %5680 = vmatmul.mubr.f32.gmra.mrb[40].mxu0 %v485_v46  ;;  %v4713_v46 = vld [vmem:[%s9372_s3 + $0xb0] sm:$0xff] }
  0x78   : > { %5682 = vmatprep.mubr.msk.f32.mxu0 %vm7681_vm0, %v7682_v6 }
  0x7b   : > { %5683 = vmatmul.mubr.f32.gmra.mrb[42].mxu0 %v486_v47  ;;  %v4714_v47 = vld [vmem:[%s9372_s3 + $0xb8] sm:$0xff] }
  0x7c   : > { %5685 = vmatprep.mubr.msk.f32.mxu0 %vm7681_vm0, %v7682_v6 }
  0x7f   : > { %5686 = vmatmul.mubr.f32.gmra.mrb[44].mxu0 %v487_v48  ;;  %v6861_v48 = vpack.c.bf16 %v4714_v47, %v4713_v46 }
  0x80   : > { %5688 = vmatprep.mubr.msk.f32.mxu0 %vm7681_vm0, %v7682_v6 }
  0x81   : > { %6862 = vmatprep.subr.bf16.mxu0 %v6861_v48 }
  0x82   : > { %6864 = vmatpush3.bf16.msra.mxu0 %v6861_v48 }
  0x83   : > { %5689 = vmatmul.mubr.f32.gmra.mrb[46].mxu0 %v488_v49  ;;  %v514_v49 = vld [vmem:[%s7853_s15 + $0x188] sm:$0xff] }
  0x84   : > { %5691 = vmatprep.mubr.msk.f32.mxu0 %vm7681_vm0, %v7682_v6 }
  0x87   : > { %5692 = vmatmul.mubr.f32.gmra.mrb[48].mxu0 %v489_v50  ;;  %v4715_v50 = vld [vmem:[%s9372_s3 + $0xc0] sm:$0xff] }
  0x88   : > { %5694 = vmatprep.mubr.msk.f32.mxu0 %vm7681_vm0, %v7682_v6 }
  0x8b   : > { %5695 = vmatmul.mubr.f32.gmra.mrb[50].mxu0 %v490_v51  ;;  %v4716_v51 = vld [vmem:[%s9372_s3 + $0xc8] sm:$0xff] }
  0x8c   : > { %5697 = vmatprep.mubr.msk.f32.mxu0 %vm7681_vm0, %v7682_v6 }
  0x8f   : > { %5698 = vmatmul.mubr.f32.gmra.mrb[52].mxu0 %v491_v52  ;;  %v6865_v52 = vpack.c.bf16 %v4716_v51, %v4715_v50 }
  0x90   : > { %5700 = vmatprep.mubr.msk.f32.mxu0 %vm7681_vm0, %v7682_v6 }
  0x91   : > { %6866 = vmatprep.subr.bf16.mxu0 %v6865_v52 }
  0x92   : > { %6868 = vmatpush3.bf16.msra.mxu0 %v6865_v52 }
  0x93   : > { %5701 = vmatmul.mubr.f32.gmra.mrb[54].mxu0 %v492_v53  ;;  %v515_v53 = vld [vmem:[%s7853_s15 + $0x190] sm:$0xff] }
  0x94   : > { %5703 = vmatprep.mubr.msk.f32.mxu0 %vm7681_vm0, %v7682_v6 }
  0x97   : > { %5704 = vmatmul.mubr.f32.gmra.mrb[56].mxu0 %v493_v54  ;;  %v4717_v54 = vld [vmem:[%s9372_s3 + $0xd0] sm:$0xff] }
  0x98   : > { %5706 = vmatprep.mubr.msk.f32.mxu0 %vm7681_vm0, %v7682_v6 }
  0x9b   : > { %5707 = vmatmul.mubr.f32.gmra.mrb[58].mxu0 %v494_v55  ;;  %v4718_v55 = vld [vmem:[%s9372_s3 + $0xd8] sm:$0xff] }
  0x9c   : > { %5709 = vmatprep.mubr.msk.f32.mxu0 %vm7681_vm0, %v7682_v6 }
  0x9f   : > { %5710 = vmatmul.mubr.f32.gmra.mrb[60].mxu0 %v495_v56  ;;  %v6869_v56 = vpack.c.bf16 %v4718_v55, %v4717_v54  ;;  %v527_v55 = vld [vmem:[%s7853_s15 + $0x1f0] sm:$0xff] }
  0xa0   : > { %5712 = vmatprep.mubr.msk.f32.mxu0 %vm7681_vm0, %v7682_v6 }
  0xa1   : > { %6870 = vmatprep.subr.bf16.mxu0 %v6869_v56 }
  0xa2   : > { %6872 = vmatpush3.bf16.msra.mxu0 %v6869_v56 }
  0xa3   : > { %5713 = vmatmul.mubr.f32.gmra.mrb[62].mxu0 %v496_v60  ;;  %v6873_v60 = vpack.c.bf16 %v4720_v59, %v4719_v58 }
  0xa4   : > { %5715 = vmatprep.mubr.msk.f32.mxu0 %vm7681_vm0, %v7682_v6 }
  0xa5   : > { %6874 = vmatprep.subr.bf16.mxu0 %v6873_v60 }
  0xa6   : > { %6876 = vmatpush3.bf16.msra.mxu0 %v6873_v60 }
  0xa7   : > { %5716 = vmatmul.mubr.f32.gmra.mrb[64].mxu0 %v497_v0  ;;  %v6877_v0 = vpack.c.bf16 %v4722_v63, %v4721_v62 }
  0xa8   : > { %5718 = vmatprep.mubr.msk.f32.mxu0 %vm7681_vm0, %v7682_v6 }
  0xa9   : > { %6878 = vmatprep.subr.bf16.mxu0 %v6877_v0 }
  0xaa   : > { %6880 = vmatpush3.bf16.msra.mxu0 %v6877_v0 }
  0xab   : > { %5719 = vmatmul.mubr.f32.gmra.mrb[66].mxu0 %v498_v5 }
  0xac   : > { %5721 = vmatprep.mubr.msk.f32.mxu0 %vm7681_vm0, %v7682_v6 }
  0xaf   : > { %5722 = vmatmul.mubr.f32.gmra.mrb[68].mxu0 %v499_v10 }
  0xb0   : > { %5724 = vmatprep.mubr.msk.f32.mxu0 %vm7681_vm0, %v7682_v6 }
  0xb3   : > { %5725 = vmatmul.mubr.f32.gmra.mrb[70].mxu0 %v500_v14 }
  0xb4   : > { %5727 = vmatprep.mubr.msk.f32.mxu0 %vm7681_vm0, %v7682_v6 }
  0xb7   : > { %5728 = vmatmul.mubr.f32.gmra.mrb[72].mxu0 %v501_v18  ;;  %v521_v18 = vld [vmem:[%s7853_s15 + $0x1c0] sm:$0xff] }
  0xb8   : > { %5730 = vmatprep.mubr.msk.f32.mxu0 %vm7681_vm0, %v7682_v6 }
  0xbb   : > { %5731 = vmatmul.mubr.f32.gmra.mrb[74].mxu0 %v502_v22 }
  0xbc   : > { %5733 = vmatprep.mubr.msk.f32.mxu0 %vm7681_vm0, %v7682_v6 }
  0xbf   : > { %5734 = vmatmul.mubr.f32.gmra.mrb[76].mxu0 %v503_v26 }
  0xc0   : > { %5736 = vmatprep.mubr.msk.f32.mxu0 %vm7681_vm0, %v7682_v6 }
  0xc3   : > { %5737 = vmatmul.mubr.f32.gmra.mrb[78].mxu0 %v504_v27 }
  0xc4   : > { %5739 = vmatprep.mubr.msk.f32.mxu0 %vm7681_vm0, %v7682_v6 }
  0xc7   : > { %5740 = vmatmul.mubr.f32.gmra.mrb[80].mxu0 %v505_v28  ;;  %v523_v28 = vld [vmem:[%s7853_s15 + $0x1d0] sm:$0xff] }
  0xc8   : > { %5742 = vmatprep.mubr.msk.f32.mxu0 %vm7681_vm0, %v7682_v6 }
  0xcb   : > { %5743 = vmatmul.mubr.f32.gmra.mrb[82].mxu0 %v506_v29 }
  0xcc   : > { %5745 = vmatprep.mubr.msk.f32.mxu0 %vm7681_vm0, %v7682_v6 }
  0xcf   : > { %5746 = vmatmul.mubr.f32.gmra.mrb[84].mxu0 %v507_v30 }
  0xd0   : > { %5748 = vmatprep.mubr.msk.f32.mxu0 %vm7681_vm0, %v7682_v6 }
  0xd3   : > { %5749 = vmatmul.mubr.f32.gmra.mrb[86].mxu0 %v508_v31 }
  0xd4   : > { %5751 = vmatprep.mubr.msk.f32.mxu0 %vm7681_vm0, %v7682_v6 }
  0xd7   : > { %5752 = vmatmul.mubr.f32.gmra.mrb[88].mxu0 %v509_v32 }
  0xd8   : > { %5754 = vmatprep.mubr.msk.f32.mxu0 %vm7681_vm0, %v7682_v6 }
  0xdb   : > { %5755 = vmatmul.mubr.f32.gmra.mrb[90].mxu0 %v510_v33  ;;  %v524_v33 = vld [vmem:[%s7853_s15 + $0x1d8] sm:$0xff] }
  0xdc   : > { %5757 = vmatprep.mubr.msk.f32.mxu0 %vm7681_vm0, %v7682_v6 }
  0xdf   : > { %5758 = vmatmul.mubr.f32.gmra.mrb[92].mxu0 %v511_v37 }
  0xe0   : > { %5760 = vmatprep.mubr.msk.f32.mxu0 %vm7681_vm0, %v7682_v6 }
  0xe3   : > { %5761 = vmatmul.mubr.f32.gmra.mrb[94].mxu0 %v512_v41 }
  0xe4   : > { %5763 = vmatprep.mubr.msk.f32.mxu0 %vm7681_vm0, %v7682_v6 }
  0xe7   : > { %5764 = vmatmul.mubr.f32.gmra.mrb[96].mxu0 %v513_v45  ;;  %v526_v45 = vld [vmem:[%s7853_s15 + $0x1e8] sm:$0xff] }
  0xe8   : > { %5766 = vmatprep.mubr.msk.f32.mxu0 %vm7681_vm0, %v7682_v6 }
  0xeb   : > { %5767 = vmatmul.mubr.f32.gmra.mrb[98].mxu0 %v514_v49 }
  0xec   : > { %5769 = vmatprep.mubr.msk.f32.mxu0 %vm7681_vm0, %v7682_v6 }
  0xef   : > { %5770 = vmatmul.mubr.f32.gmra.mrb[100].mxu0 %v515_v53 }
  0xf0   : > { %5772 = vmatprep.mubr.msk.f32.mxu0 %vm7681_vm0, %v7682_v6 }
  0xf3   : > { %5773 = vmatmul.mubr.f32.gmra.mrb[102].mxu0 %v516_v57 }
  0xf4   : > { %5775 = vmatprep.mubr.msk.f32.mxu0 %vm7681_vm0, %v7682_v6 }
  0xf7   : > { %5776 = vmatmul.mubr.f32.gmra.mrb[104].mxu0 %v517_v61 }
  0xf8   : > { %5778 = vmatprep.mubr.msk.f32.mxu0 %vm7681_vm0, %v7682_v6 }
  0xfa   : > { %v639_v4 = vpop.f32.mrb[0].mxu0 }
  0xfb   : > { %v640_v5 = vadd.f32 %v8111_v1, %v639_v4  ;;  %v5621_v7 = vpop.f32.mrb[1].mxu0  ;;  %5779 = vmatmul.mubr.f32.gmra.mrb[106].mxu0 %v518_v2  ;;  %v528_v4 = vld [vmem:[%s7853_s15 + $0x1f8] sm:$0xff] }
  0xfc   : > { %5781 = vmatprep.mubr.msk.f32.mxu0 %vm7681_vm0, %v7682_v6 }
  0xfd   : > { %v1063_v9 = vmax.f32 %v640_v5, 0.0 }
  0xfe   : > { %v644_v10 = vpop.f32.mrb[2].mxu0 }
  0xff   : > { %1148 = vst [vmem:[#allocation2] sm:$0xff] %v1063_v9  ;;  %v645_v11 = vadd.f32 %v8111_v1, %v644_v10  ;;  %v5624_v12 = vpop.f32.mrb[3].mxu0  ;;  %5782 = vmatmul.mubr.f32.gmra.mrb[108].mxu0 %v519_v8 }
 0x100   : > { %5784 = vmatprep.mubr.msk.f32.mxu0 %vm7681_vm0, %v7682_v6 }
 0x101   : > { %v1064_v14 = vmax.f32 %v645_v11, 0.0  ;;  %v529_v11 = vld [vmem:[%s7853_s15 + $0x200] sm:$0xff] }
 0x102   : > { %v649_v15 = vpop.f32.mrb[4].mxu0 }
 0x103   : > { %1149 = vst [vmem:[#allocation2 + $0x8] sm:$0xff] %v1064_v14  ;;  %v650_v16 = vadd.f32 %v8111_v1, %v649_v15  ;;  %v5627_v17 = vpop.f32.mrb[5].mxu0  ;;  %5785 = vmatmul.mubr.f32.gmra.mrb[110].mxu0 %v520_v13 }
 0x104   : > { %5787 = vmatprep.mubr.msk.f32.mxu0 %vm7681_vm0, %v7682_v6 }
 0x105   : > { %v1065_v19 = vmax.f32 %v650_v16, 0.0  ;;  %v530_v16 = vld [vmem:[%s7853_s15 + $0x208] sm:$0xff] }
 0x106   : > { %v654_v20 = vpop.f32.mrb[6].mxu0 }
 0x107   : > { %1150 = vst [vmem:[#allocation2 + $0x10] sm:$0xff] %v1065_v19  ;;  %v655_v21 = vadd.f32 %v8111_v1, %v654_v20  ;;  %v5630_v22 = vpop.f32.mrb[7].mxu0  ;;  %5788 = vmatmul.mubr.f32.gmra.mrb[112].mxu0 %v521_v18 }
 0x108   : > { %5790 = vmatprep.mubr.msk.f32.mxu0 %vm7681_vm0, %v7682_v6  ;;  %v531_v22 = vld [vmem:[%s7853_s15 + $0x210] sm:$0xff] }
 0x109   : > { %v1066_v24 = vmax.f32 %v655_v21, 0.0 }
 0x10a   : > { %v659_v25 = vpop.f32.mrb[8].mxu0  ;;  %v1233_v43 = vld [vmem:[#allocation2] ss:$2 sm:$0xff]  ;;  %v1237_v44 = vld [vmem:[#allocation2 + $0x1] ss:$2 sm:$0xff] }
 0x10b   : > { %1151 = vst [vmem:[#allocation2 + $0x18] sm:$0xff] %v1066_v24  ;;  %v660_v26 = vadd.f32 %v8111_v1, %v659_v25  ;;  %v5633_v27 = vpop.f32.mrb[9].mxu0  ;;  %5791 = vmatmul.mubr.f32.gmra.mrb[114].mxu0 %v522_v23  ;;  %v1240_v50 = vmax.f32 %v1233_v43, %v1237_v44 }
 0x10c   : > { %5793 = vmatprep.mubr.msk.f32.mxu0 %vm7681_vm0, %v7682_v6 }
 0x10d   : > { %v1067_v29 = vmax.f32 %v660_v26, 0.0 }
 0x10e   : > { %v664_v30 = vpop.f32.mrb[10].mxu0 }
 0x10f   : > { %1152 = vst [vmem:[#allocation2 + $0x20] sm:$0xff] %v1067_v29  ;;  %v665_v31 = vadd.f32 %v8111_v1, %v664_v30  ;;  %v5636_v32 = vpop.f32.mrb[11].mxu0  ;;  %5794 = vmatmul.mubr.f32.gmra.mrb[116].mxu0 %v523_v28  ;;  %v532_v29 = vld [vmem:[%s7853_s15 + $0x218] sm:$0xff] }
 0x110   : > { %5796 = vmatprep.mubr.msk.f32.mxu0 %vm7681_vm0, %v7682_v6 }
 0x111   : > { %v1068_v34 = vmax.f32 %v665_v31, 0.0 }
 0x112   : > { %v669_v35 = vpop.f32.mrb[12].mxu0  ;;  %v1235_v54 = vld [vmem:[#allocation2 + $0x10] ss:$2 sm:$0x1f] }
 0x113   : > { %1153 = vst [vmem:[#allocation2 + $0x28] sm:$0xff] %v1068_v34  ;;  %5797 = vmatmul.mubr.f32.gmra.mrb[118].mxu0 %v524_v33  ;;  %v670_v36 = vadd.f32 %v8111_v1, %v669_v35  ;;  %v5639_v37 = vpop.f32.mrb[13].mxu0  ;;  %v1239_v56 = vld [vmem:[#allocation2 + $0x11] ss:$2 sm:$0x1f] }
 0x114   : > { %5799 = vmatprep.mubr.msk.f32.mxu0 %vm7681_vm0, %v7682_v6  ;;  %v1241_v63 = vmax.f32 %v1235_v54, %v1239_v56  ;;  %v535_v56 = vld [vmem:[%s7853_s15 + $0x230] sm:$0xff] }
 0x115   : > { %v1069_v39 = vmax.f32 %v670_v36, 0.0 }
 0x116   : > { %v674_v40 = vpop.f32.mrb[14].mxu0 }
 0x117   : > { %v675_v41 = vadd.f32 %v8111_v1, %v674_v40  ;;  %v5642_v42 = vpop.f32.mrb[15].mxu0  ;;  %5800 = vmatmul.mubr.f32.gmra.mrb[120].mxu0 %v525_v38  ;;  %1154 = vst [vmem:[#allocation2 + $0x30] sm:$0xff] %v1069_v39  ;;  %v533_v39 = vld [vmem:[%s7853_s15 + $0x220] sm:$0xff] }
 0x118   : > { %5802 = vmatprep.mubr.msk.f32.mxu0 %vm7681_vm0, %v7682_v6 }
 0x119   : > { %v1070_v46 = vmax.f32 %v675_v41, 0.0 }
 0x11a   : > { %v1243_v47 = vld [vmem:[#allocation2 + $0x1a] ss:$2 sm:$0xff]  ;;  %v1247_v48 = vld [vmem:[#allocation2 + $0x1b] ss:$2 sm:$0xff]  ;;  %v679_v49 = vpop.f32.mrb[16].mxu0 }
 0x11b   : > { %v1250_v51 = vmax.f32 %v1243_v47, %v1247_v48  ;;  %1155 = vst [vmem:[#allocation2 + $0x38] sm:$0xff] %v1070_v46  ;;  %v680_v52 = vadd.f32 %v8111_v1, %v679_v49  ;;  %v5645_v53 = vpop.f32.mrb[17].mxu0  ;;  %5803 = vmatmul.mubr.f32.gmra.mrb[122].mxu0 %v526_v45 }
 0x11c   : > { %5805 = vmatprep.mubr.msk.f32.mxu0 %vm7681_vm0, %v7682_v6 }
 0x11d   : > { %v1071_v57 = vmax.f32 %v680_v52, 0.0  ;;  %v1252_v58 = vmax.f32 %v1240_v50, %v1250_v51  ;;  %v534_v50 = vld [vmem:[%s7853_s15 + $0x228] sm:$0xff] }
 0x11e   : > { %v684_v59 = vpop.f32.mrb[18].mxu0  ;;  %v1245_v60 = vld [vmem:[#allocation2 + $0x2a] ss:$2 sm:$0x1f] }
 0x11f   : > { %v1249_v61 = vld [vmem:[#allocation2 + $0x2b] ss:$2 sm:$0x1f]  ;;  %1156 = vst [vmem:[#allocation2 + $0x40] sm:$0xff] %v1071_v57  ;;  %v685_v62 = vadd.f32 %v8111_v1, %v684_v59  ;;  %5806 = vmatmul.mubr.f32.gmra.mrb[124].mxu0 %v527_v55  ;;  %1254 = vst [vmem:[#allocation3] sm:$0xff] %v1252_v58  ;;  %v5648_v2 = vpop.f32.mrb[19].mxu0 }
 0x120   : > { %v1251_v0 = vmax.f32 %v1245_v60, %v1249_v61  ;;  %5808 = vmatprep.mubr.msk.f32.mxu0 %vm7681_vm0, %v7682_v6 }
 0x121   : > { %v1072_v5 = vmax.f32 %v685_v62, 0.0  ;;  %v536_v62 = vld [vmem:[%s7853_s15 + $0x238] sm:$0xff] }
 0x122   : > { %v689_v7 = vpop.f32.mrb[20].mxu0  ;;  %v1253_v8 = vmax.f32 %v1241_v63, %v1251_v0 }
 0x123   : > { %1157 = vst [vmem:[#allocation2 + $0x48] sm:$0xff] %v1072_v5  ;;  %v690_v9 = vadd.f32 %v8111_v1, %v689_v7  ;;  %v5651_v10 = vpop.f32.mrb[21].mxu0  ;;  %5809 = vmatmul.mubr.f32.gmra.mrb[126].mxu0 %v528_v4  ;;  %v537_v7 = vld [vmem:[%s7853_s15 + $0x240] sm:$0xff] }
 0x124   : > { %5811 = vmatprep.mubr.msk.f32.mxu0 %vm7681_vm0, %v7682_v6  ;;  %1255 = vst [vmem:[#allocation3 + $0x8] sm:$0x1f] %v1253_v8 }
 0x125   : > { %v1073_v12 = vmax.f32 %v690_v9, 0.0 }
 0x126   : > { %v694_v13 = vpop.f32.mrb[22].mxu0  ;;  %v1257_v27 = vld [vmem:[#allocation2 + $0x34] ss:$2 sm:$0xff]  ;;  %v1261_v28 = vld [vmem:[#allocation2 + $0x35] ss:$2 sm:$0xff] }
 0x127   : > { %1158 = vst [vmem:[#allocation2 + $0x50] sm:$0xff] %v1073_v12  ;;  %v695_v14 = vadd.f32 %v8111_v1, %v694_v13  ;;  %v5654_v15 = vpop.f32.mrb[23].mxu0  ;;  %5812 = vmatmul.mubr.f32.gmra.mrb[128].mxu0 %v529_v11  ;;  %v1264_v34 = vmax.f32 %v1257_v27, %v1261_v28  ;;  %v538_v12 = vld [vmem:[%s7853_s15 + $0x248] sm:$0xff] }
 0x128   : > { %5814 = vmatprep.mubr.msk.f32.mxu0 %vm7681_vm0, %v7682_v6 }
 0x129   : > { %v1074_v17 = vmax.f32 %v695_v14, 0.0 }
 0x12a   : > { %v699_v18 = vpop.f32.mrb[24].mxu0  ;;  %v1259_v38 = vld [vmem:[#allocation2 + $0x44] ss:$2 sm:$0x1f] }
 0x12b   : > { %1159 = vst [vmem:[#allocation2 + $0x58] sm:$0xff] %v1074_v17  ;;  %5815 = vmatmul.mubr.f32.gmra.mrb[130].mxu0 %v530_v16  ;;  %v1923_v19 = vld [vmem:[#allocation3 + $0x2] sm:$0xff]  ;;  %v700_v20 = vadd.f32 %v8111_v1, %v699_v18  ;;  %v5657_v21 = vpop.f32.mrb[25].mxu0 }
 0x12c   : > { %6024 = vmatprep.mubr.f32.mxu1 %v1923_v19  ;;  %5817 = vmatprep.mubr.msk.f32.mxu0 %vm7681_vm0, %v7682_v6  ;;  %v1263_v40 = vld [vmem:[#allocation2 + $0x45] ss:$2 sm:$0x1f]  ;;  %v539_v19 = vld [vmem:[%s7853_s15 + $0x250] sm:$0xff] }
 0x12d   : > { %v1075_v23 = vmax.f32 %v700_v20, 0.0  ;;  %v1265_v47 = vmax.f32 %v1259_v38, %v1263_v40  ;;  %v541_v40 = vld [vmem:[%s7853_s15 + $0x260] sm:$0xff] }
 0x12e   : > { %v704_v24 = vpop.f32.mrb[26].mxu0 }
 0x12f   : > { %v705_v25 = vadd.f32 %v8111_v1, %v704_v24  ;;  %v5660_v26 = vpop.f32.mrb[27].mxu0  ;;  %5818 = vmatmul.mubr.f32.gmra.mrb[132].mxu0 %v531_v22  ;;  %1160 = vst [vmem:[#allocation2 + $0x60] sm:$0xff] %v1075_v23 }
 0x130   : > { %5820 = vmatprep.mubr.msk.f32.mxu0 %vm7681_vm0, %v7682_v6 }
 0x131   : > { %v1076_v30 = vmax.f32 %v705_v25, 0.0 }
 0x132   : > { %v1267_v31 = vld [vmem:[#allocation2 + $0x4e] ss:$2 sm:$0xff]  ;;  %v1271_v32 = vld [vmem:[#allocation2 + $0x4f] ss:$2 sm:$0xff]  ;;  %v709_v33 = vpop.f32.mrb[28].mxu0 }
 0x133   : > { %v1274_v35 = vmax.f32 %v1267_v31, %v1271_v32  ;;  %1161 = vst [vmem:[#allocation2 + $0x68] sm:$0xff] %v1076_v30  ;;  %v710_v36 = vadd.f32 %v8111_v1, %v709_v33  ;;  %v5663_v37 = vpop.f32.mrb[29].mxu0  ;;  %5821 = vmatmul.mubr.f32.gmra.mrb[134].mxu0 %v532_v29  ;;  %v8201_v29 = vld [vmem:[#allocation3 + $0x20] sm:$0xff]  ;;  %v540_v30 = vld [vmem:[%s7853_s15 + $0x258] sm:$0xff] }
 0x134   : > { %5823 = vmatprep.mubr.msk.f32.mxu0 %vm7681_vm0, %v7682_v6 }
 0x135   : > { %v1276_v41 = vmax.f32 %v1264_v34, %v1274_v35  ;;  %v1077_v42 = vmax.f32 %v710_v36, 0.0 }
 0x136   : > { %v714_v43 = vpop.f32.mrb[30].mxu0  ;;  %v1269_v44 = vld [vmem:[#allocation2 + $0x5e] ss:$2 sm:$0x1f] }
 0x137   : > { %1278 = vst [vmem:[#allocation3 + $0xd] sm:$0xff] %v1276_v41  ;;  %v1273_v45 = vld [vmem:[#allocation2 + $0x5f] ss:$2 sm:$0x1f]  ;;  %1162 = vst [vmem:[#allocation2 + $0x70] sm:$0xff] %v1077_v42  ;;  %v715_v46 = vadd.f32 %v8111_v1, %v714_v43  ;;  %5824 = vmatmul.mubr.f32.gmra.mrb[136].mxu0 %v533_v39  ;;  %v5666_v49 = vpop.f32.mrb[31].mxu0 }
 0x138   : > { %v1275_v48 = vmax.f32 %v1269_v44, %v1273_v45  ;;  %5826 = vmatprep.mubr.msk.f32.mxu0 %vm7681_vm0, %v7682_v6 }
 0x139   : > { %v1078_v51 = vmax.f32 %v715_v46, 0.0  ;;  %v542_v46 = vld [vmem:[%s7853_s15 + $0x268] sm:$0xff] }
 0x13a   : > { %v1277_v52 = vmax.f32 %v1265_v47, %v1275_v48  ;;  %v719_v53 = vpop.f32.mrb[32].mxu0 }
 0x13b   : > { %1163 = vst [vmem:[#allocation2 + $0x78] sm:$0xff] %v1078_v51  ;;  %v720_v54 = vadd.f32 %v8111_v1, %v719_v53  ;;  %v5669_v55 = vpop.f32.mrb[33].mxu0  ;;  %5827 = vmatmul.mubr.f32.gmra.mrb[138].mxu0 %v534_v50  ;;  %v543_v51 = vld [vmem:[%s7853_s15 + $0x270] sm:$0xff] }
 0x13c   : > { %1279 = vst [vmem:[#allocation3 + $0x15] sm:$0x1f] %v1277_v52  ;;  %5829 = vmatprep.mubr.msk.f32.mxu0 %vm7681_vm0, %v7682_v6 }
 0x13d   : > { %v1079_v57 = vmax.f32 %v720_v54, 0.0 }
 0x13e   : > { %v724_v58 = vpop.f32.mrb[34].mxu0  ;;  %v1924_v59 = vld [vmem:[#allocation3 + $0xa] sm:$0xff] }
 0x13f   : > { %1164 = vst [vmem:[#allocation2 + $0x80] sm:$0xff] %v1079_v57  ;;  %v725_v60 = vadd.f32 %v8111_v1, %v724_v58  ;;  %v5672_v61 = vpop.f32.mrb[35].mxu0  ;;  %5830 = vmatmul.mubr.f32.gmra.mrb[140].mxu0 %v535_v56  ;;  %6025 = vmatmul.mubr.f32.vlgmr.msra.gmra.mrb[0].mxu1 %v1924_v59  ;;  %v1281_v17 = vld [vmem:[#allocation2 + $0x68] ss:$2 sm:$0xff]  ;;  %v1285_v18 = vld [vmem:[#allocation2 + $0x69] ss:$2 sm:$0xff] }
 0x140   : > { %5832 = vmatprep.mubr.msk.f32.mxu0 %vm7681_vm0, %v7682_v6  ;;  %v1288_v24 = vmax.f32 %v1281_v17, %v1285_v18  ;;  %v544_v56 = vld [vmem:[%s7853_s15 + $0x278] sm:$0xff] }
 0x141   : > { %v1080_v63 = vmax.f32 %v725_v60, 0.0 }
 0x142   : > { %v729_v0 = vpop.f32.mrb[36].mxu0 }
 0x143   : > { %1165 = vst [vmem:[#allocation2 + $0x88] sm:$0xff] %v1080_v63  ;;  %v730_v2 = vadd.f32 %v8111_v1, %v729_v0  ;;  %v5675_v4 = vpop.f32.mrb[37].mxu0  ;;  %5833 = vmatmul.mubr.f32.gmra.mrb[142].mxu0 %v536_v62  ;;  %v1925_v5 = vld [vmem:[#allocation3 + $0x12] sm:$0xff] }
 0x144   : > { %6027 = vmatprep.mubr.f32.mxu1 %v1925_v5  ;;  %5835 = vmatprep.mubr.msk.f32.mxu0 %vm7681_vm0, %v7682_v6  ;;  %v545_v63 = vld [vmem:[%s7853_s15 + $0x280] sm:$0xff] }
 0x145   : > { %v1081_v8 = vmax.f32 %v730_v2, 0.0 }
 0x146   : > { %v734_v9 = vpop.f32.mrb[38].mxu0  ;;  %v1283_v28 = vld [vmem:[#allocation2 + $0x78] ss:$2 sm:$0x1f] }
 0x147   : > { %1166 = vst [vmem:[#allocation2 + $0x90] sm:$0xff] %v1081_v8  ;;  %5836 = vmatmul.mubr.f32.gmra.mrb[144].mxu0 %v537_v7  ;;  %v735_v10 = vadd.f32 %v8111_v1, %v734_v9  ;;  %v5678_v11 = vpop.f32.mrb[39].mxu0 }
 0x148   : > { %5838 = vmatprep.mubr.msk.f32.mxu0 %vm7681_vm0, %v7682_v6 }
 0x149   : > { %v1082_v13 = vmax.f32 %v735_v10, 0.0 }
 0x14a   : > { %v739_v14 = vpop.f32.mrb[40].mxu0 }
 0x14b   : > { %v740_v15 = vadd.f32 %v8111_v1, %v739_v14  ;;  %v5681_v16 = vpop.f32.mrb[41].mxu0  ;;  %5839 = vmatmul.mubr.f32.gmra.mrb[146].mxu0 %v538_v12  ;;  %1167 = vst [vmem:[#allocation2 + $0x98] sm:$0xff] %v1082_v13  ;;  %v546_v12 = vld [vmem:[%s7853_s15 + $0x288] sm:$0xff] }
 0x14c   : > { %5841 = vmatprep.mubr.msk.f32.mxu0 %vm7681_vm0, %v7682_v6  ;;  %v1287_v6 = vld [vmem:[#allocation2 + $0x79] ss:$2 sm:$0x1f] }
 0x14d   : > { %v1083_v20 = vmax.f32 %v740_v15, 0.0  ;;  %v1289_v37 = vmax.f32 %v1283_v28, %v1287_v6 }
 0x14e   : > { %v1291_v21 = vld [vmem:[#allocation2 + $0x82] ss:$2 sm:$0xff]  ;;  %v1295_v22 = vld [vmem:[#allocation2 + $0x83] ss:$2 sm:$0xff]  ;;  %v744_v23 = vpop.f32.mrb[42].mxu0 }
 0x14f   : > { %v1298_v25 = vmax.f32 %v1291_v21, %v1295_v22  ;;  %1168 = vst [vmem:[#allocation2 + $0xa0] sm:$0xff] %v1083_v20  ;;  %v745_v26 = vadd.f32 %v8111_v1, %v744_v23  ;;  %v5684_v27 = vpop.f32.mrb[43].mxu0  ;;  %5842 = vmatmul.mubr.f32.gmra.mrb[148].mxu0 %v539_v19  ;;  %v547_v23 = vld [vmem:[%s7853_s15 + $0x290] sm:$0xff] }
 0x150   : > { %5844 = vmatprep.mubr.msk.f32.mxu0 %vm7681_vm0, %v8201_v29 }
 0x151   : > { %v1300_v31 = vmax.f32 %v1288_v24, %v1298_v25  ;;  %v1084_v32 = vmax.f32 %v745_v26, 0.0 }
 0x152   : > { %v749_v33 = vpop.f32.mrb[44].mxu0  ;;  %v1293_v34 = vld [vmem:[#allocation2 + $0x92] ss:$2 sm:$0x1f] }
 0x153   : > { %1302 = vst [vmem:[#allocation3 + $0x1a] sm:$0xff] %v1300_v31  ;;  %v1297_v35 = vld [vmem:[#allocation2 + $0x93] ss:$2 sm:$0x1f]  ;;  %1169 = vst [vmem:[#allocation2 + $0xa8] sm:$0xff] %v1084_v32  ;;  %v750_v36 = vadd.f32 %v8111_v1, %v749_v33  ;;  %5845 = vmatmul.mubr.f32.gmra.mrb[150].mxu0 %v540_v30  ;;  %6028 = vmatmul.mubr.f32.gmra.mrb[2].mxu1 %v1300_v31  ;;  %v5687_v39 = vpop.f32.mrb[45].mxu0 }
 0x154   : > { %v1299_v38 = vmax.f32 %v1293_v34, %v1297_v35  ;;  %5847 = vmatprep.mubr.msk.f32.mxu0 %vm7681_vm0, %v8201_v29  ;;  %v548_v30 = vld [vmem:[%s7853_s15 + $0x298] sm:$0xff]  ;;  %v549_v35 = vld [vmem:[%s7853_s15 + $0x2a0] sm:$0xff] }
 0x155   : > { %v1085_v41 = vmax.f32 %v750_v36, 0.0 }
 0x156   : > { %v754_v42 = vpop.f32.mrb[46].mxu0  ;;  %v1301_v43 = vmax.f32 %v1289_v37, %v1299_v38 }
 0x157   : > { %1170 = vst [vmem:[#allocation2 + $0xb0] sm:$0xff] %v1085_v41  ;;  %v755_v44 = vadd.f32 %v8111_v1, %v754_v42  ;;  %v5690_v45 = vpop.f32.mrb[47].mxu0  ;;  %5848 = vmatmul.mubr.f32.gmra.mrb[152].mxu0 %v541_v40  ;;  %v1578_v41 = vld [vmem:[#allocation3 + $0x1] sm:$0xff] }
 0x158   : > { %5850 = vmatprep.mubr.msk.f32.mxu0 %vm7681_vm0, %v8201_v29  ;;  %1303 = vst [vmem:[#allocation3 + $0x22] sm:$0x1f] %v1301_v43  ;;  %v1579_v43 = vld [vmem:[#allocation3 + $0x9] sm:$0xff]  ;;  %v1580_v45 = vld [vmem:[#allocation3 + $0x11] sm:$0xff] }
 0x159   : > { %v1086_v47 = vmax.f32 %v755_v44, 0.0 }
 0x15a   : > { %v759_v48 = vpop.f32.mrb[48].mxu0  ;;  %v1305_v61 = vld [vmem:[#allocation2 + $0x9c] ss:$2 sm:$0xff]  ;;  %v1309_v62 = vld [vmem:[#allocation2 + $0x9d] ss:$2 sm:$0xff] }
 0x15b   : > { %1171 = vst [vmem:[#allocation2 + $0xb8] sm:$0xff] %v1086_v47  ;;  %v760_v49 = vadd.f32 %v8111_v1, %v759_v48  ;;  %v5693_v50 = vpop.f32.mrb[49].mxu0  ;;  %5851 = vmatmul.mubr.f32.gmra.mrb[154].mxu0 %v542_v46  ;;  %v1312_v7 = vmax.f32 %v1305_v61, %v1309_v62 }
 0x15c   : > { %5853 = vmatprep.mubr.msk.f32.mxu0 %vm7681_vm0, %v8201_v29 }
 0x15d   : > { %v1087_v52 = vmax.f32 %v760_v49, 0.0  ;;  %v1581_v49 = vld [vmem:[#allocation3 + $0x19] sm:$0xff] }
 0x15e   : > { %v764_v53 = vpop.f32.mrb[50].mxu0  ;;  %v1307_v11 = vld [vmem:[#allocation2 + $0xac] ss:$2 sm:$0x1f] }
 0x15f   : > { %1172 = vst [vmem:[#allocation2 + $0xc0] sm:$0xff] %v1087_v52  ;;  %5854 = vmatmul.mubr.f32.gmra.mrb[156].mxu0 %v543_v51  ;;  %v765_v54 = vadd.f32 %v8111_v1, %v764_v53  ;;  %v5696_v55 = vpop.f32.mrb[51].mxu0  ;;  %v1311_v13 = vld [vmem:[#allocation2 + $0xad] ss:$2 sm:$0x1f] }
 0x160   : > { %5856 = vmatprep.mubr.msk.f32.mxu0 %vm7681_vm0, %v8201_v29  ;;  %v1313_v20 = vmax.f32 %v1307_v11, %v1311_v13 }
 0x161   : > { %v1088_v57 = vmax.f32 %v765_v54, 0.0 }
 0x162   : > { %v769_v58 = vpop.f32.mrb[52].mxu0 }
 0x163   : > { %v770_v59 = vadd.f32 %v8111_v1, %v769_v58  ;;  %v5699_v60 = vpop.f32.mrb[53].mxu0  ;;  %5857 = vmatmul.mubr.f32.gmra.mrb[158].mxu0 %v544_v56  ;;  %1173 = vst [vmem:[#allocation2 + $0xc8] sm:$0xff] %v1088_v57 }
 0x164   : > { %5859 = vmatprep.mubr.msk.f32.mxu0 %vm7681_vm0, %v8201_v29 }
 0x165   : > { %v1089_v0 = vmax.f32 %v770_v59, 0.0 }
 0x166   : > { %v1315_v2 = vld [vmem:[#allocation2 + $0xb6] ss:$2 sm:$0xff]  ;;  %v1319_v4 = vld [vmem:[#allocation2 + $0xb7] ss:$2 sm:$0xff]  ;;  %v774_v5 = vpop.f32.mrb[54].mxu0 }
 0x167   : > { %v1322_v8 = vmax.f32 %v1315_v2, %v1319_v4  ;;  %1174 = vst [vmem:[#allocation2 + $0xd0] sm:$0xff] %v1089_v0  ;;  %v775_v9 = vadd.f32 %v8111_v1, %v774_v5  ;;  %v5702_v10 = vpop.f32.mrb[55].mxu0  ;;  %5860 = vmatmul.mubr.f32.gmra.mrb[160].mxu0 %v545_v63 }
 0x168   : > { %5862 = vmatprep.mubr.msk.f32.mxu0 %vm7681_vm0, %v8201_v29 }
 0x169   : > { %v1324_v14 = vmax.f32 %v1312_v7, %v1322_v8  ;;  %v1090_v15 = vmax.f32 %v775_v9, 0.0 }
 0x16a   : > { %v779_v16 = vpop.f32.mrb[56].mxu0  ;;  %v1317_v17 = vld [vmem:[#allocation2 + $0xc6] ss:$2 sm:$0x1f] }
 0x16b   : > { %1326 = vst [vmem:[#allocation3 + $0x27] sm:$0xff] %v1324_v14  ;;  %v1321_v18 = vld [vmem:[#allocation2 + $0xc7] ss:$2 sm:$0x1f]  ;;  %1175 = vst [vmem:[#allocation2 + $0xd8] sm:$0xff] %v1090_v15  ;;  %v780_v19 = vadd.f32 %v8111_v1, %v779_v16  ;;  %5863 = vmatmul.mubr.f32.gmra.mrb[162].mxu0 %v546_v12  ;;  %v5705_v22 = vpop.f32.mrb[57].mxu0 }
 0x16c   : > { %v1323_v21 = vmax.f32 %v1317_v17, %v1321_v18  ;;  %5865 = vmatprep.mubr.msk.f32.mxu0 %vm7681_vm0, %v8201_v29 }
 0x16d   : > { %v1091_v24 = vmax.f32 %v780_v19, 0.0 }
 0x16e   : > { %v1325_v25 = vmax.f32 %v1313_v20, %v1323_v21  ;;  %v784_v26 = vpop.f32.mrb[58].mxu0 }
 0x16f   : > { %1176 = vst [vmem:[#allocation2 + $0xe0] sm:$0xff] %v1091_v24  ;;  %v785_v27 = vadd.f32 %v8111_v1, %v784_v26  ;;  %v5708_v28 = vpop.f32.mrb[59].mxu0  ;;  %5866 = vmatmul.mubr.f32.gmra.mrb[164].mxu0 %v547_v23 }
 0x170   : > { %1327 = vst [vmem:[#allocation3 + $0x2f] sm:$0x1f] %v1325_v25  ;;  %5868 = vmatprep.mubr.msk.f32.mxu0 %vm7681_vm0, %v8201_v29 }
 0x171   : > { %v1092_v6 = vmax.f32 %v785_v27, 0.0 }
 0x172   : > { %v789_v31 = vpop.f32.mrb[60].mxu0  ;;  %v1927_v32 = vld [vmem:[#allocation3 + $0x22] sm:$0xff] }
 0x173   : > { %1177 = vst [vmem:[#allocation2 + $0xe8] sm:$0xff] %v1092_v6  ;;  %v790_v33 = vadd.f32 %v8111_v1, %v789_v31  ;;  %v5711_v34 = vpop.f32.mrb[61].mxu0  ;;  %5869 = vmatmul.mubr.f32.gmra.mrb[166].mxu0 %v548_v30  ;;  %6030 = vmatprep.mubr.f32.mxu1 %v1927_v32  ;;  %v1582_v52 = vld [vmem:[#allocation3 + $0x21] sm:$0xff]  ;;  %v1333_v54 = vld [vmem:[#allocation2 + $0xd1] ss:$2 sm:$0xff] }
 0x174   : > { %5871 = vmatprep.mubr.msk.f32.mxu0 %vm7681_vm0, %v8201_v29  ;;  %v1329_v53 = vld [vmem:[#allocation2 + $0xd0] ss:$2 sm:$0xff] }
 0x175   : > { %v1093_v36 = vmax.f32 %v790_v33, 0.0  ;;  %v1336_v60 = vmax.f32 %v1329_v53, %v1333_v54 }
 0x176   : > { %v794_v37 = vpop.f32.mrb[62].mxu0 }
 0x177   : > { %1178 = vst [vmem:[#allocation2 + $0xf0] sm:$0xff] %v1093_v36  ;;  %v795_v38 = vadd.f32 %v8111_v1, %v794_v37  ;;  %v5714_v39 = vpop.f32.mrb[63].mxu0  ;;  %5872 = vmatmul.mubr.f32.gmra.mrb[168].mxu0 %v549_v35  ;;  %v1928_v40 = vld [vmem:[#allocation3 + $0x2a] sm:$0xff] }
 0x178   : > { %6031 = vmatmul.mubr.f32.gmra.mrb[4].mxu1 %v1928_v40  ;;  %5906 = vmatprep.mubr.f32.mxu0 %v1578_v41  ;;  %v1583_v59 = vld [vmem:[#allocation3 + $0x29] sm:$0xff] }
 0x179   : > { %v1094_v42 = vmax.f32 %v795_v38, 0.0 }
 0x17a   : > { %v799_v44 = vpop.f32.mrb[64].mxu0  ;;  %v1331_v0 = vld [vmem:[#allocation2 + $0xe0] ss:$2 sm:$0x1f] }
 0x17b   : > { %1179 = vst [vmem:[#allocation2 + $0xf8] sm:$0xff] %v1094_v42  ;;  %5907 = vmatmul.mubr.f32.vlgmr.msra.gmra.mrb[170].mxu0 %v1579_v43  ;;  %v800_v29 = vadd.f32 %v8111_v1, %v799_v44  ;;  %v5717_v46 = vpop.f32.mrb[65].mxu0  ;;  %v1335_v2 = vld [vmem:[#allocation2 + $0xe1] ss:$2 sm:$0x1f] }
 0x17c   : > { %5909 = vmatprep.mubr.f32.mxu0 %v1580_v45  ;;  %v1337_v11 = vmax.f32 %v1331_v0, %v1335_v2 }
 0x17d   : > { %v1095_v47 = vmax.f32 %v800_v29, 0.0 }
 0x17e   : > { %v804_v48 = vpop.f32.mrb[66].mxu0 }
 0x17f   : > { %v805_v50 = vadd.f32 %v8111_v1, %v804_v48  ;;  %v5720_v51 = vpop.f32.mrb[67].mxu0  ;;  %5910 = vmatmul.mubr.f32.gmra.mrb[172].mxu0 %v1581_v49  ;;  %1180 = vst [vmem:[#allocation2 + $0x100] sm:$0xff] %v1095_v47 }
 0x180   : > { %5912 = vmatprep.mubr.f32.mxu0 %v1582_v52 }
 0x181   : > { %v1096_v55 = vmax.f32 %v805_v50, 0.0 }
 0x182   : > { %v1339_v56 = vld [vmem:[#allocation2 + $0xea] ss:$2 sm:$0xff]  ;;  %v1343_v57 = vld [vmem:[#allocation2 + $0xeb] ss:$2 sm:$0xff]  ;;  %v809_v58 = vpop.f32.mrb[68].mxu0 }
 0x183   : > { %v1346_v61 = vmax.f32 %v1339_v56, %v1343_v57  ;;  %1181 = vst [vmem:[#allocation2 + $0x108] sm:$0xff] %v1096_v55  ;;  %v810_v62 = vadd.f32 %v8111_v1, %v809_v58  ;;  %v5723_v63 = vpop.f32.mrb[69].mxu0  ;;  %5913 = vmatmul.mubr.f32.gmra.mrb[174].mxu0 %v1583_v59 }
 0x185   : > { %v1348_v4 = vmax.f32 %v1336_v60, %v1346_v61  ;;  %v1097_v5 = vmax.f32 %v810_v62, 0.0  ;;  %v4739_v60 = vld [vmem:[%s9372_s3 + $0x180] sm:$0xff]  ;;  %v4740_v61 = vld [vmem:[%s9372_s3 + $0x188] sm:$0xff] }
 0x186   : > { %v814_v7 = vpop.f32.mrb[70].mxu0  ;;  %v1341_v8 = vld [vmem:[#allocation2 + $0xfa] ss:$2 sm:$0x1f]  ;;  %v6945_v2 = vpack.c.bf16 %v4740_v61, %v4739_v60  ;;  %v1572_v61 = vld [vmem:[%s9372_s3 + $0x50] sm:$0xff] }
 0x187   : > { %1350 = vst [vmem:[#allocation3 + $0x34] sm:$0xff] %v1348_v4  ;;  %v1345_v9 = vld [vmem:[#allocation2 + $0xfb] ss:$2 sm:$0x1f]  ;;  %1182 = vst [vmem:[#allocation2 + $0x110] sm:$0xff] %v1097_v5  ;;  %v815_v10 = vadd.f32 %v8111_v1, %v814_v7  ;;  %v5726_v13 = vpop.f32.mrb[71].mxu0 }
 0x188   : > { %v1347_v12 = vmax.f32 %v1341_v8, %v1345_v9  ;;  %v1562_v62 = vld [vmem:[%s9372_s3] sm:$0xff]  ;;  %v1563_v7 = vld [vmem:[%s9372_s3 + $0x8] sm:$0xff]  ;;  %6946 = vmatprep.subr.bf16.mxu1 %v6945_v2  ;;  %v4750_v60 = vld [vmem:[%s9372_s3 + $0x1d8] sm:$0xff] }
 0x189   : > { %v1098_v14 = vmax.f32 %v815_v10, 0.0  ;;  %v6881_v8 = vpack.c.bf16 %v1563_v7, %v1562_v62  ;;  %6948 = vmatpush3.bf16.msra.mxu1 %v6945_v2  ;;  %v4741_v10 = vld [vmem:[%s9372_s3 + $0x190] sm:$0xff] }
 0x18a   : > { %v1349_v15 = vmax.f32 %v1337_v11, %v1347_v12  ;;  %v819_v16 = vpop.f32.mrb[72].mxu0  ;;  %v4742_v11 = vld [vmem:[%s9372_s3 + $0x198] sm:$0xff]  ;;  %v1564_v12 = vld [vmem:[%s9372_s3 + $0x10] sm:$0xff] }
 0x18b   : > { %1183 = vst [vmem:[#allocation2 + $0x118] sm:$0xff] %v1098_v14  ;;  %v820_v17 = vadd.f32 %v8111_v1, %v819_v16  ;;  %v5729_v18 = vpop.f32.mrb[73].mxu0  ;;  %6882 = vmatprep.subr.bf16.mxu0 %v6881_v8  ;;  %v6949_v14 = vpack.c.bf16 %v4742_v11, %v4741_v10 }
 0x18c   : > { %1351 = vst [vmem:[#allocation3 + $0x3c] sm:$0x1f] %v1349_v15  ;;  %v1565_v15 = vld [vmem:[%s9372_s3 + $0x18] sm:$0xff]  ;;  %6884 = vmatpush3.bf16.msra.mxu0 %v6881_v8 }
 0x18d   : > { %v1099_v19 = vmax.f32 %v820_v17, 0.0  ;;  %6950 = vmatprep.subr.bf16.mxu1 %v6949_v14 }
 0x18e   : > { %v824_v20 = vpop.f32.mrb[74].mxu0  ;;  %v1584_v21 = vld [vmem:[#allocation3 + $0x31] sm:$0xff]  ;;  %v1353_v34 = vld [vmem:[#allocation2 + $0x104] ss:$2 sm:$0xff]  ;;  %v1357_v35 = vld [vmem:[#allocation2 + $0x105] ss:$2 sm:$0xff]  ;;  %6952 = vmatpush3.bf16.msra.mxu1 %v6949_v14 }
 0x18f   : > { %1184 = vst [vmem:[#allocation2 + $0x120] sm:$0xff] %v1099_v19  ;;  %v825_v22 = vadd.f32 %v8111_v1, %v824_v20  ;;  %v5732_v23 = vpop.f32.mrb[75].mxu0  ;;  %5915 = vmatprep.mubr.f32.mxu0 %v1584_v21  ;;  %v1929_v24 = vld [vmem:[#allocation3 + $0x32] sm:$0xff]  ;;  %v1360_v40 = vmax.f32 %v1353_v34, %v1357_v35  ;;  %v6885_v19 = vpack.c.bf16 %v1565_v15, %v1564_v12 }
 0x190   : > { %6033 = vmatprep.mubr.f32.mxu1 %v1929_v24  ;;  %v4743_v21 = vld [vmem:[%s9372_s3 + $0x1a0] sm:$0xff] }
 0x191   : > { %v1100_v25 = vmax.f32 %v825_v22, 0.0  ;;  %6886 = vmatprep.subr.bf16.mxu0 %v6885_v19  ;;  %v4744_v22 = vld [vmem:[%s9372_s3 + $0x1a8] sm:$0xff]  ;;  %v1566_v23 = vld [vmem:[%s9372_s3 + $0x20] sm:$0xff] }
 0x192   : > { %v829_v26 = vpop.f32.mrb[76].mxu0  ;;  %v1355_v44 = vld [vmem:[#allocation2 + $0x114] ss:$2 sm:$0x1f]  ;;  %v6953_v24 = vpack.c.bf16 %v4744_v22, %v4743_v21  ;;  %6888 = vmatpush3.bf16.msra.mxu0 %v6885_v19  ;;  %v4751_v12 = vld [vmem:[%s9372_s3 + $0x1e0] sm:$0xff] }
 0x193   : > { %1185 = vst [vmem:[#allocation2 + $0x128] sm:$0xff] %v1100_v25  ;;  %v1585_v27 = vld [vmem:[#allocation3 + $0x39] sm:$0xff]  ;;  %v830_v28 = vadd.f32 %v8111_v1, %v829_v26  ;;  %v5735_v30 = vpop.f32.mrb[77].mxu0  ;;  %v1359_v45 = vld [vmem:[#allocation2 + $0x115] ss:$2 sm:$0x1f] }
 0x194   : > { %5916 = vmatmul.mubr.f32.gmra.mrb[176].mxu0 %v1585_v27  ;;  %v1361_v51 = vmax.f32 %v1355_v44, %v1359_v45  ;;  %v1567_v26 = vld [vmem:[%s9372_s3 + $0x28] sm:$0xff]  ;;  %6954 = vmatprep.subr.bf16.mxu1 %v6953_v24  ;;  %v1574_v14 = vld [vmem:[%s9372_s3 + $0x60] sm:$0xff] }
 0x195   : > { %v1101_v6 = vmax.f32 %v830_v28, 0.0  ;;  %v6889_v30 = vpack.c.bf16 %v1567_v26, %v1566_v23  ;;  %6956 = vmatpush3.bf16.msra.mxu1 %v6953_v24  ;;  %v4748_v44 = vld [vmem:[%s9372_s3 + $0x1c8] sm:$0xff]  ;;  %v4753_v23 = vld [vmem:[%s9372_s3 + $0x1f0] sm:$0xff]  ;;  %v4754_v24 = vld [vmem:[%s9372_s3 + $0x1f8] sm:$0xff] }
 0x196   : > { %v834_v31 = vpop.f32.mrb[78].mxu0 }
 0x197   : > { %v835_v32 = vadd.f32 %v8111_v1, %v834_v31  ;;  %v5738_v33 = vpop.f32.mrb[79].mxu0  ;;  %1186 = vst [vmem:[#allocation2 + $0x130] sm:$0xff] %v1101_v6  ;;  %v4745_v6 = vld [vmem:[%s9372_s3 + $0x1b0] sm:$0xff]  ;;  %v4746_v31 = vld [vmem:[%s9372_s3 + $0x1b8] sm:$0xff]  ;;  %6890 = vmatprep.subr.bf16.mxu0 %v6889_v30 }
 0x198   : > { %v6957_v35 = vpack.c.bf16 %v4746_v31, %v4745_v6  ;;  %6892 = vmatpush3.bf16.msra.mxu0 %v6889_v30 }
 0x199   : > { %v1102_v36 = vmax.f32 %v835_v32, 0.0  ;;  %v1568_v32 = vld [vmem:[%s9372_s3 + $0x30] sm:$0xff] }
 0x19a   : > { %v1363_v37 = vld [vmem:[#allocation2 + $0x11e] ss:$2 sm:$0xff]  ;;  %v1367_v38 = vld [vmem:[#allocation2 + $0x11f] ss:$2 sm:$0xff]  ;;  %v839_v39 = vpop.f32.mrb[80].mxu0  ;;  %6958 = vmatprep.subr.bf16.mxu1 %v6957_v35 }
 0x19b   : > { %v1370_v41 = vmax.f32 %v1363_v37, %v1367_v38  ;;  %1187 = vst [vmem:[#allocation2 + $0x138] sm:$0xff] %v1102_v36  ;;  %v840_v42 = vadd.f32 %v8111_v1, %v839_v39  ;;  %v5741_v43 = vpop.f32.mrb[81].mxu0  ;;  %v1569_v36 = vld [vmem:[%s9372_s3 + $0x38] sm:$0xff]  ;;  %6960 = vmatpush3.bf16.msra.mxu1 %v6957_v35 }
 0x19c   : > { %v6893_v39 = vpack.c.bf16 %v1569_v36, %v1568_v32  ;;  %v4747_v43 = vld [vmem:[%s9372_s3 + $0x1c0] sm:$0xff]  ;;  %v1577_v32 = vld [vmem:[%s9372_s3 + $0x78] sm:$0xff] }
 0x19d   : > { %v1372_v29 = vmax.f32 %v1360_v40, %v1370_v41  ;;  %v1103_v46 = vmax.f32 %v840_v42, 0.0 }
 0x19e   : > { %v844_v47 = vpop.f32.mrb[82].mxu0  ;;  %v1365_v48 = vld [vmem:[#allocation2 + $0x12e] ss:$2 sm:$0x1f]  ;;  %6894 = vmatprep.subr.bf16.mxu0 %v6893_v39 }
 0x19f   : > { %1374 = vst [vmem:[#allocation3 + $0x41] sm:$0xff] %v1372_v29  ;;  %v1369_v49 = vld [vmem:[#allocation2 + $0x12f] ss:$2 sm:$0x1f]  ;;  %1188 = vst [vmem:[#allocation2 + $0x140] sm:$0xff] %v1103_v46  ;;  %v845_v50 = vadd.f32 %v8111_v1, %v844_v47  ;;  %5918 = vmatprep.mubr.f32.mxu0 %v1372_v29  ;;  %v5744_v53 = vpop.f32.mrb[83].mxu0  ;;  %v6961_v47 = vpack.c.bf16 %v4748_v44, %v4747_v43  ;;  %6896 = vmatpush3.bf16.msra.mxu0 %v6893_v39 }
 0x1a0   : > { %v1371_v52 = vmax.f32 %v1365_v48, %v1369_v49  ;;  %v1571_v48 = vld [vmem:[%s9372_s3 + $0x48] sm:$0xff] }
 0x1a1   : > { %v1104_v54 = vmax.f32 %v845_v50, 0.0  ;;  %6962 = vmatprep.subr.bf16.mxu1 %v6961_v47 }
 0x1a2   : > { %v849_v55 = vpop.f32.mrb[84].mxu0  ;;  %v1373_v56 = vmax.f32 %v1361_v51, %v1371_v52  ;;  %v8321_v51 = vld [vmem:[%s9371_s2] ss:$0 sm:$0xff]  ;;  %6964 = vmatpush3.bf16.msra.mxu1 %v6961_v47 }
 0x1a3   : > { %1189 = vst [vmem:[#allocation2 + $0x148] sm:$0xff] %v1104_v54  ;;  %v850_v57 = vadd.f32 %v8111_v1, %v849_v55  ;;  %v5747_v58 = vpop.f32.mrb[85].mxu0 }
 0x1a4   : > { %1375 = vst [vmem:[#allocation3 + $0x49] sm:$0x1f] %v1373_v56 }
 0x1a5   : > { %v1105_v59 = vmax.f32 %v850_v57, 0.0 }
 0x1a6   : > { %v854_v63 = vpop.f32.mrb[86].mxu0  ;;  %v1930_v0 = vld [vmem:[#allocation3 + $0x3a] sm:$0xff] }
 0x1a7   : > { %1190 = vst [vmem:[#allocation2 + $0x150] sm:$0xff] %v1105_v59  ;;  %v855_v4 = vadd.f32 %v8111_v1, %v854_v63  ;;  %v5750_v5 = vpop.f32.mrb[87].mxu0  ;;  %6034 = vmatmul.mubr.f32.gmra.mrb[6].mxu1 %v1930_v0  ;;  %v1377_v40 = vld [vmem:[#allocation2 + $0x138] ss:$2 sm:$0xff]  ;;  %v1381_v41 = vld [vmem:[#allocation2 + $0x139] ss:$2 sm:$0xff] }
 0x1a8   : > { %v1384_v49 = vmax.f32 %v1377_v40, %v1381_v41  ;;  %v4749_v59 = vld [vmem:[%s9372_s3 + $0x1d0] sm:$0xff]  ;;  %v1573_v0 = vld [vmem:[%s9372_s3 + $0x58] sm:$0xff]  ;;  %v4755_v40 = vld [vmem:[%s9372_s3 + $0x200] sm:$0xff] }
 0x1a9   : > { %v1106_v9 = vmax.f32 %v855_v4, 0.0  ;;  %v6965_v63 = vpack.c.bf16 %v4750_v60, %v4749_v59  ;;  %v6901_v7 = vpack.c.bf16 %v1573_v0, %v1572_v61  ;;  %v4756_v41 = vld [vmem:[%s9372_s3 + $0x208] sm:$0xff] }
 0x1aa   : > { %v859_v13 = vpop.f32.mrb[88].mxu0  ;;  %v8370_v44 = vpack.c.bf16 %v4756_v41, %v4755_v40 }
 0x1ab   : > { %1191 = vst [vmem:[#allocation2 + $0x158] sm:$0xff] %v1106_v9  ;;  %v860_v16 = vadd.f32 %v8111_v1, %v859_v13  ;;  %v5753_v17 = vpop.f32.mrb[89].mxu0  ;;  %v1931_v18 = vld [vmem:[#allocation3 + $0x42] sm:$0xff]  ;;  %6966 = vmatprep.subr.bf16.mxu1 %v6965_v63 }
 0x1ac   : > { %6036 = vmatprep.mubr.f32.mxu1 %v1931_v18  ;;  %6968 = vmatpush3.bf16.msra.mxu1 %v6965_v63  ;;  %v4752_v13 = vld [vmem:[%s9372_s3 + $0x1e8] sm:$0xff] }
 0x1ad   : > { %v1107_v20 = vmax.f32 %v860_v16, 0.0  ;;  %v6969_v17 = vpack.c.bf16 %v4752_v13, %v4751_v12  ;;  %v1575_v18 = vld [vmem:[%s9372_s3 + $0x68] sm:$0xff] }
 0x1ae   : > { %v864_v25 = vpop.f32.mrb[90].mxu0  ;;  %v1379_v55 = vld [vmem:[#allocation2 + $0x148] ss:$2 sm:$0x1f]  ;;  %v6905_v21 = vpack.c.bf16 %v1575_v18, %v1574_v14 }
 0x1af   : > { %1192 = vst [vmem:[#allocation2 + $0x160] sm:$0xff] %v1107_v20  ;;  %v865_v27 = vadd.f32 %v8111_v1, %v864_v25  ;;  %v5756_v28 = vpop.f32.mrb[91].mxu0  ;;  %v1383_v56 = vld [vmem:[#allocation2 + $0x149] ss:$2 sm:$0x1f]  ;;  %6970 = vmatprep.subr.bf16.mxu1 %v6969_v17 }
 0x1b0   : > { %v1385_v8 = vmax.f32 %v1379_v55, %v1383_v56  ;;  %6972 = vmatpush3.bf16.msra.mxu1 %v6969_v17  ;;  %v1576_v25 = vld [vmem:[%s9372_s3 + $0x70] sm:$0xff]  ;;  %v6973_v28 = vpack.c.bf16 %v4754_v24, %v4753_v23 }
 0x1b1   : > { %v1108_v33 = vmax.f32 %v865_v27, 0.0 }
 0x1b2   : > { %v869_v34 = vpop.f32.mrb[92].mxu0  ;;  %6974 = vmatprep.subr.bf16.mxu1 %v6973_v28 }
 0x1b3   : > { %v870_v37 = vadd.f32 %v8111_v1, %v869_v34  ;;  %v5759_v38 = vpop.f32.mrb[93].mxu0  ;;  %1193 = vst [vmem:[#allocation2 + $0x168] sm:$0xff] %v1108_v33  ;;  %v1570_v1 = vld [vmem:[%s9372_s3 + $0x40] sm:$0xff]  ;;  %v6909_v33 = vpack.c.bf16 %v1577_v32, %v1576_v25 }
 0x1b4   : > { %v6897_v54 = vpack.c.bf16 %v1571_v48, %v1570_v1  ;;  %6976 = vmatpush3.bf16.msra.mxu1 %v6973_v28 }
 0x1b5   : > { %v1109_v42 = vmax.f32 %v870_v37, 0.0  ;;  %6978 = vmatprep.subr.bf16.mxu1 %v8370_v44 }
 0x1b6   : > { %v1387_v45 = vld [vmem:[#allocation2 + $0x152] ss:$2 sm:$0xff]  ;;  %v1391_v29 = vld [vmem:[#allocation2 + $0x153] ss:$2 sm:$0xff]  ;;  %v874_v46 = vpop.f32.mrb[94].mxu0  ;;  %6898 = vmatprep.subr.bf16.mxu0 %v6897_v54 }
 0x1b7   : > { %v1394_v50 = vmax.f32 %v1387_v45, %v1391_v29  ;;  %1194 = vst [vmem:[#allocation2 + $0x170] sm:$0xff] %v1109_v42  ;;  %v875_v52 = vadd.f32 %v8321_v51, %v874_v46  ;;  %v5762_v53 = vpop.f32.mrb[95].mxu0  ;;  %6900 = vmatpush3.bf16.msra.mxu0 %v6897_v54 }
 0x1b8   : > { %6902 = vmatprep.subr.bf16.mxu0 %v6901_v7 }
 0x1b9   : > { %v1396_v57 = vmax.f32 %v1384_v49, %v1394_v50  ;;  %v1110_v58 = vmax.f32 %v875_v52, 0.0 }
 0x1ba   : > { %v879_v62 = vpop.f32.mrb[96].mxu0  ;;  %v1389_v2 = vld [vmem:[#allocation2 + $0x162] ss:$2 sm:$0x1f] }
 0x1bb   : > { %1398 = vst [vmem:[#allocation3 + $0x4e] sm:$0xff] %v1396_v57  ;;  %v1393_v4 = vld [vmem:[#allocation2 + $0x163] ss:$2 sm:$0x1f]  ;;  %1195 = vst [vmem:[#allocation2 + $0x178] sm:$0xff] %v1110_v58  ;;  %v880_v5 = vadd.f32 %v8321_v51, %v879_v62  ;;  %v5765_v10 = vpop.f32.mrb[97].mxu0  ;;  %6904 = vmatpush3.bf16.msra.mxu0 %v6901_v7 }
 0x1bc   : > { %v1395_v9 = vmax.f32 %v1389_v2, %v1393_v4  ;;  %6906 = vmatprep.subr.bf16.mxu0 %v6905_v21 }
 0x1bd   : > { %v1111_v11 = vmax.f32 %v880_v5, 0.0 }
 0x1be   : > { %v1397_v15 = vmax.f32 %v1385_v8, %v1395_v9  ;;  %v884_v16 = vpop.f32.mrb[98].mxu0 }
 0x1bf   : > { %1196 = vst [vmem:[#allocation2 + $0x180] sm:$0xff] %v1111_v11  ;;  %v885_v19 = vadd.f32 %v8321_v51, %v884_v16  ;;  %v5768_v20 = vpop.f32.mrb[99].mxu0  ;;  %6908 = vmatpush3.bf16.msra.mxu0 %v6905_v21 }
 0x1c0   : > { %1399 = vst [vmem:[#allocation3 + $0x56] sm:$0x1f] %v1397_v15  ;;  %6910 = vmatprep.subr.bf16.mxu0 %v6909_v33 }
 0x1c1   : > { %v1112_v22 = vmax.f32 %v885_v19, 0.0 }
 0x1c2   : > { %v889_v26 = vpop.f32.mrb[100].mxu0  ;;  %v1587_v27 = vld [vmem:[#allocation3 + $0x49] sm:$0xff] }
 0x1c3   : > { %1197 = vst [vmem:[#allocation2 + $0x188] sm:$0xff] %v1112_v22  ;;  %v890_v30 = vadd.f32 %v8321_v51, %v889_v26  ;;  %v5771_v6 = vpop.f32.mrb[101].mxu0  ;;  %5919 = vmatmul.mubr.f32.gmra.mrb[178].mxu0 %v1587_v27  ;;  %v1932_v31 = vld [vmem:[#allocation3 + $0x4a] sm:$0xff] }
 0x1c4   : > { %6037 = vmatmul.mubr.f32.gmra.mrb[8].mxu1 %v1932_v31  ;;  %6912 = vmatpush3.bf16.msra.mxu0 %v6909_v33  ;;  %v1401_v29 = vld [vmem:[#allocation2 + $0x16c] ss:$2 sm:$0xff]  ;;  %v1405_v46 = vld [vmem:[#allocation2 + $0x16d] ss:$2 sm:$0xff] }
 0x1c5   : > { %v1113_v34 = vmax.f32 %v890_v30, 0.0  ;;  %7425 = vmatprep.subr.bf16.mxu0 %v7680_v3  ;;  %v1408_v52 = vmax.f32 %v1401_v29, %v1405_v46 }
 0x1c6   : > { %v894_v35 = vpop.f32.mrb[102].mxu0  ;;  %v1403_v56 = vld [vmem:[#allocation2 + $0x17c] ss:$2 sm:$0x1f] }
 0x1c7   : > { %1198 = vst [vmem:[#allocation2 + $0x190] sm:$0xff] %v1113_v34  ;;  %v1588_v36 = vld [vmem:[#allocation3 + $0x51] sm:$0xff]  ;;  %v895_v38 = vadd.f32 %v8321_v51, %v894_v35  ;;  %v5774_v39 = vpop.f32.mrb[103].mxu0 }
 0x1c8   : > { %v1933_v37 = vld [vmem:[#allocation3 + $0x52] sm:$0xff]  ;;  %5921 = vmatprep.mubr.f32.mxu0 %v1588_v36 }
 0x1c9   : > { %6039 = vmatprep.mubr.f32.mxu1 %v1933_v37  ;;  %v1114_v42 = vmax.f32 %v895_v38, 0.0  ;;  %v1407_v57 = vld [vmem:[#allocation2 + $0x17d] ss:$2 sm:$0x1f] }
 0x1ca   : > { %v899_v43 = vpop.f32.mrb[104].mxu0  ;;  %v1409_v0 = vmax.f32 %v1403_v56, %v1407_v57 }
 0x1cb   : > { %v900_v1 = vadd.f32 %v8321_v51, %v899_v43  ;;  %v5777_v45 = vpop.f32.mrb[105].mxu0  ;;  %1199 = vst [vmem:[#allocation2 + $0x198] sm:$0xff] %v1114_v42 }
 0x1cd   : > { %v1115_v47 = vmax.f32 %v900_v1, 0.0 }
 0x1ce   : > { %v1411_v48 = vld [vmem:[#allocation2 + $0x186] ss:$2 sm:$0xff]  ;;  %v1415_v49 = vld [vmem:[#allocation2 + $0x187] ss:$2 sm:$0xff]  ;;  %v904_v50 = vpop.f32.mrb[106].mxu0 }
 0x1cf   : > { %v1418_v53 = vmax.f32 %v1411_v48, %v1415_v49  ;;  %1200 = vst [vmem:[#allocation2 + $0x1a0] sm:$0xff] %v1115_v47  ;;  %v905_v54 = vadd.f32 %v8321_v51, %v904_v50  ;;  %v5780_v55 = vpop.f32.mrb[107].mxu0 }
 0x1d1   : > { %v1420_v58 = vmax.f32 %v1408_v52, %v1418_v53  ;;  %v1116_v59 = vmax.f32 %v905_v54, 0.0 }
 0x1d2   : > { %v909_v60 = vpop.f32.mrb[108].mxu0  ;;  %v1413_v61 = vld [vmem:[#allocation2 + $0x196] ss:$2 sm:$0x1f] }
 0x1d3   : > { %1422 = vst [vmem:[#allocation3 + $0x5b] sm:$0xff] %v1420_v58  ;;  %v1417_v62 = vld [vmem:[#allocation2 + $0x197] ss:$2 sm:$0x1f]  ;;  %1201 = vst [vmem:[#allocation2 + $0x1a8] sm:$0xff] %v1116_v59  ;;  %v910_v63 = vadd.f32 %v8321_v51, %v909_v60  ;;  %v5783_v4 = vpop.f32.mrb[109].mxu0 }
 0x1d4   : > { %v1419_v2 = vmax.f32 %v1413_v61, %v1417_v62 }
 0x1d5   : > { %v1117_v5 = vmax.f32 %v910_v63, 0.0 }
 0x1d6   : > { %v914_v7 = vpop.f32.mrb[110].mxu0  ;;  %v1421_v8 = vmax.f32 %v1409_v0, %v1419_v2 }
 0x1d7   : > { %1202 = vst [vmem:[#allocation2 + $0x1b0] sm:$0xff] %v1117_v5  ;;  %v915_v9 = vadd.f32 %v8321_v51, %v914_v7  ;;  %v5786_v10 = vpop.f32.mrb[111].mxu0 }
 0x1d8   : > { %1423 = vst [vmem:[#allocation3 + $0x63] sm:$0x1f] %v1421_v8 }
 0x1d9   : > { %v1118_v11 = vmax.f32 %v915_v9, 0.0 }
 0x1da   : > { %v919_v12 = vpop.f32.mrb[112].mxu0  ;;  %v1589_v13 = vld [vmem:[#allocation3 + $0x59] sm:$0xff] }
 0x1db   : > { %1203 = vst [vmem:[#allocation2 + $0x1b8] sm:$0xff] %v1118_v11  ;;  %v920_v14 = vadd.f32 %v8321_v51, %v919_v12  ;;  %v5789_v15 = vpop.f32.mrb[113].mxu0  ;;  %5922 = vmatmul.mubr.f32.gmra.mrb[180].mxu0 %v1589_v13  ;;  %v1934_v16 = vld [vmem:[#allocation3 + $0x5a] sm:$0xff] }
 0x1dc   : > { %6040 = vmatmul.mubr.f32.gmra.mrb[10].mxu1 %v1934_v16  ;;  %v1425_v30 = vld [vmem:[#allocation2 + $0x1a0] ss:$2 sm:$0xff]  ;;  %v1429_v6 = vld [vmem:[#allocation2 + $0x1a1] ss:$2 sm:$0xff] }
 0x1dd   : > { %v1119_v17 = vmax.f32 %v920_v14, 0.0  ;;  %v1432_v35 = vmax.f32 %v1425_v30, %v1429_v6 }
 0x1de   : > { %v924_v18 = vpop.f32.mrb[114].mxu0 }
 0x1df   : > { %1204 = vst [vmem:[#allocation2 + $0x1c0] sm:$0xff] %v1119_v17  ;;  %v925_v19 = vadd.f32 %v8321_v51, %v924_v18  ;;  %v5792_v20 = vpop.f32.mrb[115].mxu0 }
 0x1e1   : > { %v1120_v21 = vmax.f32 %v925_v19, 0.0 }
 0x1e2   : > { %v929_v22 = vpop.f32.mrb[116].mxu0  ;;  %v1427_v39 = vld [vmem:[#allocation2 + $0x1b0] ss:$2 sm:$0x1f] }
 0x1e3   : > { %1205 = vst [vmem:[#allocation2 + $0x1c8] sm:$0xff] %v1120_v21  ;;  %v930_v23 = vadd.f32 %v8321_v51, %v929_v22  ;;  %v5795_v24 = vpop.f32.mrb[117].mxu0  ;;  %v1431_v40 = vld [vmem:[#allocation2 + $0x1b1] ss:$2 sm:$0x1f] }
 0x1e4   : > { %v1433_v46 = vmax.f32 %v1427_v39, %v1431_v40 }
 0x1e5   : > { %v1121_v25 = vmax.f32 %v930_v23, 0.0 }
 0x1e6   : > { %v934_v26 = vpop.f32.mrb[118].mxu0 }
 0x1e7   : > { %v935_v27 = vadd.f32 %v8321_v51, %v934_v26  ;;  %v5798_v28 = vpop.f32.mrb[119].mxu0  ;;  %1206 = vst [vmem:[#allocation2 + $0x1d0] sm:$0xff] %v1121_v25 }
 0x1e9   : > { %v1122_v31 = vmax.f32 %v935_v27, 0.0 }
 0x1ea   : > { %v1435_v32 = vld [vmem:[#allocation2 + $0x1ba] ss:$2 sm:$0xff]  ;;  %v1439_v33 = vld [vmem:[#allocation2 + $0x1bb] ss:$2 sm:$0xff]  ;;  %v939_v34 = vpop.f32.mrb[120].mxu0 }
 0x1eb   : > { %v1442_v36 = vmax.f32 %v1435_v32, %v1439_v33  ;;  %1207 = vst [vmem:[#allocation2 + $0x1d8] sm:$0xff] %v1122_v31  ;;  %v940_v37 = vadd.f32 %v8321_v51, %v939_v34  ;;  %v5801_v38 = vpop.f32.mrb[121].mxu0 }
 0x1ed   : > { %v1123_v41 = vmax.f32 %v940_v37, 0.0  ;;  %v8383_v42 = vmax.f32 %v1432_v35, %v1442_v36 }
 0x1ee   : > { %v944_v43 = vpop.f32.mrb[122].mxu0  ;;  %v1437_v1 = vld [vmem:[#allocation2 + $0x1ca] ss:$2 sm:$0x1f] }
 0x1ef   : > { %v1441_v45 = vld [vmem:[#allocation2 + $0x1cb] ss:$2 sm:$0x1f]  ;;  %1208 = vst [vmem:[#allocation2 + $0x1e0] sm:$0xff] %v1123_v41  ;;  %v945_v29 = vadd.f32 %v8321_v51, %v944_v43  ;;  %1446 = vst [vmem:[#allocation3 + $0x68] sm:$0xff] %v8383_v42  ;;  %v5804_v48 = vpop.f32.mrb[123].mxu0 }
 0x1f0   : > { %v1443_v47 = vmax.f32 %v1437_v1, %v1441_v45 }
 0x1f1   : > { %v1124_v49 = vmax.f32 %v945_v29, 0.0 }
 0x1f2   : > { %v949_v50 = vpop.f32.mrb[124].mxu0  ;;  %v1445_v52 = vmax.f32 %v1433_v46, %v1443_v47 }
 0x1f3   : > { %1209 = vst [vmem:[#allocation2 + $0x1e8] sm:$0xff] %v1124_v49  ;;  %v950_v53 = vadd.f32 %v8321_v51, %v949_v50  ;;  %v5807_v54 = vpop.f32.mrb[125].mxu0 }
 0x1f4   : > { %1447 = vst [vmem:[#allocation3 + $0x70] sm:$0x1f] %v1445_v52 }
 0x1f5   : > { %v1125_v55 = vmax.f32 %v950_v53, 0.0 }
 0x1f6   : > { %v954_v56 = vpop.f32.mrb[126].mxu0  ;;  %v1590_v57 = vld [vmem:[#allocation3 + $0x61] sm:$0xff]  ;;  %v1449_v10 = vld [vmem:[#allocation2 + $0x1d4] ss:$2 sm:$0xff]  ;;  %v1453_v11 = vld [vmem:[#allocation2 + $0x1d5] ss:$2 sm:$0xff] }
 0x1f7   : > { %1210 = vst [vmem:[#allocation2 + $0x1f0] sm:$0xff] %v1125_v55  ;;  %v955_v58 = vadd.f32 %v8321_v51, %v954_v56  ;;  %v5810_v59 = vpop.f32.mrb[127].mxu0  ;;  %5924 = vmatprep.mubr.f32.mxu0 %v1590_v57  ;;  %v1935_v60 = vld [vmem:[#allocation3 + $0x62] sm:$0xff]  ;;  %v1456_v16 = vmax.f32 %v1449_v10, %v1453_v11 }
 0x1f8   : > { %6042 = vmatprep.mubr.f32.mxu1 %v1935_v60 }
 0x1f9   : > { %v1126_v61 = vmax.f32 %v955_v58, 0.0 }
 0x1fa   : > { %v959_v62 = vpop.f32.mrb[128].mxu0  ;;  %v1451_v20 = vld [vmem:[#allocation2 + $0x1e4] ss:$2 sm:$0x1f] }
 0x1fb   : > { %1211 = vst [vmem:[#allocation2 + $0x1f8] sm:$0xff] %v1126_v61  ;;  %v1591_v63 = vld [vmem:[#allocation3 + $0x69] sm:$0xff]  ;;  %v960_v2 = vadd.f32 %v8321_v51, %v959_v62  ;;  %v5813_v4 = vpop.f32.mrb[129].mxu0  ;;  %v1455_v21 = vld [vmem:[#allocation2 + $0x1e5] ss:$2 sm:$0x1f] }
 0x1fc   : > { %v1936_v0 = vld [vmem:[#allocation3 + $0x6a] sm:$0xff]  ;;  %5925 = vmatmul.mubr.f32.gmra.mrb[182].mxu0 %v1591_v63  ;;  %v1457_v28 = vmax.f32 %v1451_v20, %v1455_v21 }
 0x1fd   : > { %6043 = vmatmul.mubr.f32.gmra.mrb[12].mxu1 %v1936_v0  ;;  %v1127_v5 = vmax.f32 %v960_v2, 0.0 }
 0x1fe   : > { %v964_v7 = vpop.f32.mrb[130].mxu0 }
 0x1ff   : > { %v965_v8 = vadd.f32 %v8321_v51, %v964_v7  ;;  %v5816_v9 = vpop.f32.mrb[131].mxu0  ;;  %1212 = vst [vmem:[#allocation2 + $0x200] sm:$0xff] %v1127_v5 }
 0x201   : > { %v1128_v12 = vmax.f32 %v965_v8, 0.0 }
 0x202   : > { %v1459_v13 = vld [vmem:[#allocation2 + $0x1ee] ss:$2 sm:$0xff]  ;;  %v1463_v14 = vld [vmem:[#allocation2 + $0x1ef] ss:$2 sm:$0xff]  ;;  %v969_v15 = vpop.f32.mrb[132].mxu0 }
 0x203   : > { %v1466_v17 = vmax.f32 %v1459_v13, %v1463_v14  ;;  %1213 = vst [vmem:[#allocation2 + $0x208] sm:$0xff] %v1128_v12  ;;  %v970_v18 = vadd.f32 %v8321_v51, %v969_v15  ;;  %v5819_v19 = vpop.f32.mrb[133].mxu0 }
 0x205   : > { %v8392_v22 = vmax.f32 %v1456_v16, %v1466_v17  ;;  %v1129_v23 = vmax.f32 %v970_v18, 0.0 }
 0x206   : > { %v974_v24 = vpop.f32.mrb[134].mxu0  ;;  %v1461_v25 = vld [vmem:[#allocation2 + $0x1fe] ss:$2 sm:$0x1f] }
 0x207   : > { %1470 = vst [vmem:[#allocation3 + $0x75] sm:$0xff] %v8392_v22  ;;  %v1465_v26 = vld [vmem:[#allocation2 + $0x1ff] ss:$2 sm:$0x1f]  ;;  %1214 = vst [vmem:[#allocation2 + $0x210] sm:$0xff] %v1129_v23  ;;  %v975_v27 = vadd.f32 %v8321_v51, %v974_v24  ;;  %v5822_v6 = vpop.f32.mrb[135].mxu0 }
 0x208   : > { %v1467_v30 = vmax.f32 %v1461_v25, %v1465_v26 }
 0x209   : > { %v1130_v31 = vmax.f32 %v975_v27, 0.0 }
 0x20a   : > { %v1469_v32 = vmax.f32 %v1457_v28, %v1467_v30  ;;  %v979_v33 = vpop.f32.mrb[136].mxu0 }
 0x20b   : > { %1215 = vst [vmem:[#allocation2 + $0x218] sm:$0xff] %v1130_v31  ;;  %v980_v34 = vadd.f32 %v8321_v51, %v979_v33  ;;  %v5825_v35 = vpop.f32.mrb[137].mxu0 }
 0x20c   : > { %1471 = vst [vmem:[#allocation3 + $0x7d] sm:$0x1f] %v1469_v32 }
 0x20d   : > { %v1131_v36 = vmax.f32 %v980_v34, 0.0 }
 0x20e   : > { %v984_v37 = vpop.f32.mrb[138].mxu0  ;;  %v1592_v38 = vld [vmem:[#allocation3 + $0x71] sm:$0xff]  ;;  %v1473_v57 = vld [vmem:[#allocation2 + $0x208] ss:$2 sm:$0xff]  ;;  %v1477_v58 = vld [vmem:[#allocation2 + $0x209] ss:$2 sm:$0xff] }
 0x20f   : > { %1216 = vst [vmem:[#allocation2 + $0x220] sm:$0xff] %v1131_v36  ;;  %v985_v39 = vadd.f32 %v8321_v51, %v984_v37  ;;  %v5828_v40 = vpop.f32.mrb[139].mxu0  ;;  %5927 = vmatprep.mubr.f32.mxu0 %v1592_v38  ;;  %v1937_v41 = vld [vmem:[#allocation3 + $0x72] sm:$0xff]  ;;  %v1480_v63 = vmax.f32 %v1473_v57, %v1477_v58 }
 0x210   : > { %6045 = vmatprep.mubr.f32.mxu1 %v1937_v41 }
 0x211   : > { %v1132_v43 = vmax.f32 %v985_v39, 0.0 }
 0x212   : > { %v989_v1 = vpop.f32.mrb[140].mxu0 }
 0x213   : > { %1217 = vst [vmem:[#allocation2 + $0x228] sm:$0xff] %v1132_v43  ;;  %v990_v45 = vadd.f32 %v8321_v51, %v989_v1  ;;  %v5831_v29 = vpop.f32.mrb[141].mxu0  ;;  %v1593_v46 = vld [vmem:[#allocation3 + $0x79] sm:$0xff] }
 0x214   : > { %v8399_v47 = vld [vmem:[#allocation3 + $0x7a] sm:$0xff]  ;;  %5928 = vmatmul.mubr.f32.gmra.mrb[184].mxu0 %v1593_v46 }
 0x215   : > { %6046 = vmatmul.mubr.f32.gmra.mrb[14].mxu1 %v8399_v47  ;;  %v1133_v48 = vmax.f32 %v990_v45, 0.0 }
 0x216   : > { %v994_v49 = vpop.f32.mrb[142].mxu0  ;;  %v1475_v5 = vld [vmem:[#allocation2 + $0x218] ss:$2 sm:$0x1f] }
 0x217   : > { %1218 = vst [vmem:[#allocation2 + $0x230] sm:$0xff] %v1133_v48  ;;  %v995_v50 = vadd.f32 %v8321_v51, %v994_v49  ;;  %v5834_v52 = vpop.f32.mrb[143].mxu0  ;;  %v1479_v7 = vld [vmem:[#allocation2 + $0x219] ss:$2 sm:$0x1f] }
 0x218   : > { %v1481_v14 = vmax.f32 %v1475_v5, %v1479_v7  ;;  %v1544_v5 = vld [vmem:[#allocation3] sm:$0xff] }
 0x219   : > { %v1134_v53 = vmax.f32 %v995_v50, 0.0 }
 0x21a   : > { %v999_v54 = vpop.f32.mrb[144].mxu0 }
 0x21b   : > { %v1000_v55 = vadd.f32 %v8321_v51, %v999_v54  ;;  %v5837_v56 = vpop.f32.mrb[145].mxu0  ;;  %1219 = vst [vmem:[#allocation2 + $0x238] sm:$0xff] %v1134_v53 }
 0x21d   : > { %v1135_v59 = vmax.f32 %v1000_v55, 0.0 }
 0x21e   : > { %v1483_v60 = vld [vmem:[#allocation2 + $0x222] ss:$2 sm:$0xff]  ;;  %v1487_v61 = vld [vmem:[#allocation2 + $0x223] ss:$2 sm:$0xff]  ;;  %v1004_v62 = vpop.f32.mrb[146].mxu0 }
 0x21f   : > { %v1490_v0 = vmax.f32 %v1483_v60, %v1487_v61  ;;  %1220 = vst [vmem:[#allocation2 + $0x240] sm:$0xff] %v1135_v59  ;;  %v1005_v2 = vadd.f32 %v8321_v51, %v1004_v62  ;;  %v5840_v4 = vpop.f32.mrb[147].mxu0 }
 0x221   : > { %v1492_v8 = vmax.f32 %v1480_v63, %v1490_v0  ;;  %v1136_v9 = vmax.f32 %v1005_v2, 0.0 }
 0x222   : > { %v1009_v10 = vpop.f32.mrb[148].mxu0  ;;  %v1485_v11 = vld [vmem:[#allocation2 + $0x232] ss:$2 sm:$0x1f] }
 0x223   : > { %1494 = vst [vmem:[#allocation3 + $0x82] sm:$0xff] %v1492_v8  ;;  %v1489_v12 = vld [vmem:[#allocation2 + $0x233] ss:$2 sm:$0x1f]  ;;  %1221 = vst [vmem:[#allocation2 + $0x248] sm:$0xff] %v1136_v9  ;;  %v1010_v13 = vadd.f32 %v8321_v51, %v1009_v10  ;;  %6048 = vmatprep.mubr.f32.mxu1 %v1492_v8  ;;  %v5843_v16 = vpop.f32.mrb[149].mxu0 }
 0x224   : > { %v1491_v15 = vmax.f32 %v1485_v11, %v1489_v12  ;;  %v4757_v10 = vld [vmem:[%s9372_s3 + $0x210] sm:$0xff]  ;;  %v4758_v11 = vld [vmem:[%s9372_s3 + $0x218] sm:$0xff] }
 0x225   : > { %v1137_v17 = vmax.f32 %v1010_v13, 0.0  ;;  %v2131_v12 = vld [vmem:[#allocation3 + $0xd] sm:$0xff] }
 0x226   : > { %v1014_v18 = vpop.f32.mrb[150].mxu0  ;;  %v1493_v19 = vmax.f32 %v1481_v14, %v1491_v15  ;;  %v1545_v15 = vld [vmem:[#allocation3 + $0x8] sm:$0xff]  ;;  %v1546_v16 = vld [vmem:[#allocation3 + $0x10] sm:$0xff] }
 0x227   : > { %1222 = vst [vmem:[#allocation2 + $0x250] sm:$0xff] %v1137_v17  ;;  %v1015_v20 = vadd.f32 %v8321_v51, %v1014_v18  ;;  %v5846_v21 = vpop.f32.mrb[151].mxu0  ;;  %v6981_v17 = vpack.c.bf16 %v4758_v11, %v4757_v10  ;;  %v2141_v11 = vld [vmem:[#allocation3 + $0x5d] sm:$0xff] }
 0x228   : > { %1495 = vst [vmem:[#allocation3 + $0x8a] sm:$0x1f] %v1493_v19  ;;  %v2132_v19 = vld [vmem:[#allocation3 + $0x15] sm:$0xff] }
 0x229   : > { %v1138_v23 = vmax.f32 %v1015_v20, 0.0  ;;  %v4759_v21 = vld [vmem:[%s9372_s3 + $0x220] sm:$0xff] }
 0x22a   : > { %v1019_v24 = vpop.f32.mrb[152].mxu0  ;;  %v1594_v25 = vld [vmem:[#allocation3 + $0x81] sm:$0xff] }
 0x22b   : > { %1223 = vst [vmem:[#allocation2 + $0x258] sm:$0xff] %v1138_v23  ;;  %v1020_v26 = vadd.f32 %v8321_v51, %v1019_v24  ;;  %v5849_v27 = vpop.f32.mrb[153].mxu0  ;;  %5930 = vmatprep.mubr.f32.mxu0 %v1594_v25  ;;  %v1497_v36 = vld [vmem:[#allocation2 + $0x23c] ss:$2 sm:$0xff]  ;;  %v1501_v37 = vld [vmem:[#allocation2 + $0x23d] ss:$2 sm:$0xff] }
 0x22c   : > { %v1504_v43 = vmax.f32 %v1497_v36, %v1501_v37  ;;  %v4760_v23 = vld [vmem:[%s9372_s3 + $0x228] sm:$0xff]  ;;  %v1549_v36 = vld [vmem:[#allocation3 + $0x28] sm:$0xff]  ;;  %v1550_v37 = vld [vmem:[#allocation3 + $0x30] sm:$0xff] }
 0x22d   : > { %v1139_v28 = vmax.f32 %v1020_v26, 0.0  ;;  %v2133_v24 = vld [vmem:[#allocation3 + $0x1d] sm:$0xff]  ;;  %v2134_v27 = vld [vmem:[#allocation3 + $0x25] sm:$0xff] }
 0x22e   : > { %v1024_v30 = vpop.f32.mrb[154].mxu0  ;;  %v1499_v46 = vld [vmem:[#allocation2 + $0x24c] ss:$2 sm:$0x1f]  ;;  %v1547_v26 = vld [vmem:[#allocation3 + $0x18] sm:$0xff] }
 0x22f   : > { %1224 = vst [vmem:[#allocation2 + $0x260] sm:$0xff] %v1139_v28  ;;  %v1025_v6 = vadd.f32 %v8321_v51, %v1024_v30  ;;  %v5852_v31 = vpop.f32.mrb[155].mxu0  ;;  %v1503_v48 = vld [vmem:[#allocation2 + $0x24d] ss:$2 sm:$0x1f]  ;;  %v6985_v28 = vpack.c.bf16 %v4760_v23, %v4759_v21  ;;  %v1558_v21 = vld [vmem:[#allocation3 + $0x70] sm:$0xff] }
 0x230   : > { %v1505_v56 = vmax.f32 %v1499_v46, %v1503_v48  ;;  %v4761_v31 = vld [vmem:[%s9372_s3 + $0x230] sm:$0xff]  ;;  %v1552_v48 = vld [vmem:[#allocation3 + $0x40] sm:$0xff]  ;;  %v4771_v23 = vld [vmem:[%s9372_s3 + $0x280] sm:$0xff] }
 0x231   : > { %v1140_v32 = vmax.f32 %v1025_v6, 0.0  ;;  %v1548_v6 = vld [vmem:[#allocation3 + $0x20] sm:$0xff] }
 0x232   : > { %v1029_v33 = vpop.f32.mrb[156].mxu0 }
 0x233   : > { %v1030_v34 = vadd.f32 %v8321_v51, %v1029_v33  ;;  %v5855_v35 = vpop.f32.mrb[157].mxu0  ;;  %1225 = vst [vmem:[#allocation2 + $0x268] sm:$0xff] %v1140_v32  ;;  %v4762_v32 = vld [vmem:[%s9372_s3 + $0x238] sm:$0xff] }
 0x235   : > { %v1141_v38 = vmax.f32 %v1030_v34, 0.0 }
 0x236   : > { %v1507_v39 = vld [vmem:[#allocation2 + $0x256] ss:$2 sm:$0xff]  ;;  %v1511_v40 = vld [vmem:[#allocation2 + $0x257] ss:$2 sm:$0xff]  ;;  %v1034_v41 = vpop.f32.mrb[158].mxu0 }
 0x237   : > { %v1514_v1 = vmax.f32 %v1507_v39, %v1511_v40  ;;  %1226 = vst [vmem:[#allocation2 + $0x270] sm:$0xff] %v1141_v38  ;;  %v1035_v45 = vadd.f32 %v8321_v51, %v1034_v41  ;;  %v5858_v29 = vpop.f32.mrb[159].mxu0  ;;  %v6989_v38 = vpack.c.bf16 %v4762_v32, %v4761_v31  ;;  %v2136_v39 = vld [vmem:[#allocation3 + $0x35] sm:$0xff] }
 0x238   : > { %v4763_v40 = vld [vmem:[%s9372_s3 + $0x240] sm:$0xff]  ;;  %v4774_v32 = vld [vmem:[%s9372_s3 + $0x298] sm:$0xff] }
 0x239   : > { %v8411_v49 = vmax.f32 %v1504_v43, %v1514_v1  ;;  %v1142_v50 = vmax.f32 %v1035_v45, 0.0  ;;  %v2137_v1 = vld [vmem:[#allocation3 + $0x3d] sm:$0xff] }
 0x23a   : > { %v1039_v52 = vpop.f32.mrb[160].mxu0  ;;  %v1509_v53 = vld [vmem:[#allocation2 + $0x266] ss:$2 sm:$0x1f] }
 0x23b   : > { %1518 = vst [vmem:[#allocation3 + $0x8f] sm:$0xff] %v8411_v49  ;;  %v1513_v54 = vld [vmem:[#allocation2 + $0x267] ss:$2 sm:$0x1f]  ;;  %1227 = vst [vmem:[#allocation2 + $0x278] sm:$0xff] %v1142_v50  ;;  %v1040_v55 = vadd.f32 %v8321_v51, %v1039_v52  ;;  %v5861_v58 = vpop.f32.mrb[161].mxu0 }
 0x23c   : > { %v1515_v57 = vmax.f32 %v1509_v53, %v1513_v54  ;;  %v1551_v45 = vld [vmem:[#allocation3 + $0x38] sm:$0xff]  ;;  %v2138_v54 = vld [vmem:[#allocation3 + $0x45] sm:$0xff] }
 0x23d   : > { %v1143_v59 = vmax.f32 %v1040_v55, 0.0  ;;  %v4765_v55 = vld [vmem:[%s9372_s3 + $0x250] sm:$0xff] }
 0x23e   : > { %v1517_v60 = vmax.f32 %v1505_v56, %v1515_v57  ;;  %v1044_v61 = vpop.f32.mrb[162].mxu0  ;;  %v4766_v56 = vld [vmem:[%s9372_s3 + $0x258] sm:$0xff]  ;;  %v1553_v58 = vld [vmem:[#allocation3 + $0x48] sm:$0xff] }
 0x23f   : > { %1228 = vst [vmem:[#allocation2 + $0x280] sm:$0xff] %v1143_v59  ;;  %v1045_v62 = vadd.f32 %v8321_v51, %v1044_v61  ;;  %v5864_v63 = vpop.f32.mrb[163].mxu0  ;;  %v2139_v57 = vld [vmem:[#allocation3 + $0x4d] sm:$0xff] }
 0x240   : > { %1519 = vst [vmem:[#allocation3 + $0x97] sm:$0x1f] %v1517_v60  ;;  %v2140_v63 = vld [vmem:[#allocation3 + $0x55] sm:$0xff] }
 0x241   : > { %v1144_v0 = vmax.f32 %v1045_v62, 0.0  ;;  %v1554_v62 = vld [vmem:[#allocation3 + $0x50] sm:$0xff] }
 0x242   : > { %v1595_v2 = vld [vmem:[#allocation3 + $0x89] sm:$0xff]  ;;  %v1049_v4 = vpop.f32.mrb[164].mxu0 }
 0x243   : > { %1229 = vst [vmem:[#allocation2 + $0x288] sm:$0xff] %v1144_v0  ;;  %5931 = vmatmul.mubr.f32.gmra.mrb[186].mxu0 %v1595_v2  ;;  %v8416_v7 = vld [vmem:[#allocation3 + $0x8a] sm:$0xff]  ;;  %v1050_v8 = vadd.f32 %v8321_v51, %v1049_v4  ;;  %v5867_v9 = vpop.f32.mrb[165].mxu0  ;;  %v6997_v0 = vpack.c.bf16 %v4766_v56, %v4765_v55  ;;  %v4767_v2 = vld [vmem:[%s9372_s3 + $0x260] sm:$0xff]  ;;  %v4768_v4 = vld [vmem:[%s9372_s3 + $0x268] sm:$0xff] }
 0x244   : > { %6049 = vmatmul.mubr.f32.gmra.mrb[16].mxu1 %v8416_v7  ;;  %5965 = vmatprep.mubr.f32.mxu0 %v1544_v5  ;;  %v1521_v41 = vld [vmem:[#allocation2 + $0x270] ss:$2 sm:$0xff]  ;;  %v1525_v43 = vld [vmem:[#allocation2 + $0x271] ss:$2 sm:$0xff] }
 0x245   : > { %v1145_v13 = vmax.f32 %v1050_v8, 0.0  ;;  %6083 = vmatprep.mubr.f32.mxu1 %v2131_v12  ;;  %v1528_v52 = vmax.f32 %v1521_v41, %v1525_v43  ;;  %v4778_v41 = vld [vmem:[%s9372_s3 + $0x2b8] sm:$0xff] }
 0x246   : > { %v1054_v14 = vpop.f32.mrb[166].mxu0  ;;  %v2343_v43 = vld [vmem:[#allocation3 + $0x2e] sm:$0xff] }
 0x247   : > { %1230 = vst [vmem:[#allocation2 + $0x290] sm:$0xff] %v1145_v13  ;;  %v1055_v18 = vadd.f32 %v8321_v51, %v1054_v14  ;;  %5966 = vmatmul.mubr.f32.vlgmr.msra.gmra.mrb[170].mxu0 %v1545_v15  ;;  %v5870_v20 = vpop.f32.mrb[167].mxu0  ;;  %v1555_v13 = vld [vmem:[#allocation3 + $0x58] sm:$0xff]  ;;  %v1556_v14 = vld [vmem:[#allocation3 + $0x60] sm:$0xff]  ;;  %v7001_v15 = vpack.c.bf16 %v4768_v4, %v4767_v2  ;;  %v2347_v55 = vld [vmem:[#allocation3 + $0x4e] sm:$0xff] }
 0x248   : > { %6084 = vmatmul.mubr.f32.vlgmr.msra.gmra.mrb[0].mxu1 %v2132_v19  ;;  %5968 = vmatprep.mubr.f32.mxu0 %v1546_v16  ;;  %v2142_v16 = vld [vmem:[#allocation3 + $0x65] sm:$0xff]  ;;  %v2143_v19 = vld [vmem:[#allocation3 + $0x6d] sm:$0xff] }
 0x249   : > { %v1146_v25 = vmax.f32 %v1055_v18, 0.0  ;;  %6980 = vmatpush3.bf16.msra.mxu1 %v8370_v44  ;;  %6086 = vmatprep.mubr.f32.mxu1 %v2133_v24  ;;  %v2135_v44 = vld [vmem:[#allocation3 + $0x2d] sm:$0xff]  ;;  %v4772_v24 = vld [vmem:[%s9372_s3 + $0x288] sm:$0xff] }
 0x24a   : > { %6982 = vmatprep.subr.bf16.mxu1 %v6981_v17  ;;  %v1059_v30 = vpop.f32.mrb[168].mxu0  ;;  %v1523_v59 = vld [vmem:[#allocation2 + $0x280] ss:$2 sm:$0x1f]  ;;  %v4770_v18 = vld [vmem:[%s9372_s3 + $0x278] sm:$0xff] }
 0x24b   : > { %1231 = vst [vmem:[#allocation2 + $0x298] sm:$0xff] %v1146_v25  ;;  %5969 = vmatmul.mubr.f32.gmra.mrb[172].mxu0 %v1547_v26  ;;  %v1060_v33 = vadd.f32 %v8321_v51, %v1059_v30  ;;  %v5873_v34 = vpop.f32.mrb[169].mxu0  ;;  %v4764_v51 = vld [vmem:[%s9372_s3 + $0x248] sm:$0xff]  ;;  %v1559_v26 = vld [vmem:[#allocation3 + $0x78] sm:$0xff]  ;;  %v2147_v30 = vld [vmem:[#allocation3 + $0x8d] sm:$0xff] }
 0x24c   : > { %6087 = vmatmul.mubr.f32.gmra.mrb[2].mxu1 %v2134_v27  ;;  %5971 = vmatprep.mubr.f32.mxu0 %v1548_v6  ;;  %v6993_v50 = vpack.c.bf16 %v4764_v51, %v4763_v40  ;;  %v1527_v60 = vld [vmem:[#allocation2 + $0x281] ss:$2 sm:$0x1f]  ;;  %v7009_v27 = vpack.c.bf16 %v4772_v24, %v4771_v23  ;;  %v1561_v6 = vld [vmem:[#allocation3 + $0x88] sm:$0xff]  ;;  %v4786_v2 = vld [vmem:[%s9372_s3 + $0x2f8] sm:$0xff] }
 0x24d   : > { %6089 = vmatprep.mubr.f32.mxu1 %v2135_v44  ;;  %6984 = vmatpush3.bf16.msra.mxu1 %v6981_v17  ;;  %v1147_v35 = vmax.f32 %v1060_v33, 0.0  ;;  %v1529_v9 = vmax.f32 %v1523_v59, %v1527_v60  ;;  %v4769_v17 = vld [vmem:[%s9372_s3 + $0x270] sm:$0xff]  ;;  %v2145_v25 = vld [vmem:[#allocation3 + $0x7d] sm:$0xff] }
 0x24e   : > { %6986 = vmatprep.subr.bf16.mxu1 %v6985_v28  ;;  %v7005_v20 = vpack.c.bf16 %v4770_v18, %v4769_v17  ;;  %v2339_v33 = vld [vmem:[#allocation3 + $0xe] sm:$0xff]  ;;  %v8482_v44 = vld [vmem:[#allocation5] sm:$0xff] }
 0x24f   : > { %5972 = vmatmul.mubr.f32.gmra.mrb[174].mxu0 %v1549_v36  ;;  %1232 = vst [vmem:[#allocation2 + $0x2a0] sm:$0xff] %v1147_v35  ;;  %v2340_v35 = vld [vmem:[#allocation3 + $0x16] sm:$0xff]  ;;  %v2342_v40 = vld [vmem:[#allocation3 + $0x26] sm:$0xff]  ;;  %v2349_v60 = vld [vmem:[#allocation3 + $0x5e] sm:$0xff] }
 0x250   : > { %6090 = vmatmul.mubr.f32.gmra.mrb[4].mxu1 %v2136_v39  ;;  %5974 = vmatprep.mubr.f32.mxu0 %v1550_v37  ;;  %v4775_v36 = vld [vmem:[%s9372_s3 + $0x2a0] sm:$0xff]  ;;  %v4776_v37 = vld [vmem:[%s9372_s3 + $0x2a8] sm:$0xff]  ;;  %v4777_v51 = vld [vmem:[%s9372_s3 + $0x2b0] sm:$0xff] }
 0x251   : > { %6092 = vmatprep.mubr.f32.mxu1 %v2137_v1  ;;  %6988 = vmatpush3.bf16.msra.mxu1 %v6985_v28  ;;  %v1560_v28 = vld [vmem:[#allocation3 + $0x80] sm:$0xff]  ;;  %v7017_v39 = vpack.c.bf16 %v4776_v37, %v4775_v36  ;;  %v7021_v1 = vpack.c.bf16 %v4778_v41, %v4777_v51  ;;  %v2351_v4 = vld [vmem:[#allocation3 + $0x6e] sm:$0xff] }
 0x252   : > { %v1531_v29 = vld [vmem:[#allocation2 + $0x28a] ss:$2 sm:$0xff]  ;;  %v1535_v46 = vld [vmem:[#allocation2 + $0x28b] ss:$2 sm:$0xff]  ;;  %6990 = vmatprep.subr.bf16.mxu1 %v6989_v38 }
 0x253   : > { %v1538_v53 = vmax.f32 %v1531_v29, %v1535_v46  ;;  %5975 = vmatmul.mubr.f32.gmra.mrb[176].mxu0 %v1551_v45  ;;  %v2344_v45 = vld [vmem:[#allocation3 + $0x36] sm:$0xff]  ;;  %v4780_v46 = vld [vmem:[%s9372_s3 + $0x2c8] sm:$0xff] }
 0x254   : > { %6093 = vmatmul.mubr.f32.gmra.mrb[6].mxu1 %v2138_v54  ;;  %5977 = vmatprep.mubr.f32.mxu0 %v1552_v48  ;;  %v4779_v29 = vld [vmem:[%s9372_s3 + $0x2c0] sm:$0xff]  ;;  %v4782_v54 = vld [vmem:[%s9372_s3 + $0x2d8] sm:$0xff]  ;;  %v4784_v59 = vld [vmem:[%s9372_s3 + $0x2e8] sm:$0xff] }
 0x255   : > { %v8453_v61 = vmax.f32 %v1528_v52, %v1538_v53  ;;  %6095 = vmatprep.mubr.f32.mxu1 %v2139_v57  ;;  %6992 = vmatpush3.bf16.msra.mxu1 %v6989_v38  ;;  %v2341_v38 = vld [vmem:[#allocation3 + $0x1e] sm:$0xff]  ;;  %v2346_v52 = vld [vmem:[#allocation3 + $0x46] sm:$0xff]  ;;  %v2348_v57 = vld [vmem:[#allocation3 + $0x56] sm:$0xff] }
 0x256   : > { %6994 = vmatprep.subr.bf16.mxu1 %v6993_v50  ;;  %v1533_v5 = vld [vmem:[#allocation2 + $0x29a] ss:$2 sm:$0x1f]  ;;  %v1537_v8 = vld [vmem:[#allocation2 + $0x29b] ss:$2 sm:$0x1f] }
 0x257   : > { %1542 = vst [vmem:[#allocation3 + $0x9c] sm:$0xff] %v8453_v61  ;;  %5978 = vmatmul.mubr.f32.gmra.mrb[178].mxu0 %v1553_v58  ;;  %v1539_v10 = vmax.f32 %v1533_v5, %v1537_v8  ;;  %v2345_v48 = vld [vmem:[#allocation3 + $0x3e] sm:$0xff]  ;;  %v4781_v53 = vld [vmem:[%s9372_s3 + $0x2d0] sm:$0xff]  ;;  %v2352_v8 = vld [vmem:[#allocation3 + $0x76] sm:$0xff] }
 0x258   : > { %6096 = vmatmul.mubr.f32.gmra.mrb[8].mxu1 %v2140_v63  ;;  %5980 = vmatprep.mubr.f32.mxu0 %v1554_v62  ;;  %v7029_v56 = vpack.c.bf16 %v4782_v54, %v4781_v53  ;;  %v4783_v58 = vld [vmem:[%s9372_s3 + $0x2e0] sm:$0xff]  ;;  %v2350_v63 = vld [vmem:[#allocation3 + $0x66] sm:$0xff]  ;;  %v4790_v17 = vld [vmem:[%s9372_s3 + $0x318] sm:$0xff] }
 0x259   : > { %6098 = vmatprep.mubr.f32.mxu1 %v2141_v11  ;;  %6996 = vmatpush3.bf16.msra.mxu1 %v6993_v50  ;;  %v1541_v12 = vmax.f32 %v1529_v9, %v1539_v10  ;;  %v7025_v50 = vpack.c.bf16 %v4780_v46, %v4779_v29  ;;  %v7033_v62 = vpack.c.bf16 %v4784_v59, %v4783_v58  ;;  %v4787_v9 = vld [vmem:[%s9372_s3 + $0x300] sm:$0xff]  ;;  %v4788_v10 = vld [vmem:[%s9372_s3 + $0x308] sm:$0xff]  ;;  %v2547_v18 = vld [vmem:[#allocation3 + $0xf] sm:$0xff] }
 0x25a   : > { %6998 = vmatprep.subr.bf16.mxu1 %v6997_v0  ;;  %v2353_v11 = vld [vmem:[#allocation3 + $0x7e] sm:$0xff]  ;;  %v4798_v36 = vld [vmem:[%s9372_s3 + $0x358] sm:$0xff]  ;;  %v4805_v58 = vld [vmem:[%s9372_s3 + $0x390] sm:$0xff] }
 0x25b   : > { %5981 = vmatmul.mubr.f32.gmra.mrb[180].mxu0 %v1555_v13  ;;  %1543 = vst [vmem:[#allocation3 + $0xa4] sm:$0x1f] %v1541_v12  ;;  %v7041_v12 = vpack.c.bf16 %v4788_v10, %v4787_v9  ;;  %v2354_v13 = vld [vmem:[#allocation3 + $0x86] sm:$0xff]  ;;  %v2555_v37 = vld [vmem:[#allocation3 + $0x4f] sm:$0xff]  ;;  %v2759_v10 = vld [vmem:[#allocation3 + $0x3a] sm:$0xff] }
 0x25c   : > { %6099 = vmatmul.mubr.f32.gmra.mrb[10].mxu1 %v2142_v16  ;;  %5983 = vmatprep.mubr.f32.mxu0 %v1556_v14  ;;  %v2355_v14 = vld [vmem:[#allocation3 + $0x8e] sm:$0xff]  ;;  %v4792_v23 = vld [vmem:[%s9372_s3 + $0x328] sm:$0xff] }
 0x25d   : > { %6101 = vmatprep.mubr.f32.mxu1 %v2143_v19  ;;  %7000 = vmatpush3.bf16.msra.mxu1 %v6997_v0  ;;  %v4785_v0 = vld [vmem:[%s9372_s3 + $0x2f0] sm:$0xff]  ;;  %v2549_v24 = vld [vmem:[#allocation3 + $0x1f] sm:$0xff]  ;;  %v4802_v29 = vld [vmem:[%s9372_s3 + $0x378] sm:$0xff] }
 0x25e   : > { %7002 = vmatprep.subr.bf16.mxu1 %v7001_v15  ;;  %v2148_v31 = vld [vmem:[#allocation3 + $0x95] sm:$0xff]  ;;  %v7037_v5 = vpack.c.bf16 %v4786_v2, %v4785_v0  ;;  %v4789_v16 = vld [vmem:[%s9372_s3 + $0x310] sm:$0xff]  ;;  %v4800_v51 = vld [vmem:[%s9372_s3 + $0x368] sm:$0xff] }
 0x25f   : > { %5984 = vmatmul.mubr.f32.gmra.mrb[182].mxu0 %v8383_v42  ;;  %v2146_v42 = vld [vmem:[#allocation3 + $0x85] sm:$0xff]  ;;  %v7045_v19 = vpack.c.bf16 %v4790_v17, %v4789_v16  ;;  %v2559_v46 = vld [vmem:[#allocation3 + $0x6f] sm:$0xff] }
 0x260   : > { %6102 = vmatmul.mubr.f32.gmra.mrb[12].mxu1 %v8392_v22  ;;  %5986 = vmatprep.mubr.f32.mxu0 %v1558_v21  ;;  %v4773_v22 = vld [vmem:[%s9372_s3 + $0x290] sm:$0xff]  ;;  %v4791_v21 = vld [vmem:[%s9372_s3 + $0x320] sm:$0xff]  ;;  %v4804_v53 = vld [vmem:[%s9372_s3 + $0x388] sm:$0xff] }
 0x261   : > { %6104 = vmatprep.mubr.f32.mxu1 %v2145_v25  ;;  %7004 = vmatpush3.bf16.msra.mxu1 %v7001_v15  ;;  %v7013_v34 = vpack.c.bf16 %v4774_v32, %v4773_v22  ;;  %v2356_v15 = vld [vmem:[#allocation3 + $0x96] sm:$0xff]  ;;  %v7049_v25 = vpack.c.bf16 %v4792_v23, %v4791_v21  ;;  %v4796_v22 = vld [vmem:[%s9372_s3 + $0x348] sm:$0xff]  ;;  %v2757_v2 = vld [vmem:[#allocation3 + $0x2a] sm:$0xff] }
 0x262   : > { %7006 = vmatprep.subr.bf16.mxu1 %v7005_v20  ;;  %v2553_v32 = vld [vmem:[#allocation3 + $0x3f] sm:$0xff]  ;;  %v4806_v59 = vld [vmem:[%s9372_s3 + $0x398] sm:$0xff] }
 0x263   : > { %5987 = vmatmul.mubr.f32.gmra.mrb[184].mxu0 %v1559_v26  ;;  %v2550_v26 = vld [vmem:[#allocation3 + $0x27] sm:$0xff]  ;;  %v2557_v41 = vld [vmem:[#allocation3 + $0x5f] sm:$0xff]  ;;  %v4810_v9 = vld [vmem:[%s9372_s3 + $0x3b8] sm:$0xff] }
 0x264   : > { %6105 = vmatmul.mubr.f32.gmra.mrb[14].mxu1 %v2146_v42  ;;  %5989 = vmatprep.mubr.f32.mxu0 %v1560_v28  ;;  %v4794_v42 = vld [vmem:[%s9372_s3 + $0x338] sm:$0xff]  ;;  %v2561_v54 = vld [vmem:[#allocation3 + $0x7f] sm:$0xff] }
 0x265   : > { %6107 = vmatprep.mubr.f32.mxu1 %v2147_v30  ;;  %7008 = vmatpush3.bf16.msra.mxu1 %v7005_v20  ;;  %v2548_v20 = vld [vmem:[#allocation3 + $0x17] sm:$0xff]  ;;  %v2551_v28 = vld [vmem:[#allocation3 + $0x2f] sm:$0xff]  ;;  %v4808_v0 = vld [vmem:[%s9372_s3 + $0x3a8] sm:$0xff] }
 0x266   : > { %7010 = vmatprep.subr.bf16.mxu1 %v7009_v27  ;;  %v2762_v17 = vld [vmem:[#allocation3 + $0x52] sm:$0xff]  ;;  %v2764_v23 = vld [vmem:[#allocation3 + $0x62] sm:$0xff] }
 0x267   : > { %5990 = vmatmul.mubr.f32.gmra.mrb[186].mxu0 %v1561_v6  ;;  %v2552_v6 = vld [vmem:[#allocation3 + $0x37] sm:$0xff] }
 0x268   : > { %6108 = vmatmul.mubr.f32.gmra.mrb[16].mxu1 %v2148_v31  ;;  %6752 = vmatprep.mubr.msk.f32.mxu0 %vm7681_vm0, %v8482_v44  ;;  %v4795_v31 = vld [vmem:[%s9372_s3 + $0x340] sm:$0xff] }
 0x269   : > { %6142 = vmatprep.mubr.f32.mxu1 %v2339_v33  ;;  %v7057_v33 = vpack.c.bf16 %v4796_v22, %v4795_v31  ;;  %v2768_v31 = vld [vmem:[#allocation3 + $0x82] sm:$0xff]  ;;  %v4819_v22 = vld [vmem:[%s9372_s3 + $0x400] sm:$0xff] }
 0x26c   : > { %6143 = vmatmul.mubr.f32.vlgmr.msra.gmra.mrb[0].mxu1 %v2340_v35  ;;  %v4797_v35 = vld [vmem:[%s9372_s3 + $0x350] sm:$0xff] }
 0x26d   : > { %7012 = vmatpush3.bf16.msra.mxu1 %v7009_v27  ;;  %6145 = vmatprep.mubr.f32.mxu1 %v2341_v38  ;;  %v4793_v27 = vld [vmem:[%s9372_s3 + $0x330] sm:$0xff]  ;;  %v7061_v38 = vpack.c.bf16 %v4798_v36, %v4797_v35 }
 0x26e   : > { %7014 = vmatprep.subr.bf16.mxu1 %v7013_v34  ;;  %v7053_v30 = vpack.c.bf16 %v4794_v42, %v4793_v27  ;;  %v2766_v42 = vld [vmem:[#allocation3 + $0x72] sm:$0xff]  ;;  %v2772_v35 = vld [vmem:[#allocation3 + $0xa2] sm:$0xff] }
 0x26f   : > { %v4821_v36 = vld [vmem:[%s9372_s3 + $0x410] sm:$0xff] }
 0x270   : > { %6146 = vmatmul.mubr.f32.gmra.mrb[2].mxu1 %v2342_v40  ;;  %v4799_v40 = vld [vmem:[%s9372_s3 + $0x360] sm:$0xff] }
 0x271   : > { %6148 = vmatprep.mubr.f32.mxu1 %v2343_v43  ;;  %7016 = vmatpush3.bf16.msra.mxu1 %v7013_v34  ;;  %v2554_v34 = vld [vmem:[#allocation3 + $0x47] sm:$0xff]  ;;  %v7065_v43 = vpack.c.bf16 %v4800_v51, %v4799_v40  ;;  %v4823_v40 = vld [vmem:[%s9372_s3 + $0x420] sm:$0xff] }
 0x272   : > { %7018 = vmatprep.subr.bf16.mxu1 %v7017_v39  ;;  %v4824_v51 = vld [vmem:[%s9372_s3 + $0x428] sm:$0xff] }
 0x274   : > { %6149 = vmatmul.mubr.f32.gmra.mrb[4].mxu1 %v2344_v45  ;;  %v4801_v45 = vld [vmem:[%s9372_s3 + $0x370] sm:$0xff] }
 0x275   : > { %6151 = vmatprep.mubr.f32.mxu1 %v2345_v48  ;;  %7020 = vmatpush3.bf16.msra.mxu1 %v7017_v39  ;;  %v2556_v39 = vld [vmem:[#allocation3 + $0x57] sm:$0xff]  ;;  %v7069_v48 = vpack.c.bf16 %v4802_v29, %v4801_v45  ;;  %v4825_v45 = vld [vmem:[%s9372_s3 + $0x430] sm:$0xff] }
 0x276   : > { %7022 = vmatprep.subr.bf16.mxu1 %v7021_v1  ;;  %v4826_v29 = vld [vmem:[%s9372_s3 + $0x438] sm:$0xff] }
 0x278   : > { %6152 = vmatmul.mubr.f32.gmra.mrb[6].mxu1 %v2346_v52  ;;  %v4803_v52 = vld [vmem:[%s9372_s3 + $0x380] sm:$0xff] }
 0x279   : > { %6154 = vmatprep.mubr.f32.mxu1 %v2347_v55  ;;  %7024 = vmatpush3.bf16.msra.mxu1 %v7021_v1  ;;  %v2558_v1 = vld [vmem:[#allocation3 + $0x67] sm:$0xff]  ;;  %v7073_v55 = vpack.c.bf16 %v4804_v53, %v4803_v52  ;;  %v4827_v52 = vld [vmem:[%s9372_s3 + $0x440] sm:$0xff] }
 0x27a   : > { %7026 = vmatprep.subr.bf16.mxu1 %v7025_v50  ;;  %v4828_v53 = vld [vmem:[%s9372_s3 + $0x448] sm:$0xff] }
 0x27c   : > { %6155 = vmatmul.mubr.f32.gmra.mrb[8].mxu1 %v2348_v57  ;;  %v2564_v57 = vld [vmem:[#allocation3 + $0x97] sm:$0xff] }
 0x27d   : > { %6157 = vmatprep.mubr.f32.mxu1 %v2349_v60  ;;  %7028 = vmatpush3.bf16.msra.mxu1 %v7025_v50  ;;  %v2560_v50 = vld [vmem:[#allocation3 + $0x77] sm:$0xff] }
 0x27e   : > { %7030 = vmatprep.subr.bf16.mxu1 %v7029_v56  ;;  %v2755_v60 = vld [vmem:[#allocation3 + $0x1a] sm:$0xff] }
 0x280   : > { %6158 = vmatmul.mubr.f32.gmra.mrb[10].mxu1 %v2350_v63  ;;  %v2756_v63 = vld [vmem:[#allocation3 + $0x22] sm:$0xff] }
 0x281   : > { %6160 = vmatprep.mubr.f32.mxu1 %v2351_v4  ;;  %7032 = vmatpush3.bf16.msra.mxu1 %v7029_v56  ;;  %v2562_v56 = vld [vmem:[#allocation3 + $0x87] sm:$0xff] }
 0x282   : > { %7034 = vmatprep.subr.bf16.mxu1 %v7033_v62 }
 0x284   : > { %6161 = vmatmul.mubr.f32.gmra.mrb[12].mxu1 %v2352_v8  ;;  %v4809_v8 = vld [vmem:[%s9372_s3 + $0x3b0] sm:$0xff] }
 0x285   : > { %6163 = vmatprep.mubr.f32.mxu1 %v2353_v11  ;;  %7036 = vmatpush3.bf16.msra.mxu1 %v7033_v62  ;;  %v7077_v62 = vpack.c.bf16 %v4806_v59, %v4805_v58  ;;  %v7085_v11 = vpack.c.bf16 %v4810_v9, %v4809_v8  ;;  %v4830_v58 = vld [vmem:[%s9372_s3 + $0x458] sm:$0xff]  ;;  %v2971_v59 = vld [vmem:[#allocation3 + $0x5b] sm:$0xff] }
 0x286   : > { %7038 = vmatprep.subr.bf16.mxu1 %v7037_v5  ;;  %v4834_v8 = vld [vmem:[%s9372_s3 + $0x478] sm:$0xff]  ;;  %v2975_v9 = vld [vmem:[#allocation3 + $0x7b] sm:$0xff] }
 0x288   : > { %6164 = vmatmul.mubr.f32.gmra.mrb[14].mxu1 %v2354_v13  ;;  %v4811_v13 = vld [vmem:[%s9372_s3 + $0x3c0] sm:$0xff] }
 0x289   : > { %6166 = vmatprep.mubr.f32.mxu1 %v2355_v14  ;;  %7040 = vmatpush3.bf16.msra.mxu1 %v7037_v5  ;;  %v2758_v5 = vld [vmem:[#allocation3 + $0x32] sm:$0xff]  ;;  %v4812_v14 = vld [vmem:[%s9372_s3 + $0x3c8] sm:$0xff] }
 0x28a   : > { %7042 = vmatprep.subr.bf16.mxu1 %v7041_v12  ;;  %v7089_v16 = vpack.c.bf16 %v4812_v14, %v4811_v13  ;;  %v2978_v13 = vld [vmem:[#allocation3 + $0x93] sm:$0xff]  ;;  %v2979_v14 = vld [vmem:[#allocation3 + $0x9b] sm:$0xff] }
 0x28c   : > { %6167 = vmatmul.mubr.f32.gmra.mrb[16].mxu1 %v2356_v15  ;;  %v2761_v15 = vld [vmem:[#allocation3 + $0x4a] sm:$0xff] }
 0x28d   : > { %6201 = vmatprep.mubr.f32.mxu1 %v2547_v18  ;;  %v4813_v18 = vld [vmem:[%s9372_s3 + $0x3d0] sm:$0xff] }
 0x290   : > { %6202 = vmatmul.mubr.f32.vlgmr.msra.gmra.mrb[0].mxu1 %v2548_v20  ;;  %v2763_v20 = vld [vmem:[#allocation3 + $0x5a] sm:$0xff] }
 0x291   : > { %7044 = vmatpush3.bf16.msra.mxu1 %v7041_v12  ;;  %6204 = vmatprep.mubr.f32.mxu1 %v2549_v24  ;;  %v2760_v12 = vld [vmem:[#allocation3 + $0x42] sm:$0xff]  ;;  %v4815_v24 = vld [vmem:[%s9372_s3 + $0x3e0] sm:$0xff] }
 0x292   : > { %7046 = vmatprep.subr.bf16.mxu1 %v7045_v19 }
 0x294   : > { %6205 = vmatmul.mubr.f32.gmra.mrb[2].mxu1 %v2550_v26  ;;  %v2765_v26 = vld [vmem:[#allocation3 + $0x6a] sm:$0xff] }
 0x295   : > { %6207 = vmatprep.mubr.f32.mxu1 %v2551_v28  ;;  %7048 = vmatpush3.bf16.msra.mxu1 %v7045_v19  ;;  %v4814_v19 = vld [vmem:[%s9372_s3 + $0x3d8] sm:$0xff]  ;;  %v4817_v28 = vld [vmem:[%s9372_s3 + $0x3f0] sm:$0xff] }
 0x296   : > { %7050 = vmatprep.subr.bf16.mxu1 %v7049_v25  ;;  %v7093_v21 = vpack.c.bf16 %v4814_v19, %v4813_v18  ;;  %v3173_v18 = vld [vmem:[#allocation3 + $0x2c] sm:$0xff]  ;;  %v3174_v19 = vld [vmem:[#allocation3 + $0x34] sm:$0xff] }
 0x298   : > { %6208 = vmatmul.mubr.f32.gmra.mrb[4].mxu1 %v2552_v6 }
 0x299   : > { %6210 = vmatprep.mubr.f32.mxu1 %v2553_v32  ;;  %7052 = vmatpush3.bf16.msra.mxu1 %v7049_v25  ;;  %v4816_v25 = vld [vmem:[%s9372_s3 + $0x3e8] sm:$0xff] }
 0x29a   : > { %7054 = vmatprep.subr.bf16.mxu1 %v7053_v30  ;;  %v7097_v27 = vpack.c.bf16 %v4816_v25, %v4815_v24  ;;  %v4820_v32 = vld [vmem:[%s9372_s3 + $0x408] sm:$0xff]  ;;  %v3178_v24 = vld [vmem:[#allocation3 + $0x54] sm:$0xff] }
 0x29b   : > { %v3179_v25 = vld [vmem:[#allocation3 + $0x5c] sm:$0xff] }
 0x29c   : > { %6211 = vmatmul.mubr.f32.gmra.mrb[6].mxu1 %v2554_v34  ;;  %v2770_v34 = vld [vmem:[#allocation3 + $0x92] sm:$0xff] }
 0x29d   : > { %6213 = vmatprep.mubr.f32.mxu1 %v2555_v37  ;;  %7056 = vmatpush3.bf16.msra.mxu1 %v7053_v30  ;;  %v4818_v30 = vld [vmem:[%s9372_s3 + $0x3f8] sm:$0xff] }
 0x29e   : > { %7058 = vmatprep.subr.bf16.mxu1 %v7057_v33  ;;  %v7101_v6 = vpack.c.bf16 %v4818_v30, %v4817_v28  ;;  %v4822_v37 = vld [vmem:[%s9372_s3 + $0x418] sm:$0xff]  ;;  %v3183_v28 = vld [vmem:[#allocation3 + $0x7c] sm:$0xff]  ;;  %v3184_v30 = vld [vmem:[#allocation3 + $0x84] sm:$0xff] }
 0x2a0   : > { %6214 = vmatmul.mubr.f32.gmra.mrb[8].mxu1 %v2556_v39  ;;  %v2964_v39 = vld [vmem:[#allocation3 + $0x23] sm:$0xff] }
 0x2a1   : > { %6216 = vmatprep.mubr.f32.mxu1 %v2557_v41  ;;  %7060 = vmatpush3.bf16.msra.mxu1 %v7057_v33  ;;  %v7105_v33 = vpack.c.bf16 %v4820_v32, %v4819_v22  ;;  %v2965_v41 = vld [vmem:[#allocation3 + $0x2b] sm:$0xff] }
 0x2a2   : > { %7062 = vmatprep.subr.bf16.mxu1 %v7061_v38 }
 0x2a4   : > { %6217 = vmatmul.mubr.f32.gmra.mrb[10].mxu1 %v2558_v1  ;;  %v2966_v1 = vld [vmem:[#allocation3 + $0x33] sm:$0xff] }
 0x2a5   : > { %6219 = vmatprep.mubr.f32.mxu1 %v2559_v46  ;;  %7064 = vmatpush3.bf16.msra.mxu1 %v7061_v38  ;;  %v7109_v38 = vpack.c.bf16 %v4822_v37, %v4821_v36  ;;  %v2967_v46 = vld [vmem:[#allocation3 + $0x3b] sm:$0xff] }
 0x2a6   : > { %7066 = vmatprep.subr.bf16.mxu1 %v7065_v43 }
 0x2a8   : > { %6220 = vmatmul.mubr.f32.gmra.mrb[12].mxu1 %v2560_v50  ;;  %v2968_v50 = vld [vmem:[#allocation3 + $0x43] sm:$0xff] }
 0x2a9   : > { %6222 = vmatprep.mubr.f32.mxu1 %v2561_v54  ;;  %7068 = vmatpush3.bf16.msra.mxu1 %v7065_v43  ;;  %v7113_v43 = vpack.c.bf16 %v4824_v51, %v4823_v40  ;;  %v2969_v54 = vld [vmem:[#allocation3 + $0x4b] sm:$0xff] }
 0x2aa   : > { %7070 = vmatprep.subr.bf16.mxu1 %v7069_v48 }
 0x2ac   : > { %6223 = vmatmul.mubr.f32.gmra.mrb[14].mxu1 %v2562_v56  ;;  %v2970_v56 = vld [vmem:[#allocation3 + $0x53] sm:$0xff] }
 0x2ad   : > { %6225 = vmatprep.mubr.f32.mxu1 %v8411_v49  ;;  %7072 = vmatpush3.bf16.msra.mxu1 %v7069_v48  ;;  %v4807_v49 = vld [vmem:[%s9372_s3 + $0x3a0] sm:$0xff]  ;;  %v7117_v48 = vpack.c.bf16 %v4826_v29, %v4825_v45 }
 0x2ae   : > { %7074 = vmatprep.subr.bf16.mxu1 %v7073_v55  ;;  %v7081_v4 = vpack.c.bf16 %v4808_v0, %v4807_v49  ;;  %v4832_v49 = vld [vmem:[%s9372_s3 + $0x468] sm:$0xff]  ;;  %v2973_v0 = vld [vmem:[#allocation3 + $0x6b] sm:$0xff] }
 0x2b0   : > { %6226 = vmatmul.mubr.f32.gmra.mrb[16].mxu1 %v2564_v57  ;;  %v4829_v57 = vld [vmem:[%s9372_s3 + $0x450] sm:$0xff] }
 0x2b1   : > { %6260 = vmatprep.mubr.f32.mxu1 %v2755_v60  ;;  %v7125_v60 = vpack.c.bf16 %v4830_v58, %v4829_v57  ;;  %v4842_v58 = vld [vmem:[%s9374_s5 + $0xb0] sm:$0xff] }
 0x2b4   : > { %6261 = vmatmul.mubr.f32.vlgmr.msra.gmra.mrb[0].mxu1 %v2756_v63  ;;  %v4831_v63 = vld [vmem:[%s9372_s3 + $0x460] sm:$0xff] }
 0x2b5   : > { %7076 = vmatpush3.bf16.msra.mxu1 %v7073_v55  ;;  %6263 = vmatprep.mubr.f32.mxu1 %v2757_v2  ;;  %v7121_v55 = vpack.c.bf16 %v4828_v53, %v4827_v52  ;;  %v7129_v2 = vpack.c.bf16 %v4832_v49, %v4831_v63  ;;  %v4838_v52 = vld [vmem:[%s9374_s5 + $0x90] sm:$0xff]  ;;  %v4839_v53 = vld [vmem:[%s9374_s5 + $0x98] sm:$0xff]  ;;  %v4845_v63 = vld [vmem:[%s9374_s5 + $0xc8] sm:$0xff] }
 0x2b6   : > { %7078 = vmatprep.subr.bf16.mxu1 %v7077_v62 }
 0x2b8   : > { %6264 = vmatmul.mubr.f32.gmra.mrb[2].mxu1 %v2758_v5  ;;  %v4833_v5 = vld [vmem:[%s9372_s3 + $0x470] sm:$0xff] }
 0x2b9   : > { %6266 = vmatprep.mubr.f32.mxu1 %v2759_v10  ;;  %7080 = vmatpush3.bf16.msra.mxu1 %v7077_v62  ;;  %v2972_v62 = vld [vmem:[#allocation3 + $0x63] sm:$0xff]  ;;  %v7133_v10 = vpack.c.bf16 %v4834_v8, %v4833_v5  ;;  %v4848_v5 = vld [vmem:[%s9374_s5 + $0xe0] sm:$0xff] }
 0x2ba   : > { %7082 = vmatprep.subr.bf16.mxu1 %v7081_v4  ;;  %v4849_v8 = vld [vmem:[%s9374_s5 + $0xe8] sm:$0xff] }
 0x2bc   : > { %6267 = vmatmul.mubr.f32.gmra.mrb[4].mxu1 %v2760_v12  ;;  %v2977_v12 = vld [vmem:[#allocation3 + $0x8b] sm:$0xff] }
 0x2bd   : > { %6269 = vmatprep.mubr.f32.mxu1 %v2761_v15  ;;  %7084 = vmatpush3.bf16.msra.mxu1 %v7081_v4  ;;  %v2974_v4 = vld [vmem:[#allocation3 + $0x73] sm:$0xff]  ;;  %v2980_v15 = vld [vmem:[#allocation3 + $0xa3] sm:$0xff] }
 0x2be   : > { %7086 = vmatprep.subr.bf16.mxu1 %v7085_v11 }
 0x2c0   : > { %6270 = vmatmul.mubr.f32.gmra.mrb[6].mxu1 %v2762_v17  ;;  %v3172_v17 = vld [vmem:[#allocation3 + $0x24] sm:$0xff] }
 0x2c1   : > { %6272 = vmatprep.mubr.f32.mxu1 %v2763_v20  ;;  %7088 = vmatpush3.bf16.msra.mxu1 %v7085_v11  ;;  %v2976_v11 = vld [vmem:[#allocation3 + $0x83] sm:$0xff] }
 0x2c2   : > { %7090 = vmatprep.subr.bf16.mxu1 %v7089_v16  ;;  %v3175_v20 = vld [vmem:[#allocation3 + $0x3c] sm:$0xff] }
 0x2c4   : > { %6273 = vmatmul.mubr.f32.gmra.mrb[8].mxu1 %v2764_v23  ;;  %v3177_v23 = vld [vmem:[#allocation3 + $0x4c] sm:$0xff] }
 0x2c5   : > { %6275 = vmatprep.mubr.f32.mxu1 %v2765_v26  ;;  %7092 = vmatpush3.bf16.msra.mxu1 %v7089_v16  ;;  %v3171_v16 = vld [vmem:[#allocation3 + $0x1c] sm:$0xff]  ;;  %v3180_v26 = vld [vmem:[#allocation3 + $0x64] sm:$0xff] }
 0x2c6   : > { %7094 = vmatprep.subr.bf16.mxu1 %v7093_v21 }
 0x2c8   : > { %6276 = vmatmul.mubr.f32.gmra.mrb[10].mxu1 %v2766_v42  ;;  %v3182_v42 = vld [vmem:[#allocation3 + $0x74] sm:$0xff] }
 0x2c9   : > { %6278 = vmatprep.mubr.f32.mxu1 %v8399_v47  ;;  %7096 = vmatpush3.bf16.msra.mxu1 %v7093_v21  ;;  %v2771_v47 = vld [vmem:[#allocation3 + $0x9a] sm:$0xff]  ;;  %v3176_v21 = vld [vmem:[#allocation3 + $0x44] sm:$0xff] }
 0x2ca   : > { %7098 = vmatprep.subr.bf16.mxu1 %v7097_v27 }
 0x2cc   : > { %6279 = vmatmul.mubr.f32.gmra.mrb[12].mxu1 %v2768_v31  ;;  %v3186_v31 = vld [vmem:[#allocation3 + $0x94] sm:$0xff] }
 0x2cd   : > { %6281 = vmatprep.mubr.f32.mxu1 %v8416_v7  ;;  %7100 = vmatpush3.bf16.msra.mxu1 %v7097_v27  ;;  %v2963_v7 = vld [vmem:[#allocation3 + $0x1b] sm:$0xff]  ;;  %v3181_v27 = vld [vmem:[#allocation3 + $0x6c] sm:$0xff] }
 0x2ce   : > { %7102 = vmatprep.subr.bf16.mxu1 %v7101_v6 }
 0x2d0   : > { %6282 = vmatmul.mubr.f32.gmra.mrb[14].mxu1 %v2770_v34 }
 0x2d1   : > { %6284 = vmatprep.mubr.f32.mxu1 %v2771_v47  ;;  %7104 = vmatpush3.bf16.msra.mxu1 %v7101_v6  ;;  %v3185_v6 = vld [vmem:[#allocation3 + $0x8c] sm:$0xff] }
 0x2d2   : > { %7106 = vmatprep.subr.bf16.mxu1 %v7105_v33 }
 0x2d4   : > { %6285 = vmatmul.mubr.f32.gmra.mrb[16].mxu1 %v2772_v35 }
 0x2d5   : > { %6319 = vmatprep.mubr.f32.mxu1 %v2963_v7 }
 0x2d8   : > { %6320 = vmatmul.mubr.f32.vlgmr.msra.gmra.mrb[0].mxu1 %v2964_v39 }
 0x2d9   : > { %7108 = vmatpush3.bf16.msra.mxu1 %v7105_v33  ;;  %6322 = vmatprep.mubr.f32.mxu1 %v2965_v41  ;;  %v3188_v33 = vld [vmem:[#allocation3 + $0xa4] sm:$0xff] }
 0x2da   : > { %7110 = vmatprep.subr.bf16.mxu1 %v7109_v38 }
 0x2dc   : > { %6323 = vmatmul.mubr.f32.gmra.mrb[2].mxu1 %v2966_v1 }
 0x2dd   : > { %6325 = vmatprep.mubr.f32.mxu1 %v2967_v46  ;;  %7112 = vmatpush3.bf16.msra.mxu1 %v7109_v38  ;;  %v4836_v46 = vld [vmem:[%s9374_s5 + $0x80] sm:$0xff] }
 0x2de   : > { %7114 = vmatprep.subr.bf16.mxu1 %v7113_v43 }
 0x2e0   : > { %6326 = vmatmul.mubr.f32.gmra.mrb[4].mxu1 %v2968_v50 }
 0x2e1   : > { %6328 = vmatprep.mubr.f32.mxu1 %v2969_v54  ;;  %7116 = vmatpush3.bf16.msra.mxu1 %v7113_v43  ;;  %v7141_v54 = vpack.c.bf16 %v4839_v53, %v4838_v52 }
 0x2e2   : > { %7118 = vmatprep.subr.bf16.mxu1 %v7117_v48 }
 0x2e4   : > { %6329 = vmatmul.mubr.f32.gmra.mrb[6].mxu1 %v2970_v56  ;;  %v4841_v56 = vld [vmem:[%s9374_s5 + $0xa8] sm:$0xff] }
 0x2e5   : > { %6331 = vmatprep.mubr.f32.mxu1 %v2971_v59  ;;  %7120 = vmatpush3.bf16.msra.mxu1 %v7117_v48  ;;  %v4837_v48 = vld [vmem:[%s9374_s5 + $0x88] sm:$0xff]  ;;  %v4843_v59 = vld [vmem:[%s9374_s5 + $0xb8] sm:$0xff] }
 0x2e6   : > { %7122 = vmatprep.subr.bf16.mxu1 %v7121_v55  ;;  %v7137_v50 = vpack.c.bf16 %v4837_v48, %v4836_v46 }
 0x2e8   : > { %6332 = vmatmul.mubr.f32.gmra.mrb[8].mxu1 %v2972_v62  ;;  %v4844_v62 = vld [vmem:[%s9374_s5 + $0xc0] sm:$0xff] }
 0x2e9   : > { %6334 = vmatprep.mubr.f32.mxu1 %v2973_v0  ;;  %7124 = vmatpush3.bf16.msra.mxu1 %v7121_v55  ;;  %v4840_v55 = vld [vmem:[%s9374_s5 + $0xa0] sm:$0xff]  ;;  %v7153_v49 = vpack.c.bf16 %v4845_v63, %v4844_v62  ;;  %v4846_v0 = vld [vmem:[%s9374_s5 + $0xd0] sm:$0xff] }
 0x2ea   : > { %7126 = vmatprep.subr.bf16.mxu1 %v7125_v60  ;;  %v7145_v57 = vpack.c.bf16 %v4841_v56, %v4840_v55 }
 0x2ec   : > { %6335 = vmatmul.mubr.f32.gmra.mrb[10].mxu1 %v2974_v4 }
 0x2ed   : > { %6337 = vmatprep.mubr.f32.mxu1 %v2975_v9  ;;  %7128 = vmatpush3.bf16.msra.mxu1 %v7125_v60  ;;  %v7149_v60 = vpack.c.bf16 %v4843_v59, %v4842_v58  ;;  %v7161_v9 = vpack.c.bf16 %v4849_v8, %v4848_v5 }
 0x2ee   : > { %7130 = vmatprep.subr.bf16.mxu1 %v7129_v2 }
 0x2f0   : > { %6338 = vmatmul.mubr.f32.gmra.mrb[12].mxu1 %v2976_v11  ;;  %v4851_v11 = vld [vmem:[%s9374_s5 + $0xf8] sm:$0xff] }
 0x2f1   : > { %6340 = vmatprep.mubr.f32.mxu1 %v2977_v12  ;;  %7132 = vmatpush3.bf16.msra.mxu1 %v7129_v2  ;;  %v4847_v2 = vld [vmem:[%s9374_s5 + $0xd8] sm:$0xff] }
 0x2f2   : > { %7134 = vmatprep.subr.bf16.mxu1 %v7133_v10  ;;  %v7157_v4 = vpack.c.bf16 %v4847_v2, %v4846_v0 }
 0x2f4   : > { %6341 = vmatmul.mubr.f32.gmra.mrb[14].mxu1 %v2978_v13  ;;  %v3501_v13 = vld [vmem:[%s9374_s5] sm:$0xff] }
 0x2f5   : > { %6343 = vmatprep.mubr.f32.mxu1 %v2979_v14  ;;  %7136 = vmatpush3.bf16.msra.mxu1 %v7133_v10  ;;  %v4850_v10 = vld [vmem:[%s9374_s5 + $0xf0] sm:$0xff]  ;;  %v3502_v14 = vld [vmem:[%s9374_s5 + $0x8] sm:$0xff] }
 0x2f6   : > { %7138 = vmatprep.subr.bf16.mxu1 %v7137_v50  ;;  %v7165_v12 = vpack.c.bf16 %v4851_v11, %v4850_v10 }
 0x2f8   : > { %6344 = vmatmul.mubr.f32.gmra.mrb[16].mxu1 %v2980_v15  ;;  %v8756_v15 = vpack.c.bf16 %v3502_v14, %v3501_v13 }
 0x2f9   : > { %6378 = vmatprep.mubr.f32.mxu1 %v3171_v16 }
 0x2fc   : > { %6379 = vmatmul.mubr.f32.vlgmr.msra.gmra.mrb[0].mxu1 %v3172_v17  ;;  %v8762_v17 = vld [vmem:[%s9373_s4] ss:$0 sm:$0xff] }
 0x2fd   : > { %6381 = vmatprep.mubr.f32.mxu1 %v3173_v18  ;;  %7140 = vmatpush3.bf16.msra.mxu1 %v7137_v50 }
 0x2fe   : > { %7142 = vmatprep.subr.bf16.mxu1 %v7141_v54 }
 0x300   : > { %6382 = vmatmul.mubr.f32.gmra.mrb[2].mxu1 %v3174_v19 }
 0x301   : > { %6384 = vmatprep.mubr.f32.mxu1 %v3175_v20  ;;  %7144 = vmatpush3.bf16.msra.mxu1 %v7141_v54 }
 0x302   : > { %7146 = vmatprep.subr.bf16.mxu1 %v7145_v57 }
 0x304   : > { %6385 = vmatmul.mubr.f32.gmra.mrb[4].mxu1 %v3176_v21 }
 0x305   : > { %6387 = vmatprep.mubr.f32.mxu1 %v3177_v23  ;;  %7148 = vmatpush3.bf16.msra.mxu1 %v7145_v57 }
 0x306   : > { %7150 = vmatprep.subr.bf16.mxu1 %v7149_v60 }
 0x308   : > { %6388 = vmatmul.mubr.f32.gmra.mrb[6].mxu1 %v3178_v24 }
 0x309   : > { %6390 = vmatprep.mubr.f32.mxu1 %v3179_v25  ;;  %7152 = vmatpush3.bf16.msra.mxu1 %v7149_v60 }
 0x30a   : > { %7154 = vmatprep.subr.bf16.mxu1 %v7153_v49 }
 0x30c   : > { %6391 = vmatmul.mubr.f32.gmra.mrb[8].mxu1 %v3180_v26 }
 0x30d   : > { %6393 = vmatprep.mubr.f32.mxu1 %v3181_v27  ;;  %7156 = vmatpush3.bf16.msra.mxu1 %v7153_v49 }
 0x30e   : > { %7158 = vmatprep.subr.bf16.mxu1 %v7157_v4 }
 0x310   : > { %6394 = vmatmul.mubr.f32.gmra.mrb[10].mxu1 %v3182_v42 }
 0x311   : > { %6396 = vmatprep.mubr.f32.mxu1 %v3183_v28  ;;  %7160 = vmatpush3.bf16.msra.mxu1 %v7157_v4 }
 0x312   : > { %7162 = vmatprep.subr.bf16.mxu1 %v7161_v9 }
 0x314   : > { %6397 = vmatmul.mubr.f32.gmra.mrb[12].mxu1 %v3184_v30 }
 0x315   : > { %6399 = vmatprep.mubr.f32.mxu1 %v3185_v6  ;;  %7164 = vmatpush3.bf16.msra.mxu1 %v7161_v9 }
 0x316   : > { %7166 = vmatprep.subr.bf16.mxu1 %v7165_v12 }
 0x318   : > { %6400 = vmatmul.mubr.f32.gmra.mrb[14].mxu1 %v3186_v31 }
 0x319   : > { %6402 = vmatprep.mubr.f32.mxu1 %v8453_v61  ;;  %7168 = vmatpush3.bf16.msra.mxu1 %v7165_v12 }
 0x31a   : > { %v8670_v22 = vpop.f32.mrb[170].mxu0  ;;  %7170 = vmatprep.subr.bf16.mxu1 %v8756_v15 }
 0x31b   : > { %v8672_v32 = vpop.f32.mrb[171].mxu0 }
 0x31c   : > { %6403 = vmatmul.mubr.f32.gmra.mrb[16].mxu1 %v3188_v33 }
 0x31e   : > { %v8674_v34 = vpop.f32.mrb[172].mxu0 }
 0x31f   : > { %v8676_v47 = vpop.f32.mrb[173].mxu0 }
 0x322   : > { %v8678_v35 = vpop.f32.mrb[174].mxu0 }
 0x323   : > { %v8680_v36 = vpop.f32.mrb[175].mxu0 }
 0x326   : > { %v8682_v37 = vpop.f32.mrb[176].mxu0 }
 0x327   : > { %v8684_v7 = vpop.f32.mrb[177].mxu0 }
 0x32a   : > { %v8686_v38 = vpop.f32.mrb[178].mxu0 }
 0x32b   : > { %v8688_v61 = vpop.f32.mrb[179].mxu0 }
 0x32e   : > { %v8690_v39 = vpop.f32.mrb[180].mxu0 }
 0x32f   : > { %v8692_v40 = vpop.f32.mrb[181].mxu0 }
 0x332   : > { %v8694_v51 = vpop.f32.mrb[182].mxu0 }
 0x333   : > { %v8696_v41 = vpop.f32.mrb[183].mxu0 }
 0x336   : > { %v8698_v43 = vpop.f32.mrb[184].mxu0 }
 0x337   : > { %v8700_v1 = vpop.f32.mrb[185].mxu0 }
 0x33a   : > { %v5991_v45 = vpop.f32.mrb[186].mxu0 }
 0x33b   : > { %v1914_v29 = vpop.f32.mrb[187].mxu0 }
 0x3cf   : > { %v6380_v16 = vpop.f32.mrb[0].mxu1 }
 0x3d0   : > { %v7497_v18 = vadd.f32 %v6380_v16, %v8670_v22  ;;  %v3272_v19 = vpop.f32.mrb[1].mxu1 }
 0x3d1   : > { %v7498_v20 = vadd.f32 %v3272_v19, %v8672_v32 }
 0x3d2   : > { %v3387_v21 = vadd.f32 %v7497_v18, %v8762_v17 }
 0x3d3   : > { %v3386_v23 = vadd.f32 %v7498_v20, %v8762_v17  ;;  %v6383_v24 = vpop.f32.mrb[2].mxu1 }
 0x3d4   : > { %v3405_v25 = vmax.f32 %v3387_v21, 0.0  ;;  %v7499_v26 = vadd.f32 %v6383_v24, %v8674_v34  ;;  %v3282_v27 = vpop.f32.mrb[3].mxu1 }
 0x3d5   : > { %v3404_v42 = vmax.f32 %v3386_v23, 0.0  ;;  %v7500_v28 = vadd.f32 %v3282_v27, %v8676_v47 }
 0x3d6   : > { %3423 = vst [vmem:[#allocation4 + $0x8] sm:$0xff] %v3405_v25  ;;  %v3389_v30 = vadd.f32 %v7499_v26, %v8762_v17 }
 0x3d7   : > { %3422 = vst [vmem:[#allocation4] sm:$0xff] %v3404_v42  ;;  %v3388_v6 = vadd.f32 %v7500_v28, %v8762_v17  ;;  %v6386_v31 = vpop.f32.mrb[4].mxu1 }
 0x3d8   : > { %v3407_v22 = vmax.f32 %v3389_v30, 0.0  ;;  %v7501_v32 = vadd.f32 %v6386_v31, %v8678_v35  ;;  %v3292_v33 = vpop.f32.mrb[5].mxu1 }
 0x3d9   : > { %v3406_v45 = vmax.f32 %v3388_v6, 0.0  ;;  %v7502_v29 = vadd.f32 %v3292_v33, %v8680_v36 }
 0x3da   : > { %3425 = vst [vmem:[#allocation4 + $0x18] sm:$0xff] %v3407_v22  ;;  %v3391_v34 = vadd.f32 %v7501_v32, %v8762_v17 }
 0x3db   : > { %3424 = vst [vmem:[#allocation4 + $0x10] sm:$0xff] %v3406_v45  ;;  %v3390_v47 = vadd.f32 %v7502_v29, %v8762_v17  ;;  %v6389_v46 = vpop.f32.mrb[6].mxu1 }
 0x3dc   : > { %v3409_v48 = vmax.f32 %v3391_v34, 0.0  ;;  %v7503_v50 = vadd.f32 %v6389_v46, %v8682_v37  ;;  %v3302_v52 = vpop.f32.mrb[7].mxu1 }
 0x3dd   : > { %v3408_v53 = vmax.f32 %v3390_v47, 0.0  ;;  %v7504_v54 = vadd.f32 %v3302_v52, %v8684_v7 }
 0x3de   : > { %3427 = vst [vmem:[#allocation4 + $0x28] sm:$0xff] %v3409_v48  ;;  %v3393_v35 = vadd.f32 %v7503_v50, %v8762_v17  ;;  %v3440_v55 = vld [vmem:[#allocation4] ss:$2 sm:$0x1f] }
 0x3df   : > { %3426 = vst [vmem:[#allocation4 + $0x20] sm:$0xff] %v3408_v53  ;;  %v3392_v36 = vadd.f32 %v7504_v54, %v8762_v17  ;;  %v6392_v56 = vpop.f32.mrb[8].mxu1  ;;  %v3442_v57 = vld [vmem:[#allocation4 + $0x1] ss:$2 sm:$0x1f] }
 0x3e0   : > { %v3411_v58 = vmax.f32 %v3393_v35, 0.0  ;;  %v7505_v59 = vadd.f32 %v6392_v56, %v8686_v38  ;;  %v3312_v60 = vpop.f32.mrb[9].mxu1  ;;  %v3443_v0 = vmax.f32 %v3440_v55, %v3442_v57 }
 0x3e1   : > { %v3410_v62 = vmax.f32 %v3392_v36, 0.0  ;;  %v7506_v37 = vadd.f32 %v3312_v60, %v8688_v61 }
 0x3e2   : > { %v3445_v63 = vld [vmem:[#allocation4 + $0xd] ss:$2 sm:$0x1f]  ;;  %v3447_v49 = vld [vmem:[#allocation4 + $0xe] ss:$2 sm:$0x1f]  ;;  %v3395_v7 = vadd.f32 %v7505_v59, %v8762_v17 }
 0x3e3   : > { %3429 = vst [vmem:[#allocation4 + $0x38] sm:$0xff] %v3411_v58  ;;  %v3448_v2 = vmax.f32 %v3445_v63, %v3447_v49  ;;  %3428 = vst [vmem:[#allocation4 + $0x30] sm:$0xff] %v3410_v62  ;;  %v3394_v4 = vadd.f32 %v7506_v37, %v8762_v17  ;;  %v6395_v5 = vpop.f32.mrb[10].mxu1 }
 0x3e4   : > { %v3413_v8 = vmax.f32 %v3395_v7, 0.0  ;;  %v7507_v9 = vadd.f32 %v6395_v5, %v8690_v39  ;;  %v3322_v10 = vpop.f32.mrb[11].mxu1 }
 0x3e5   : > { %v3412_v38 = vmax.f32 %v3394_v4, 0.0  ;;  %v7508_v11 = vadd.f32 %v3322_v10, %v8692_v40  ;;  %v3449_v12 = vmax.f32 %v3443_v0, %v3448_v2  ;;  %v3503_v0 = vld [vmem:[%s9374_s5 + $0x10] sm:$0xff]  ;;  %v3504_v2 = vld [vmem:[%s9374_s5 + $0x18] sm:$0xff] }
 0x3e6   : > { %3431 = vst [vmem:[#allocation4 + $0x48] sm:$0xff] %v3413_v8  ;;  %v3397_v61 = vadd.f32 %v7507_v9, %v8762_v17  ;;  %v3452_v13 = vld [vmem:[#allocation4 + $0x1a] ss:$2 sm:$0x1f]  ;;  %v7173_v4 = vpack.c.bf16 %v3504_v2, %v3503_v0  ;;  %v3505_v8 = vld [vmem:[%s9374_s5 + $0x20] sm:$0xff]  ;;  %v3506_v9 = vld [vmem:[%s9374_s5 + $0x28] sm:$0xff] }
 0x3e7   : > { %3430 = vst [vmem:[#allocation4 + $0x40] sm:$0xff] %v3412_v38  ;;  %v3396_v14 = vadd.f32 %v7508_v11, %v8762_v17  ;;  %v6398_v16 = vpop.f32.mrb[12].mxu1  ;;  %3450 = vst [vmem:[#allocation5] sm:$0x1f] %v3449_v12  ;;  %v7177_v38 = vpack.c.bf16 %v3506_v9, %v3505_v8  ;;  %v3507_v11 = vld [vmem:[%s9374_s5 + $0x30] sm:$0xff]  ;;  %v3508_v12 = vld [vmem:[%s9374_s5 + $0x38] sm:$0xff] }
 0x3e8   : > { %v3454_v18 = vld [vmem:[#allocation4 + $0x1b] ss:$2 sm:$0x1f]  ;;  %v3415_v19 = vmax.f32 %v3397_v61, 0.0  ;;  %v7509_v20 = vadd.f32 %v6398_v16, %v8694_v51  ;;  %v3332_v21 = vpop.f32.mrb[13].mxu1  ;;  %v7181_v61 = vpack.c.bf16 %v3508_v12, %v3507_v11  ;;  %v4876_v2 = vld [vmem:[%s9374_s5 + $0x1c0] sm:$0xff] }
 0x3e9   : > { %v3414_v39 = vmax.f32 %v3396_v14, 0.0  ;;  %v7510_v23 = vadd.f32 %v3332_v21, %v8696_v41  ;;  %v3457_v24 = vld [vmem:[#allocation4 + $0x27] ss:$2 sm:$0x1f]  ;;  %v3455_v26 = vmax.f32 %v3452_v13, %v3454_v18  ;;  %v3511_v16 = vld [vmem:[%s9374_s5 + $0x50] sm:$0xff]  ;;  %v3514_v21 = vld [vmem:[%s9374_s5 + $0x68] sm:$0xff] }
 0x3ea   : > { %v3459_v40 = vld [vmem:[#allocation4 + $0x28] ss:$2 sm:$0x1f]  ;;  %3433 = vst [vmem:[#allocation4 + $0x58] sm:$0xff] %v3415_v19  ;;  %v3399_v25 = vadd.f32 %v7509_v20, %v8762_v17  ;;  %v3512_v18 = vld [vmem:[%s9374_s5 + $0x58] sm:$0xff]  ;;  %v4878_v8 = vld [vmem:[%s9374_s5 + $0x1d0] sm:$0xff] }
 0x3eb   : > { %v3460_v27 = vmax.f32 %v3457_v24, %v3459_v40  ;;  %v3464_v42 = vld [vmem:[#allocation4 + $0x34] ss:$2 sm:$0x1f]  ;;  %3432 = vst [vmem:[#allocation4 + $0x50] sm:$0xff] %v3414_v39  ;;  %v3398_v28 = vadd.f32 %v7510_v23, %v8762_v17  ;;  %v6401_v30 = vpop.f32.mrb[14].mxu1  ;;  %v3509_v13 = vld [vmem:[%s9374_s5 + $0x40] sm:$0xff]  ;;  %v7189_v19 = vpack.c.bf16 %v3512_v18, %v3511_v16 }
 0x3ec   : > { %v3466_v6 = vld [vmem:[#allocation4 + $0x35] ss:$2 sm:$0x1f]  ;;  %v3417_v31 = vmax.f32 %v3399_v25, 0.0  ;;  %v7511_v51 = vadd.f32 %v6401_v30, %v8698_v43  ;;  %v3342_v22 = vpop.f32.mrb[15].mxu1  ;;  %v3513_v20 = vld [vmem:[%s9374_s5 + $0x60] sm:$0xff] }
 0x3ed   : > { %v3416_v32 = vmax.f32 %v3398_v28, 0.0  ;;  %v7512_v41 = vadd.f32 %v3342_v22, %v8700_v1  ;;  %v3461_v33 = vmax.f32 %v3455_v26, %v3460_v27  ;;  %v3467_v47 = vmax.f32 %v3464_v42, %v3466_v6  ;;  %v3515_v23 = vld [vmem:[%s9374_s5 + $0x70] sm:$0xff]  ;;  %v3516_v24 = vld [vmem:[%s9374_s5 + $0x78] sm:$0xff]  ;;  %v4852_v25 = vld [vmem:[%s9374_s5 + $0x100] sm:$0xff] }
 0x3ee   : > { %v3469_v45 = vld [vmem:[#allocation4 + $0x41] ss:$2 sm:$0x1f]  ;;  %v3471_v29 = vld [vmem:[#allocation4 + $0x42] ss:$2 sm:$0x1f]  ;;  %v3401_v34 = vadd.f32 %v7511_v51, %v8762_v17  ;;  %v7193_v39 = vpack.c.bf16 %v3514_v21, %v3513_v20  ;;  %v7197_v40 = vpack.c.bf16 %v3516_v24, %v3515_v23 }
 0x3ef   : > { %3435 = vst [vmem:[#allocation4 + $0x68] sm:$0xff] %v3417_v31  ;;  %v3472_v46 = vmax.f32 %v3469_v45, %v3471_v29  ;;  %3434 = vst [vmem:[#allocation4 + $0x60] sm:$0xff] %v3416_v32  ;;  %v3400_v48 = vadd.f32 %v7512_v41, %v8762_v17  ;;  %v6404_v50 = vpop.f32.mrb[16].mxu1  ;;  %v4853_v26 = vld [vmem:[%s9374_s5 + $0x108] sm:$0xff]  ;;  %v4854_v42 = vld [vmem:[%s9374_s5 + $0x110] sm:$0xff] }
 0x3f0   : > { %3462 = vst [vmem:[#allocation5 + $0x5] sm:$0x1f] %v3461_v33  ;;  %v3419_v52 = vmax.f32 %v3401_v34, 0.0  ;;  %v3352_v53 = vpop.f32.mrb[17].mxu1  ;;  %v7201_v27 = vpack.c.bf16 %v4853_v26, %v4852_v25  ;;  %v4855_v28 = vld [vmem:[%s9374_s5 + $0x118] sm:$0xff]  ;;  %v4856_v31 = vld [vmem:[%s9374_s5 + $0x120] sm:$0xff] }
 0x3f1   : > { %v3473_v43 = vmax.f32 %v3467_v47, %v3472_v46  ;;  %v3418_v54 = vmax.f32 %v3400_v48, 0.0  ;;  %v7205_v30 = vpack.c.bf16 %v4855_v28, %v4854_v42  ;;  %v4857_v51 = vld [vmem:[%s9374_s5 + $0x128] sm:$0xff]  ;;  %v4858_v41 = vld [vmem:[%s9374_s5 + $0x130] sm:$0xff]  ;;  %v4859_v33 = vld [vmem:[%s9374_s5 + $0x138] sm:$0xff] }
 0x3f2   : > { %3437 = vst [vmem:[#allocation4 + $0x78] sm:$0xff] %v3419_v52  ;;  %v3476_v1 = vld [vmem:[#allocation4 + $0x4e] ss:$2 sm:$0x1f]  ;;  %v7209_v32 = vpack.c.bf16 %v4857_v51, %v4856_v31  ;;  %v7213_v45 = vpack.c.bf16 %v4859_v33, %v4858_v41  ;;  %v4862_v46 = vld [vmem:[%s9374_s5 + $0x150] sm:$0xff]  ;;  %v4863_v48 = vld [vmem:[%s9374_s5 + $0x158] sm:$0xff] }
 0x3f3   : > { %3474 = vst [vmem:[#allocation5 + $0xa] sm:$0x1f] %v3473_v43  ;;  %3436 = vst [vmem:[#allocation4 + $0x70] sm:$0xff] %v3418_v54  ;;  %v3478_v35 = vld [vmem:[#allocation4 + $0x4f] ss:$2 sm:$0x1f]  ;;  %v7221_v50 = vpack.c.bf16 %v4863_v48, %v4862_v46 }
 0x3f4   : > { %v3479_v56 = vmax.f32 %v3476_v1, %v3478_v35  ;;  %v4860_v29 = vld [vmem:[%s9374_s5 + $0x140] sm:$0xff]  ;;  %v4861_v34 = vld [vmem:[%s9374_s5 + $0x148] sm:$0xff]  ;;  %v4866_v54 = vld [vmem:[%s9374_s5 + $0x170] sm:$0xff] }
 0x3f5   : > { %v7217_v47 = vpack.c.bf16 %v4861_v34, %v4860_v29  ;;  %v4864_v52 = vld [vmem:[%s9374_s5 + $0x160] sm:$0xff]  ;;  %v4865_v53 = vld [vmem:[%s9374_s5 + $0x168] sm:$0xff]  ;;  %v4867_v1 = vld [vmem:[%s9374_s5 + $0x178] sm:$0xff] }
 0x3f6   : > { %v3481_v55 = vld [vmem:[#allocation4 + $0x5b] ss:$2 sm:$0x1f]  ;;  %v3483_v36 = vld [vmem:[#allocation4 + $0x5c] ss:$2 sm:$0x1f]  ;;  %v7225_v43 = vpack.c.bf16 %v4865_v53, %v4864_v52  ;;  %v7229_v35 = vpack.c.bf16 %v4867_v1, %v4866_v54 }
 0x3f7   : > { %v3484_v57 = vmax.f32 %v3481_v55, %v3483_v36  ;;  %v3517_v58 = vld [vmem:[#allocation5 + $0x1] sm:$0xff]  ;;  %v4868_v55 = vld [vmem:[%s9374_s5 + $0x180] sm:$0xff]  ;;  %v4879_v9 = vld [vmem:[%s9374_s5 + $0x1d8] sm:$0xff] }
 0x3f8   : > { %6437 = vmatprep.mubr.f32.mxu1 %v3517_v58  ;;  %v3499_v10 = vld [vmem:[#allocation5] sm:$0xff]  ;;  %v4871_v58 = vld [vmem:[%s9374_s5 + $0x198] sm:$0xff]  ;;  %v4888_v23 = vld [vmem:[%s9374_s5 + $0x220] sm:$0xff] }
 0x3f9   : > { %v3485_v59 = vmax.f32 %v3479_v56, %v3484_v57  ;;  %v3686_v22 = vld [vmem:[#allocation5 + $0x2] sm:$0xff]  ;;  %v4887_v20 = vld [vmem:[%s9374_s5 + $0x218] sm:$0xff]  ;;  %v4892_v28 = vld [vmem:[%s9374_s5 + $0x240] sm:$0xff] }
 0x3fa   : > { %v3488_v60 = vld [vmem:[#allocation4 + $0x68] ss:$2 sm:$0x1f]  ;;  %v3490_v17 = vld [vmem:[#allocation4 + $0x69] ss:$2 sm:$0x1f] }
 0x3fb   : > { %3486 = vst [vmem:[#allocation5 + $0xf] sm:$0x1f] %v3485_v59  ;;  %v3491_v62 = vmax.f32 %v3488_v60, %v3490_v17  ;;  %v3493_v37 = vld [vmem:[#allocation4 + $0x75] ss:$2 sm:$0x1f]  ;;  %v4872_v17 = vld [vmem:[%s9374_s5 + $0x1a0] sm:$0xff] }
 0x3fc   : > { %v3495_v63 = vld [vmem:[#allocation4 + $0x76] ss:$2 sm:$0x1f]  ;;  %v4895_v51 = vld [vmem:[%s9374_s5 + $0x258] sm:$0xff]  ;;  %v4904_v1 = vld [vmem:[%s9374_s5 + $0x2a0] sm:$0xff] }
 0x3fd   : > { %v3496_v49 = vmax.f32 %v3493_v37, %v3495_v63  ;;  %v4869_v36 = vld [vmem:[%s9374_s5 + $0x188] sm:$0xff]  ;;  %v4870_v57 = vld [vmem:[%s9374_s5 + $0x190] sm:$0xff]  ;;  %v4899_v29 = vld [vmem:[%s9374_s5 + $0x278] sm:$0xff] }
 0x3fe   : > { %v7233_v56 = vpack.c.bf16 %v4869_v36, %v4868_v55  ;;  %v7237_v59 = vpack.c.bf16 %v4871_v58, %v4870_v57  ;;  %v3782_v37 = vld [vmem:[#allocation5 + $0x5] sm:$0xff]  ;;  %v4903_v52 = vld [vmem:[%s9374_s5 + $0x298] sm:$0xff]  ;;  %v4378_v55 = vld [vmem:[%s9376_s7] sm:$0xff] }
 0x3ff   : > { %v3497_v7 = vmax.f32 %v3491_v62, %v3496_v49  ;;  %v4873_v62 = vld [vmem:[%s9374_s5 + $0x1a8] sm:$0xff]  ;;  %v4874_v49 = vld [vmem:[%s9374_s5 + $0x1b0] sm:$0xff]  ;;  %v4381_v58 = vld [vmem:[%s9376_s7 + $0x18] sm:$0xff] }
 0x400   : > { %v7241_v63 = vpack.c.bf16 %v4873_v62, %v4872_v17  ;;  %v4881_v11 = vld [vmem:[%s9374_s5 + $0x1e8] sm:$0xff]  ;;  %v4890_v26 = vld [vmem:[%s9374_s5 + $0x230] sm:$0xff]  ;;  %v4907_v62 = vld [vmem:[%s9374_s5 + $0x2b8] sm:$0xff] }
 0x401   : > { %3498 = vst [vmem:[#allocation5 + $0x14] sm:$0x1f] %v3497_v7  ;;  %v4875_v7 = vld [vmem:[%s9374_s5 + $0x1b8] sm:$0xff]  ;;  %v4885_v16 = vld [vmem:[%s9374_s5 + $0x208] sm:$0xff]  ;;  %v4894_v31 = vld [vmem:[%s9374_s5 + $0x250] sm:$0xff] }
 0x402   : > { %v3518_v5 = vld [vmem:[#allocation5 + $0x9] sm:$0xff]  ;;  %v7245_v0 = vpack.c.bf16 %v4875_v7, %v4874_v49  ;;  %v4889_v24 = vld [vmem:[%s9374_s5 + $0x228] sm:$0xff] }
 0x403   : > { %6438 = vmatmul.mubr.f32.vlgmr.msra.gmra.mrb[18].mxu1 %v3518_v5  ;;  %v3500_v6 = vld [vmem:[#allocation5 + $0x8] sm:$0xff]  ;;  %v7273_v25 = vpack.c.bf16 %v4889_v24, %v4888_v23  ;;  %v4897_v41 = vld [vmem:[%s9374_s5 + $0x268] sm:$0xff]  ;;  %v4919_v23 = vld [vmem:[%s9374_s5 + $0x318] sm:$0xff] }
 0x404   : > { %7172 = vmatpush3.bf16.msra.mxu1 %v8756_v15  ;;  %6472 = vmatprep.mubr.f32.mxu1 %v3499_v10  ;;  %v3510_v15 = vld [vmem:[%s9374_s5 + $0x48] sm:$0xff]  ;;  %v8899_v60 = vld [vmem:[#allocation5 + $0xa] sm:$0xff]  ;;  %v7253_v10 = vpack.c.bf16 %v4879_v9, %v4878_v8 }
 0x405   : > { %7174 = vmatprep.subr.bf16.mxu1 %v7173_v4  ;;  %v7185_v14 = vpack.c.bf16 %v3510_v15, %v3509_v13  ;;  %v4883_v13 = vld [vmem:[%s9374_s5 + $0x1f8] sm:$0xff]  ;;  %v4901_v46 = vld [vmem:[%s9374_s5 + $0x288] sm:$0xff]  ;;  %v4906_v17 = vld [vmem:[%s9374_s5 + $0x2b0] sm:$0xff] }
 0x406   : > { %v3974_v53 = vld [vmem:[#allocation5 + $0x7] sm:$0xff]  ;;  %v7309_v7 = vpack.c.bf16 %v4907_v62, %v4906_v17  ;;  %v4385_v8 = vld [vmem:[%s9376_s7 + $0x38] sm:$0xff] }
 0x407   : > { %v4379_v36 = vld [vmem:[%s9376_s7 + $0x8] sm:$0xff] }
 0x408   : > { %7176 = vmatpush3.bf16.msra.mxu1 %v7173_v4  ;;  %v4877_v4 = vld [vmem:[%s9374_s5 + $0x1c8] sm:$0xff]  ;;  %v3879_v54 = vld [vmem:[#allocation5 + $0xe] sm:$0xff]  ;;  %v7426_v57 = vpack.c.bf16 %v4379_v36, %v4378_v55 }
 0x409   : > { %7178 = vmatprep.subr.bf16.mxu1 %v7177_v38  ;;  %v7249_v5 = vpack.c.bf16 %v4877_v4, %v4876_v2  ;;  %v4383_v49 = vld [vmem:[%s9376_s7 + $0x28] sm:$0xff]  ;;  %v4166_v55 = vld [vmem:[#allocation5 + $0xb] sm:$0xff] }
 0x40a   : > { %7427 = vmatpush3.bf16.msra.mxu0 %v7426_v57  ;;  %v4909_v2 = vld [vmem:[%s9374_s5 + $0x2c8] sm:$0xff]  ;;  %v4939_v57 = vld [vmem:[%s9374_s5 + $0x3b8] sm:$0xff] }
 0x40b   : > { %7428 = vmatprep.subr.bf16.mxu0 %v7680_v3  ;;  %v4941_v17 = vld [vmem:[%s9374_s5 + $0x3c8] sm:$0xff] }
 0x40c   : > { %7180 = vmatpush3.bf16.msra.mxu1 %v7177_v38  ;;  %v4880_v38 = vld [vmem:[%s9374_s5 + $0x1e0] sm:$0xff] }
 0x40d   : > { %7182 = vmatprep.subr.bf16.mxu1 %v7181_v61  ;;  %v7257_v12 = vpack.c.bf16 %v4881_v11, %v4880_v38  ;;  %v4911_v38 = vld [vmem:[%s9374_s5 + $0x2d8] sm:$0xff] }
 0x410   : > { %7184 = vmatpush3.bf16.msra.mxu1 %v7181_v61  ;;  %v4882_v61 = vld [vmem:[%s9374_s5 + $0x1f0] sm:$0xff] }
 0x411   : > { %7186 = vmatprep.subr.bf16.mxu1 %v7185_v14  ;;  %v7261_v15 = vpack.c.bf16 %v4883_v13, %v4882_v61  ;;  %v4912_v61 = vld [vmem:[%s9374_s5 + $0x2e0] sm:$0xff]  ;;  %v4913_v13 = vld [vmem:[%s9374_s5 + $0x2e8] sm:$0xff] }
 0x414   : > { %7188 = vmatpush3.bf16.msra.mxu1 %v7185_v14  ;;  %v4884_v14 = vld [vmem:[%s9374_s5 + $0x200] sm:$0xff] }
 0x415   : > { %7190 = vmatprep.subr.bf16.mxu1 %v7189_v19  ;;  %v7265_v18 = vpack.c.bf16 %v4885_v16, %v4884_v14  ;;  %v4914_v14 = vld [vmem:[%s9374_s5 + $0x2f0] sm:$0xff]  ;;  %v4915_v16 = vld [vmem:[%s9374_s5 + $0x2f8] sm:$0xff] }
 0x418   : > { %7192 = vmatpush3.bf16.msra.mxu1 %v7189_v19  ;;  %v4886_v19 = vld [vmem:[%s9374_s5 + $0x210] sm:$0xff] }
 0x419   : > { %7194 = vmatprep.subr.bf16.mxu1 %v7193_v39  ;;  %v7269_v21 = vpack.c.bf16 %v4887_v20, %v4886_v19  ;;  %v4916_v19 = vld [vmem:[%s9374_s5 + $0x300] sm:$0xff]  ;;  %v4917_v20 = vld [vmem:[%s9374_s5 + $0x308] sm:$0xff] }
 0x41c   : > { %7196 = vmatpush3.bf16.msra.mxu1 %v7193_v39  ;;  %v3783_v39 = vld [vmem:[#allocation5 + $0xd] sm:$0xff] }
 0x41d   : > { %7198 = vmatprep.subr.bf16.mxu1 %v7197_v40 }
 0x420   : > { %7200 = vmatpush3.bf16.msra.mxu1 %v7197_v40  ;;  %v3878_v40 = vld [vmem:[#allocation5 + $0x6] sm:$0xff] }
 0x421   : > { %7202 = vmatprep.subr.bf16.mxu1 %v7201_v27 }
 0x423   : > { %6473 = vmatmul.mubr.f32.vlgmr.msra.gmra.mrb[18].mxu1 %v3500_v6 }
 0x424   : > { %7204 = vmatpush3.bf16.msra.mxu1 %v7201_v27  ;;  %6507 = vmatprep.mubr.f32.mxu1 %v3686_v22  ;;  %v4891_v27 = vld [vmem:[%s9374_s5 + $0x238] sm:$0xff]  ;;  %v7285_v22 = vpack.c.bf16 %v4895_v51, %v4894_v31  ;;  %v4926_v51 = vld [vmem:[%s9374_s5 + $0x350] sm:$0xff] }
 0x425   : > { %7206 = vmatprep.subr.bf16.mxu1 %v7205_v30  ;;  %v7277_v42 = vpack.c.bf16 %v4891_v27, %v4890_v26  ;;  %v4921_v26 = vld [vmem:[%s9374_s5 + $0x328] sm:$0xff] }
 0x428   : > { %7208 = vmatpush3.bf16.msra.mxu1 %v7205_v30  ;;  %v4893_v30 = vld [vmem:[%s9374_s5 + $0x248] sm:$0xff] }
 0x429   : > { %7210 = vmatprep.subr.bf16.mxu1 %v7209_v32  ;;  %v7281_v6 = vpack.c.bf16 %v4893_v30, %v4892_v28  ;;  %v4923_v28 = vld [vmem:[%s9374_s5 + $0x338] sm:$0xff] }
 0x42c   : > { %7212 = vmatpush3.bf16.msra.mxu1 %v7209_v32  ;;  %v4896_v32 = vld [vmem:[%s9374_s5 + $0x260] sm:$0xff] }
 0x42d   : > { %7214 = vmatprep.subr.bf16.mxu1 %v7213_v45  ;;  %v7289_v33 = vpack.c.bf16 %v4897_v41, %v4896_v32  ;;  %v4928_v41 = vld [vmem:[%s9374_s5 + $0x360] sm:$0xff] }
 0x430   : > { %7216 = vmatpush3.bf16.msra.mxu1 %v7213_v45  ;;  %v4898_v45 = vld [vmem:[%s9374_s5 + $0x270] sm:$0xff] }
 0x431   : > { %7218 = vmatprep.subr.bf16.mxu1 %v7217_v47  ;;  %v7293_v34 = vpack.c.bf16 %v4899_v29, %v4898_v45  ;;  %v4930_v29 = vld [vmem:[%s9374_s5 + $0x370] sm:$0xff] }
 0x434   : > { %7220 = vmatpush3.bf16.msra.mxu1 %v7217_v47  ;;  %v4900_v47 = vld [vmem:[%s9374_s5 + $0x280] sm:$0xff] }
 0x435   : > { %7222 = vmatprep.subr.bf16.mxu1 %v7221_v50  ;;  %v7297_v48 = vpack.c.bf16 %v4901_v46, %v4900_v47  ;;  %v4932_v46 = vld [vmem:[%s9374_s5 + $0x380] sm:$0xff] }
 0x438   : > { %7224 = vmatpush3.bf16.msra.mxu1 %v7221_v50  ;;  %v4902_v50 = vld [vmem:[%s9374_s5 + $0x290] sm:$0xff] }
 0x439   : > { %7226 = vmatprep.subr.bf16.mxu1 %v7225_v43 }
 0x43c   : > { %7228 = vmatpush3.bf16.msra.mxu1 %v7225_v43  ;;  %v7301_v43 = vpack.c.bf16 %v4903_v52, %v4902_v50  ;;  %v4934_v52 = vld [vmem:[%s9374_s5 + $0x390] sm:$0xff] }
 0x43d   : > { %7230 = vmatprep.subr.bf16.mxu1 %v7229_v35 }
 0x440   : > { %7232 = vmatpush3.bf16.msra.mxu1 %v7229_v35  ;;  %v4905_v35 = vld [vmem:[%s9374_s5 + $0x2a8] sm:$0xff] }
 0x441   : > { %7234 = vmatprep.subr.bf16.mxu1 %v7233_v56 }
 0x443   : > { %6508 = vmatmul.mubr.f32.vlgmr.msra.gmra.mrb[18].mxu1 %v8899_v60 }
 0x444   : > { %7236 = vmatpush3.bf16.msra.mxu1 %v7233_v56  ;;  %6542 = vmatprep.mubr.f32.mxu1 %v3782_v37  ;;  %v4380_v56 = vld [vmem:[%s9376_s7 + $0x10] sm:$0xff] }
 0x445   : > { %7238 = vmatprep.subr.bf16.mxu1 %v7237_v59  ;;  %v7429_v37 = vpack.c.bf16 %v4381_v58, %v4380_v56  ;;  %v4938_v56 = vld [vmem:[%s9374_s5 + $0x3b0] sm:$0xff] }
 0x446   : > { %v7373_v58 = vpack.c.bf16 %v4939_v57, %v4938_v56 }
 0x447   : > { %7430 = vmatpush3.bf16.msra.mxu0 %v7429_v37  ;;  %v4942_v37 = vld [vmem:[%s9374_s5 + $0x3d0] sm:$0xff] }
 0x448   : > { %7240 = vmatpush3.bf16.msra.mxu1 %v7237_v59  ;;  %v7305_v59 = vpack.c.bf16 %v4905_v35, %v4904_v1  ;;  %7431 = vmatprep.subr.bf16.mxu0 %v7680_v3  ;;  %v4936_v1 = vld [vmem:[%s9374_s5 + $0x3a0] sm:$0xff]  ;;  %v4937_v35 = vld [vmem:[%s9374_s5 + $0x3a8] sm:$0xff] }
 0x449   : > { %7242 = vmatprep.subr.bf16.mxu1 %v7241_v63  ;;  %v7369_v36 = vpack.c.bf16 %v4937_v35, %v4936_v1  ;;  %v4466_v35 = vld [vmem:[%s9378_s9] sm:$0xff] }
 0x44c   : > { %7244 = vmatpush3.bf16.msra.mxu1 %v7241_v63  ;;  %v4382_v63 = vld [vmem:[%s9376_s7 + $0x20] sm:$0xff] }
 0x44d   : > { %7246 = vmatprep.subr.bf16.mxu1 %v7245_v0  ;;  %v7432_v4 = vpack.c.bf16 %v4383_v49, %v4382_v63  ;;  %v4943_v63 = vld [vmem:[%s9374_s5 + $0x3d8] sm:$0xff] }
 0x44e   : > { %v7381_v49 = vpack.c.bf16 %v4943_v63, %v4942_v37  ;;  %v4468_v63 = vld [vmem:[%s9378_s9 + $0x10] sm:$0xff] }
 0x44f   : > { %7433 = vmatpush3.bf16.msra.mxu0 %v7432_v4  ;;  %v4946_v4 = vld [vmem:[%s9374_s5 + $0x3f0] sm:$0xff] }
 0x450   : > { %7248 = vmatpush3.bf16.msra.mxu1 %v7245_v0  ;;  %v4908_v0 = vld [vmem:[%s9374_s5 + $0x2c0] sm:$0xff]  ;;  %7434 = vmatprep.subr.bf16.mxu0 %v7680_v3 }
 0x451   : > { %7250 = vmatprep.subr.bf16.mxu1 %v7249_v5  ;;  %v7313_v9 = vpack.c.bf16 %v4909_v2, %v4908_v0  ;;  %v4945_v0 = vld [vmem:[%s9374_s5 + $0x3e8] sm:$0xff] }
 0x454   : > { %7252 = vmatpush3.bf16.msra.mxu1 %v7249_v5  ;;  %v4384_v5 = vld [vmem:[%s9376_s7 + $0x30] sm:$0xff] }
 0x455   : > { %7254 = vmatprep.subr.bf16.mxu1 %v7253_v10  ;;  %v7435_v11 = vpack.c.bf16 %v4385_v8, %v4384_v5  ;;  %v4947_v5 = vld [vmem:[%s9374_s5 + $0x3f8] sm:$0xff] }
 0x456   : > { %v7389_v8 = vpack.c.bf16 %v4947_v5, %v4946_v4  ;;  %v4472_v5 = vld [vmem:[%s9378_s9 + $0x30] sm:$0xff] }
 0x457   : > { %7436 = vmatpush3.bf16.msra.mxu0 %v7435_v11  ;;  %v4950_v11 = vld [vmem:[%s9374_s5 + $0x410] sm:$0xff] }
 0x458   : > { %7256 = vmatpush3.bf16.msra.mxu1 %v7253_v10  ;;  %v4910_v10 = vld [vmem:[%s9374_s5 + $0x2d0] sm:$0xff]  ;;  %7437 = vmatprep.subr.bf16.mxu0 %v7680_v3 }
 0x459   : > { %7258 = vmatprep.subr.bf16.mxu1 %v7257_v12 }
 0x45c   : > { %7260 = vmatpush3.bf16.msra.mxu1 %v7257_v12  ;;  %v7317_v12 = vpack.c.bf16 %v4911_v38, %v4910_v10  ;;  %v4949_v10 = vld [vmem:[%s9374_s5 + $0x408] sm:$0xff] }
 0x45d   : > { %7262 = vmatprep.subr.bf16.mxu1 %v7261_v15 }
 0x460   : > { %7264 = vmatpush3.bf16.msra.mxu1 %v7261_v15  ;;  %v7321_v15 = vpack.c.bf16 %v4913_v13, %v4912_v61  ;;  %v4167_v13 = vld [vmem:[#allocation5 + $0x13] sm:$0xff] }
 0x461   : > { %7266 = vmatprep.subr.bf16.mxu1 %v7265_v18 }
 0x463   : > { %6543 = vmatmul.mubr.f32.vlgmr.msra.gmra.mrb[18].mxu1 %v3783_v39  ;;  %v4918_v39 = vld [vmem:[%s9374_s5 + $0x310] sm:$0xff] }
 0x464   : > { %7268 = vmatpush3.bf16.msra.mxu1 %v7265_v18  ;;  %6577 = vmatprep.mubr.f32.mxu1 %v3878_v40  ;;  %v7325_v18 = vpack.c.bf16 %v4915_v16, %v4914_v14  ;;  %v7333_v24 = vpack.c.bf16 %v4919_v23, %v4918_v39  ;;  %v3975_v40 = vld [vmem:[#allocation5 + $0xf] sm:$0xff]  ;;  %v4953_v14 = vld [vmem:[%s9374_s5 + $0x428] sm:$0xff]  ;;  %v4956_v39 = vld [vmem:[%s9374_s5 + $0x440] sm:$0xff] }
 0x465   : > { %7270 = vmatprep.subr.bf16.mxu1 %v7269_v21  ;;  %v4262_v16 = vld [vmem:[#allocation5 + $0xc] sm:$0xff]  ;;  %v4957_v23 = vld [vmem:[%s9374_s5 + $0x448] sm:$0xff] }
 0x468   : > { %7272 = vmatpush3.bf16.msra.mxu1 %v7269_v21  ;;  %v7329_v21 = vpack.c.bf16 %v4917_v20, %v4916_v19  ;;  %v4954_v19 = vld [vmem:[%s9374_s5 + $0x430] sm:$0xff]  ;;  %v4955_v20 = vld [vmem:[%s9374_s5 + $0x438] sm:$0xff] }
 0x469   : > { %7274 = vmatprep.subr.bf16.mxu1 %v7273_v25 }
 0x46c   : > { %7276 = vmatpush3.bf16.msra.mxu1 %v7273_v25  ;;  %v4920_v25 = vld [vmem:[%s9374_s5 + $0x320] sm:$0xff] }
 0x46d   : > { %7278 = vmatprep.subr.bf16.mxu1 %v7277_v42  ;;  %v7337_v27 = vpack.c.bf16 %v4921_v26, %v4920_v25  ;;  %v4959_v25 = vld [vmem:[%s9374_s5 + $0x458] sm:$0xff] }
 0x470   : > { %7280 = vmatpush3.bf16.msra.mxu1 %v7277_v42  ;;  %v4922_v42 = vld [vmem:[%s9374_s5 + $0x330] sm:$0xff] }
 0x471   : > { %7282 = vmatprep.subr.bf16.mxu1 %v7281_v6  ;;  %v7341_v30 = vpack.c.bf16 %v4923_v28, %v4922_v42  ;;  %v4961_v42 = vld [vmem:[%s9374_s5 + $0x468] sm:$0xff] }
 0x474   : > { %7284 = vmatpush3.bf16.msra.mxu1 %v7281_v6  ;;  %v4924_v6 = vld [vmem:[%s9374_s5 + $0x340] sm:$0xff] }
 0x475   : > { %7286 = vmatprep.subr.bf16.mxu1 %v7285_v22 }
 0x478   : > { %7288 = vmatpush3.bf16.msra.mxu1 %v7285_v22  ;;  %v4927_v22 = vld [vmem:[%s9374_s5 + $0x358] sm:$0xff] }
 0x479   : > { %7290 = vmatprep.subr.bf16.mxu1 %v7289_v33  ;;  %v7349_v32 = vpack.c.bf16 %v4927_v22, %v4926_v51  ;;  %v4386_v51 = vld [vmem:[%s9376_s7 + $0x40] sm:$0xff]  ;;  %v4387_v22 = vld [vmem:[%s9376_s7 + $0x48] sm:$0xff] }
 0x47c   : > { %7292 = vmatpush3.bf16.msra.mxu1 %v7289_v33  ;;  %v4929_v33 = vld [vmem:[%s9374_s5 + $0x368] sm:$0xff] }
 0x47d   : > { %7294 = vmatprep.subr.bf16.mxu1 %v7293_v34  ;;  %v7353_v45 = vpack.c.bf16 %v4929_v33, %v4928_v41  ;;  %v4388_v41 = vld [vmem:[%s9376_s7 + $0x50] sm:$0xff]  ;;  %v4389_v33 = vld [vmem:[%s9376_s7 + $0x58] sm:$0xff] }
 0x480   : > { %7296 = vmatpush3.bf16.msra.mxu1 %v7293_v34  ;;  %v4931_v34 = vld [vmem:[%s9374_s5 + $0x378] sm:$0xff] }
 0x481   : > { %7298 = vmatprep.subr.bf16.mxu1 %v7297_v48  ;;  %v7357_v47 = vpack.c.bf16 %v4931_v34, %v4930_v29  ;;  %v7441_v29 = vpack.c.bf16 %v4389_v33, %v4388_v41  ;;  %v4391_v34 = vld [vmem:[%s9376_s7 + $0x68] sm:$0xff] }
 0x482   : > { %v4563_v41 = vld [vmem:[%s9380_s11 + $0x48] sm:$0xff] }
 0x483   : > { %6578 = vmatmul.mubr.f32.vlgmr.msra.gmra.mrb[18].mxu1 %v3879_v54  ;;  %v4071_v54 = vld [vmem:[#allocation5 + $0x12] sm:$0xff] }
 0x484   : > { %7300 = vmatpush3.bf16.msra.mxu1 %v7297_v48  ;;  %6612 = vmatprep.mubr.f32.mxu1 %v3974_v53  ;;  %v4933_v48 = vld [vmem:[%s9374_s5 + $0x388] sm:$0xff]  ;;  %v4935_v53 = vld [vmem:[%s9374_s5 + $0x398] sm:$0xff] }
 0x485   : > { %7302 = vmatprep.subr.bf16.mxu1 %v7301_v43  ;;  %v7361_v50 = vpack.c.bf16 %v4933_v48, %v4932_v46  ;;  %v4392_v46 = vld [vmem:[%s9376_s7 + $0x70] sm:$0xff]  ;;  %v4393_v48 = vld [vmem:[%s9376_s7 + $0x78] sm:$0xff] }
 0x488   : > { %7304 = vmatpush3.bf16.msra.mxu1 %v7301_v43  ;;  %v7365_v43 = vpack.c.bf16 %v4935_v53, %v4934_v52  ;;  %v4964_v52 = vld [vmem:[%s9375_s6] ss:$0 sm:$0xff] }
 0x489   : > { %7306 = vmatprep.subr.bf16.mxu1 %v7305_v59 }
 0x48c   : > { %7308 = vmatpush3.bf16.msra.mxu1 %v7305_v59  ;;  %v4940_v59 = vld [vmem:[%s9374_s5 + $0x3c0] sm:$0xff] }
 0x48d   : > { %7310 = vmatprep.subr.bf16.mxu1 %v7309_v7  ;;  %v7377_v62 = vpack.c.bf16 %v4941_v17, %v4940_v59 }
 0x490   : > { %7312 = vmatpush3.bf16.msra.mxu1 %v7309_v7  ;;  %v4944_v7 = vld [vmem:[%s9374_s5 + $0x3e0] sm:$0xff] }
 0x491   : > { %7314 = vmatprep.subr.bf16.mxu1 %v7313_v9  ;;  %v7385_v2 = vpack.c.bf16 %v4945_v0, %v4944_v7  ;;  %v4470_v0 = vld [vmem:[%s9378_s9 + $0x20] sm:$0xff] }
 0x494   : > { %7316 = vmatpush3.bf16.msra.mxu1 %v7313_v9  ;;  %v4948_v9 = vld [vmem:[%s9374_s5 + $0x400] sm:$0xff] }
 0x495   : > { %7318 = vmatprep.subr.bf16.mxu1 %v7317_v12  ;;  %v7393_v38 = vpack.c.bf16 %v4949_v10, %v4948_v9  ;;  %v4474_v10 = vld [vmem:[%s9378_s9 + $0x40] sm:$0xff] }
 0x498   : > { %7320 = vmatpush3.bf16.msra.mxu1 %v7317_v12  ;;  %v4951_v12 = vld [vmem:[%s9374_s5 + $0x418] sm:$0xff] }
 0x499   : > { %7322 = vmatprep.subr.bf16.mxu1 %v7321_v15  ;;  %v7397_v61 = vpack.c.bf16 %v4951_v12, %v4950_v11  ;;  %v4476_v12 = vld [vmem:[%s9378_s9 + $0x50] sm:$0xff] }
 0x49c   : > { %7324 = vmatpush3.bf16.msra.mxu1 %v7321_v15  ;;  %v4952_v15 = vld [vmem:[%s9374_s5 + $0x420] sm:$0xff] }
 0x49d   : > { %7326 = vmatprep.subr.bf16.mxu1 %v7325_v18 }
 0x4a0   : > { %7328 = vmatpush3.bf16.msra.mxu1 %v7325_v18  ;;  %v7401_v18 = vpack.c.bf16 %v4953_v14, %v4952_v15  ;;  %v4478_v15 = vld [vmem:[%s9378_s9 + $0x60] sm:$0xff]  ;;  %v4479_v14 = vld [vmem:[%s9378_s9 + $0x68] sm:$0xff] }
 0x4a1   : > { %7330 = vmatprep.subr.bf16.mxu1 %v7329_v21 }
 0x4a3   : > { %6613 = vmatmul.mubr.f32.vlgmr.msra.gmra.mrb[18].mxu1 %v3975_v40  ;;  %v4958_v40 = vld [vmem:[%s9374_s5 + $0x450] sm:$0xff] }
 0x4a4   : > { %7332 = vmatpush3.bf16.msra.mxu1 %v7329_v21  ;;  %6647 = vmatprep.mubr.f32.mxu1 %v8899_v60  ;;  %v4925_v60 = vld [vmem:[%s9374_s5 + $0x348] sm:$0xff]  ;;  %v7405_v21 = vpack.c.bf16 %v4955_v20, %v4954_v19  ;;  %v7413_v26 = vpack.c.bf16 %v4959_v25, %v4958_v40  ;;  %v4481_v19 = vld [vmem:[%s9378_s9 + $0x78] sm:$0xff] }
 0x4a5   : > { %7334 = vmatprep.subr.bf16.mxu1 %v7333_v24  ;;  %v7345_v31 = vpack.c.bf16 %v4925_v60, %v4924_v6  ;;  %v4963_v6 = vld [vmem:[%s9374_s5 + $0x478] sm:$0xff] }
 0x4a8   : > { %7336 = vmatpush3.bf16.msra.mxu1 %v7333_v24  ;;  %v7409_v24 = vpack.c.bf16 %v4957_v23, %v4956_v39  ;;  %v4554_v39 = vld [vmem:[%s9380_s11] sm:$0xff]  ;;  %v4555_v23 = vld [vmem:[%s9380_s11 + $0x8] sm:$0xff] }
 0x4a9   : > { %7338 = vmatprep.subr.bf16.mxu1 %v7337_v27 }
 0x4ac   : > { %7340 = vmatpush3.bf16.msra.mxu1 %v7337_v27  ;;  %v4960_v27 = vld [vmem:[%s9374_s5 + $0x460] sm:$0xff] }
 0x4ad   : > { %7342 = vmatprep.subr.bf16.mxu1 %v7341_v30  ;;  %v7417_v28 = vpack.c.bf16 %v4961_v42, %v4960_v27  ;;  %v4556_v42 = vld [vmem:[%s9380_s11 + $0x10] sm:$0xff] }
 0x4b0   : > { %7344 = vmatpush3.bf16.msra.mxu1 %v7341_v30  ;;  %v4962_v30 = vld [vmem:[%s9374_s5 + $0x470] sm:$0xff] }
 0x4b1   : > { %7346 = vmatprep.subr.bf16.mxu1 %v7345_v31  ;;  %v7421_v60 = vpack.c.bf16 %v4963_v6, %v4962_v30  ;;  %v4558_v6 = vld [vmem:[%s9380_s11 + $0x20] sm:$0xff] }
 0x4b4   : > { %7348 = vmatpush3.bf16.msra.mxu1 %v7345_v31  ;;  %v4263_v31 = vld [vmem:[#allocation5 + $0x14] sm:$0xff] }
 0x4b5   : > { %7350 = vmatprep.subr.bf16.mxu1 %v7349_v32 }
 0x4b8   : > { %7352 = vmatpush3.bf16.msra.mxu1 %v7349_v32  ;;  %v7438_v32 = vpack.c.bf16 %v4387_v22, %v4386_v51  ;;  %v4560_v51 = vld [vmem:[%s9380_s11 + $0x30] sm:$0xff] }
 0x4b9   : > { %7354 = vmatprep.subr.bf16.mxu1 %v7353_v45 }
 0x4ba   : > { %7439 = vmatpush3.bf16.msra.mxu0 %v7438_v32  ;;  %v4562_v32 = vld [vmem:[%s9380_s11 + $0x40] sm:$0xff] }
 0x4bb   : > { %7440 = vmatprep.subr.bf16.mxu0 %v7680_v3  ;;  %v7486_v33 = vpack.c.bf16 %v4563_v41, %v4562_v32 }
 0x4bc   : > { %7356 = vmatpush3.bf16.msra.mxu1 %v7353_v45  ;;  %v4390_v45 = vld [vmem:[%s9376_s7 + $0x60] sm:$0xff] }
 0x4bd   : > { %7358 = vmatprep.subr.bf16.mxu1 %v7357_v47 }
 0x4be   : > { %7442 = vmatpush3.bf16.msra.mxu0 %v7441_v29  ;;  %v4565_v29 = vld [vmem:[%s9380_s11 + $0x58] sm:$0xff] }
 0x4bf   : > { %7443 = vmatprep.subr.bf16.mxu0 %v7680_v3 }
 0x4c0   : > { %7360 = vmatpush3.bf16.msra.mxu1 %v7357_v47  ;;  %v7444_v47 = vpack.c.bf16 %v4391_v34, %v4390_v45  ;;  %v4564_v45 = vld [vmem:[%s9380_s11 + $0x50] sm:$0xff] }
 0x4c1   : > { %7362 = vmatprep.subr.bf16.mxu1 %v7361_v50  ;;  %v7489_v34 = vpack.c.bf16 %v4565_v29, %v4564_v45 }
 0x4c2   : > { %7445 = vmatpush3.bf16.msra.mxu0 %v7444_v47  ;;  %v4566_v47 = vld [vmem:[%s9380_s11 + $0x60] sm:$0xff] }
 0x4c3   : > { %6648 = vmatmul.mubr.f32.vlgmr.msra.gmra.mrb[18].mxu1 %v4071_v54  ;;  %7446 = vmatprep.subr.bf16.mxu0 %v7680_v3 }
 0x4c4   : > { %7364 = vmatpush3.bf16.msra.mxu1 %v7361_v50  ;;  %6682 = vmatprep.mubr.f32.mxu1 %v4166_v55  ;;  %v7447_v50 = vpack.c.bf16 %v4393_v48, %v4392_v46  ;;  %v4467_v55 = vld [vmem:[%s9378_s9 + $0x8] sm:$0xff] }
 0x4c5   : > { %7366 = vmatprep.subr.bf16.mxu1 %v7365_v43  ;;  %v4567_v46 = vld [vmem:[%s9380_s11 + $0x68] sm:$0xff] }
 0x4c6   : > { %7448 = vmatpush3.bf16.msra.mxu0 %v7447_v50  ;;  %v7492_v48 = vpack.c.bf16 %v4567_v46, %v4566_v47  ;;  %v4568_v50 = vld [vmem:[%s9380_s11 + $0x70] sm:$0xff] }
 0x4c7   : > { %7449 = vmatprep.subr.bf16.mxu0 %v7680_v3 }
 0x4c8   : > { %7368 = vmatpush3.bf16.msra.mxu1 %v7365_v43 }
 0x4c9   : > { %7370 = vmatprep.subr.bf16.mxu1 %v7369_v36 }
 0x4cc   : > { %7372 = vmatpush3.bf16.msra.mxu1 %v7369_v36 }
 0x4cd   : > { %7374 = vmatprep.subr.bf16.mxu1 %v7373_v58 }
 0x4d0   : > { %7376 = vmatpush3.bf16.msra.mxu1 %v7373_v58 }
 0x4d1   : > { %7378 = vmatprep.subr.bf16.mxu1 %v7377_v62 }
 0x4d4   : > { %7380 = vmatpush3.bf16.msra.mxu1 %v7377_v62  ;;  %v7450_v62 = vpack.c.bf16 %v4467_v55, %v4466_v35 }
 0x4d5   : > { %7382 = vmatprep.subr.bf16.mxu1 %v7381_v49 }
 0x4d8   : > { %7384 = vmatpush3.bf16.msra.mxu1 %v7381_v49  ;;  %v4469_v49 = vld [vmem:[%s9378_s9 + $0x18] sm:$0xff] }
 0x4d9   : > { %7386 = vmatprep.subr.bf16.mxu1 %v7385_v2  ;;  %v7453_v7 = vpack.c.bf16 %v4469_v49, %v4468_v63 }
 0x4dc   : > { %7388 = vmatpush3.bf16.msra.mxu1 %v7385_v2  ;;  %v4471_v2 = vld [vmem:[%s9378_s9 + $0x28] sm:$0xff] }
 0x4dd   : > { %7390 = vmatprep.subr.bf16.mxu1 %v7389_v8  ;;  %v7456_v4 = vpack.c.bf16 %v4471_v2, %v4470_v0 }
 0x4e0   : > { %7392 = vmatpush3.bf16.msra.mxu1 %v7389_v8  ;;  %v4473_v8 = vld [vmem:[%s9378_s9 + $0x38] sm:$0xff] }
 0x4e1   : > { %7394 = vmatprep.subr.bf16.mxu1 %v7393_v38  ;;  %v7459_v9 = vpack.c.bf16 %v4473_v8, %v4472_v5 }
 0x4e3   : > { %6683 = vmatmul.mubr.f32.vlgmr.msra.gmra.mrb[18].mxu1 %v4167_v13 }
 0x4e4   : > { %7396 = vmatpush3.bf16.msra.mxu1 %v7393_v38  ;;  %6717 = vmatprep.mubr.f32.mxu1 %v4262_v16  ;;  %v4475_v38 = vld [vmem:[%s9378_s9 + $0x48] sm:$0xff]  ;;  %v7468_v16 = vpack.c.bf16 %v4479_v14, %v4478_v15 }
 0x4e5   : > { %7398 = vmatprep.subr.bf16.mxu1 %v7397_v61  ;;  %v7462_v11 = vpack.c.bf16 %v4475_v38, %v4474_v10 }
 0x4e8   : > { %7400 = vmatpush3.bf16.msra.mxu1 %v7397_v61  ;;  %v4477_v61 = vld [vmem:[%s9378_s9 + $0x58] sm:$0xff] }
 0x4e9   : > { %7402 = vmatprep.subr.bf16.mxu1 %v7401_v18  ;;  %v7465_v13 = vpack.c.bf16 %v4477_v61, %v4476_v12 }
 0x4ec   : > { %7404 = vmatpush3.bf16.msra.mxu1 %v7401_v18  ;;  %v4480_v18 = vld [vmem:[%s9378_s9 + $0x70] sm:$0xff] }
 0x4ed   : > { %7406 = vmatprep.subr.bf16.mxu1 %v7405_v21  ;;  %v7471_v20 = vpack.c.bf16 %v4481_v19, %v4480_v18 }
 0x4f0   : > { %7408 = vmatpush3.bf16.msra.mxu1 %v7405_v21  ;;  %v4394_v21 = vld [vmem:[%s9377_s8] sm:$0x1] }
 0x4f1   : > { %7410 = vmatprep.subr.bf16.mxu1 %v7409_v24 }
 0x4f4   : > { %7412 = vmatpush3.bf16.msra.mxu1 %v7409_v24 }
 0x4f5   : > { %7414 = vmatprep.subr.bf16.mxu1 %v7413_v26 }
 0x4f8   : > { %7416 = vmatpush3.bf16.msra.mxu1 %v7413_v26  ;;  %v7474_v26 = vpack.c.bf16 %v4555_v23, %v4554_v39 }
 0x4f9   : > { %7418 = vmatprep.subr.bf16.mxu1 %v7417_v28 }
 0x4fc   : > { %7420 = vmatpush3.bf16.msra.mxu1 %v7417_v28  ;;  %v4557_v28 = vld [vmem:[%s9380_s11 + $0x18] sm:$0xff] }
 0x4fd   : > { %7422 = vmatprep.subr.bf16.mxu1 %v7421_v60  ;;  %v7477_v30 = vpack.c.bf16 %v4557_v28, %v4556_v42 }
 0x500   : > { %7424 = vmatpush3.bf16.msra.mxu1 %v7421_v60  ;;  %v4559_v60 = vld [vmem:[%s9380_s11 + $0x28] sm:$0xff] }
 0x503   : > { %6718 = vmatmul.mubr.f32.vlgmr.msra.gmra.mrb[18].mxu1 %v4263_v31  ;;  %v7480_v31 = vpack.c.bf16 %v4559_v60, %v4558_v6 }
 0x5d6   : > { %v6719_v53 = vpop.f32.mrb[18].mxu1 }
 0x5d7   : > { %v4347_v43 = vpop.f32.mrb[19].mxu1 }
 0x5d8   : > { %v4365_v54 = vadd.f32 %v4964_v52, %v4347_v43  ;;  %v4569_v52 = vld [vmem:[%s9380_s11 + $0x78] sm:$0xff]  ;;  %v4482_v43 = vld [vmem:[%s9379_s10] sm:$0x1] }
 0x5d9   : > { %v7495_v53 = vpack.c.bf16 %v4569_v52, %v4568_v50 }
 0x5da   : > { %v4367_v1 = vmax.f32 %v4365_v54, 0.0 }
 0x5dc   : > { %4369 = vst [vmem:[#allocation6] sm:$0xff] %v4367_v1 }
 0x5e3   : > { %v4371_v36 = vld [vmem:[#allocation6] sm:$0x1]  ;;  %v4372_v56 = vld [vmem:[#allocation6 + $0x1] sm:$0x1]  ;;  %v4374_v57 = vld [vmem:[#allocation6 + $0x5] sm:$0x1] }
 0x5e4   : > { %v4373_v58 = vmax.f32 %v4371_v36, %v4372_v56  ;;  %v4375_v59 = vld [vmem:[#allocation6 + $0x6] sm:$0x1]  ;;  %v4570_v56 = vld [vmem:[%s9381_s12] sm:$0x1] }
 0x5e5   : > { %v4376_v17 = vmax.f32 %v4374_v57, %v4375_v59 }
 0x5e7   : > { %v4377_v37 = vmax.f32 %v4373_v58, %v4376_v17 }
 0x5e9   : > { %6753 = vmatmul.mubr.f32.vlgmr.msra.gmra.mrb[188].mxu0 %v4377_v37 }
 0x5ea   : > { %7451 = vmatpush3.bf16.msra.mxu0 %v7450_v62  ;;  %6787 = vmatprep.mubr.msk.f32.mxu0 %vm7681_vm0, %v8482_v44 }
 0x5eb   : > { %7452 = vmatprep.subr.bf16.mxu0 %v7680_v3 }
 0x5ee   : > { %7454 = vmatpush3.bf16.msra.mxu0 %v7453_v7 }
 0x5ef   : > { %7455 = vmatprep.subr.bf16.mxu0 %v7680_v3 }
 0x5f2   : > { %7457 = vmatpush3.bf16.msra.mxu0 %v7456_v4 }
 0x5f3   : > { %7458 = vmatprep.subr.bf16.mxu0 %v7680_v3 }
 0x5f6   : > { %7460 = vmatpush3.bf16.msra.mxu0 %v7459_v9 }
 0x5f7   : > { %7461 = vmatprep.subr.bf16.mxu0 %v7680_v3 }
 0x5fa   : > { %7463 = vmatpush3.bf16.msra.mxu0 %v7462_v11 }
 0x5fb   : > { %7464 = vmatprep.subr.bf16.mxu0 %v7680_v3 }
 0x5fe   : > { %7466 = vmatpush3.bf16.msra.mxu0 %v7465_v13 }
 0x5ff   : > { %7467 = vmatprep.subr.bf16.mxu0 %v7680_v3 }
 0x602   : > { %7469 = vmatpush3.bf16.msra.mxu0 %v7468_v16 }
 0x603   : > { %7470 = vmatprep.subr.bf16.mxu0 %v7680_v3 }
 0x606   : > { %7472 = vmatpush3.bf16.msra.mxu0 %v7471_v20 }
 0x607   : > { %7473 = vmatprep.subr.bf16.mxu0 %v7680_v3 }
 0x6bc   : > { %v4461_v24 = vpop.f32.mrb[188].mxu0 }
 0x6bd   : > { %v4462_v40 = vadd.f32 %v4461_v24, %v4394_v21  ;;  %v6754_v25 = vpop.f32.mrb[189].mxu0 }
 0x6bf   : > { %v4465_v27 = vmax.f32 %v4462_v40, 0.0 }
 0x6c1   : > { %6788 = vmatmul.mubr.f32.vlgmr.msra.gmra.mrb[190].mxu0 %v4465_v27 }
 0x6c2   : > { %7475 = vmatpush3.bf16.msra.mxu0 %v7474_v26  ;;  %6822 = vmatprep.mubr.msk.f32.mxu0 %vm7681_vm0, %v8482_v44  ;;  %v4561_v44 = vld [vmem:[%s9380_s11 + $0x38] sm:$0xff] }
 0x6c3   : > { %7476 = vmatprep.subr.bf16.mxu0 %v7680_v3  ;;  %v7483_v22 = vpack.c.bf16 %v4561_v44, %v4560_v51 }
 0x6c6   : > { %7478 = vmatpush3.bf16.msra.mxu0 %v7477_v30 }
 0x6c7   : > { %7479 = vmatprep.subr.bf16.mxu0 %v7680_v3 }
 0x6ca   : > { %7481 = vmatpush3.bf16.msra.mxu0 %v7480_v31 }
 0x6cb   : > { %7482 = vmatprep.subr.bf16.mxu0 %v7680_v3 }
 0x6ce   : > { %7484 = vmatpush3.bf16.msra.mxu0 %v7483_v22 }
 0x6cf   : > { %7485 = vmatprep.subr.bf16.mxu0 %v7680_v3 }
 0x6d2   : > { %7487 = vmatpush3.bf16.msra.mxu0 %v7486_v33 }
 0x6d3   : > { %7488 = vmatprep.subr.bf16.mxu0 %v7680_v3 }
 0x6d6   : > { %7490 = vmatpush3.bf16.msra.mxu0 %v7489_v34 }
 0x6d7   : > { %7491 = vmatprep.subr.bf16.mxu0 %v7680_v3 }
 0x6da   : > { %7493 = vmatpush3.bf16.msra.mxu0 %v7492_v48 }
 0x6db   : > { %7494 = vmatprep.subr.bf16.mxu0 %v7680_v3  ;;  %v4641_v3 = vlaneseq }
 0x6dd   : > { %v4642_v36 = vshrl.u32 %v4641_v3, 7 }
 0x6de   : > { %7496 = vmatpush3.bf16.msra.mxu0 %v7495_v53 }
 0x6df   : > { %v4643_v57 = vsub.s32 0, %v4642_v36 }
 0x794   : > { %v4549_v54 = vpop.f32.mrb[190].mxu0 }
 0x795   : > { %v4550_v1 = vadd.f32 %v4549_v54, %v4482_v43  ;;  %v6789_v35 = vpop.f32.mrb[191].mxu0 }
 0x797   : > { %v4553_v55 = vmax.f32 %v4550_v1, 0.0 }
 0x799   : > { %6823 = vmatmul.mubr.f32.vlgmr.msra.gmra.mrb[192].mxu0 %v4553_v55 }
 0x86c   : > { %v4637_v58 = vpop.f32.mrb[192].mxu0 }
 0x86d   : > { %v4638_v59 = vadd.f32 %v4637_v58, %v4570_v56  ;;  %v6824_v17 = vpop.f32.mrb[193].mxu0 }
 0x86f   : > { %v4644_v62 = vrot.slane %v4638_v59, %v4643_v57 }
 0x871   : > { %4645 = vst [vmem:[%s438_s19] sm:$0xff] %v4644_v62 }
 0x872 PF: > { %s23_s25 = sadd.s32 1, %s7678_s25  }
 0x873   : > { %p20_p4 = scmp.ge.s32.totalorder %s23_s25, 6  }
 0x875   :  { %22 = sbr.rel (!%p20_p4) target bundleno = 1 (0x1), region = 240 }

</bundles_post_ra>
